<compile_context>
chip_gen: v7x
topology: tpu7x:2x2x1
jax: 0.10.0
libtpu: 0.0.40
codegen_flags: <defaults>
</compile_context>

<pallas_src>
import math
from functools import partial

import jax
import jax.numpy as jnp
from jax.experimental import pallas as pl
from jax.experimental.pallas import tpu as pltpu


# --------------------------- in-kernel helpers ---------------------------

_SQRT_HALF = 1.0 / math.sqrt(2.0)


def _erf(x):
    # Abramowitz & Stegun 7.1.26 (|err| < 1.5e-7): matches PyTorch's exact-erf GELU
    # without relying on an erf primitive in the Mosaic lowering.
    a1, a2, a3, a4, a5 = 0.254829592, -0.284496736, 1.421413741, -1.453152027, 1.061405429
    p = 0.3275911
    ax = jnp.abs(x)
    t = 1.0 / (1.0 + p * ax)
    poly = ((((a5 * t + a4) * t + a3) * t + a2) * t + a1) * t
    y = 1.0 - poly * jnp.exp(-ax * ax)
    return jnp.where(x >= 0, y, -y)


def _gelu_exact(x):
    return 0.5 * x * (1.0 + _erf(x * _SQRT_HALF))


def _layer_norm(x, g, b, eps=1e-5):
    mu = jnp.mean(x, axis=-1, keepdims=True)
    xc = x - mu
    var = jnp.mean(xc * xc, axis=-1, keepdims=True)
    return xc * jax.lax.rsqrt(var + eps) * g + b


# --------------------------- transformer kernels ---------------------------

def _attn_kernel(x_ref, ctx_ref, lng_ref, lnb_ref, wq_ref, wk_ref, wv_ref,
                 wo_ref, bo_ref, o_ref, *, heads, dim_head, scale, self_attn):
    """Fused pre-norm attention layer for one batch element (residual included)."""
    x = x_ref[...].astype(jnp.float32)                       # (S, dim)
    xn = _layer_norm(x, lng_ref[...], lnb_ref[...])
    q_in = xn.astype(jnp.bfloat16)
    if self_attn:
        kv_in = q_in                                          # self-attn: normed x
    else:
        kv_in = ctx_ref[...].astype(jnp.bfloat16)             # cross-attn: raw context
    q = jnp.dot(q_in, wq_ref[...], preferred_element_type=jnp.float32)
    k = jnp.dot(kv_in, wk_ref[...], preferred_element_type=jnp.float32)
    v = jnp.dot(kv_in, wv_ref[...], preferred_element_type=jnp.float32)

    out = x + bo_ref[...]                                     # residual + out-proj bias
    for h in range(heads):
        sl = slice(h * dim_head, (h + 1) * dim_head)
        qh, kh, vh = q[:, sl], k[:, sl], v[:, sl]
        s = jax.lax.dot_general(qh, kh, (((1,), (1,)), ((), ())),
                                preferred_element_type=jnp.float32) * scale
        m = jnp.max(s, axis=-1, keepdims=True)
        p = jnp.exp(s - m)
        p = p * pl.reciprocal(jnp.sum(p, axis=-1, keepdims=True), approx=True)
        oh = jnp.dot(p, vh, preferred_element_type=jnp.float32)          # (S, dh)
        out = out + jnp.dot(oh.astype(jnp.bfloat16), wo_ref[sl, :],
                            preferred_element_type=jnp.float32)
    o_ref[...] = out.astype(o_ref.dtype)


def _ff_kernel(x_ref, lng_ref, lnb_ref, w1_ref, b1_ref, w2_ref, b2_ref, o_ref):
    """Fused pre-norm feed-forward (LN + W1 + exact GELU + W2 + residual)."""
    x = x_ref[...].astype(jnp.float32)
    xn = _layer_norm(x, lng_ref[...], lnb_ref[...])
    h = jnp.dot(xn.astype(jnp.bfloat16), w1_ref[...],
                preferred_element_type=jnp.float32) + b1_ref[...]
    h = _gelu_exact(h)
    out = x + jnp.dot(h.astype(jnp.bfloat16), w2_ref[...],
                      preferred_element_type=jnp.float32) + b2_ref[...]
    o_ref[...] = out.astype(o_ref.dtype)


def _ln_proj_kernel(x_ref, lng_ref, lnb_ref, w_ref, b_ref, o_ref):
    """Final LayerNorm fused with the decoder's first 1x1x1 conv (per-voxel GEMM)."""
    x = x_ref[...].astype(jnp.float32)
    xn = _layer_norm(x, lng_ref[...], lnb_ref[...])
    y = jnp.dot(xn.astype(jnp.bfloat16), w_ref[...],
                preferred_element_type=jnp.float32) + b_ref[...]
    o_ref[...] = y.astype(o_ref.dtype)


# --------------------------- decoder kernels ---------------------------

def _resblock_kernel(x_ref, w1_ref, b1_ref, w2_ref, b2_ref, w3_ref, b3_ref, o_ref):
    """Whole ResBlock (3x3 conv, relu, 3x3 conv, relu, 1x1 conv, +residual) as 3 GEMMs.

    The P^3 spatial grid is tiny, so each same-padded 3x3x3 conv was dense-unrolled at
    init into a (P^3*C, P^3*C) matrix; the volume stays resident in VMEM.
    """
    x = x_ref[...].astype(jnp.float32)                         # (B, P^3*C)
    h = jnp.maximum(jnp.dot(x.astype(jnp.bfloat16), w1_ref[...],
                            preferred_element_type=jnp.float32) + b1_ref[...], 0.0)
    h = jnp.maximum(jnp.dot(h.astype(jnp.bfloat16), w2_ref[...],
                            preferred_element_type=jnp.float32) + b2_ref[...], 0.0)
    h = jnp.dot(h.astype(jnp.bfloat16), w3_ref[...],
                preferred_element_type=jnp.float32) + b3_ref[...]
    o_ref[...] = (h + x).astype(o_ref.dtype)


def _upsample_kernel(x_ref, w_ref, b_ref, *rest, HW, W, C, fuse_out):
    """One output coarse-depth plane of a phase-decomposed ConvTranspose3d(4,2,1)+ReLU.

    Input is the spatially padded volume, per plane flattened as (H*W + 2*(W+1), C);
    tap shifts are sublane slices (full-row shifts) plus a lane-boundary mask for +/-1
    W shifts.  Output columns hold the 8 sub-pixel phases (phase*C + c); optionally the
    final Conv3d(C,1,1) is fused as a block-diagonal GEMM over phases.
    """
    if fuse_out:
        wout_ref, bout_ref, o_ref = rest
    else:
        (o_ref,) = rest
    d = pl.program_id(1)

    col = jax.lax.broadcasted_iota(jnp.int32, (HW, C), 0) % W
    mask_m = col != 0            # W-shift of -1 crosses a row start
    mask_p = col != W - 1        # W-shift of +1 crosses a row end

    acc = jnp.zeros((HW, 8 * C), jnp.float32) + b_ref[...]
    for od in range(3):          # depth offset (input depth = d + od - 1, zero padded)
        for oh in range(3):
            for ow in range(3):
                start = (W + 1) + (oh - 1) * W + (ow - 1)
                slab = x_ref[0, pl.ds(d + od, 1), pl.ds(start, HW), :][0]  # (HW, C)
                slab = slab.astype(jnp.float32)
                if ow == 0:
                    slab = jnp.where(mask_m, slab, 0.0)
                elif ow == 2:
                    slab = jnp.where(mask_p, slab, 0.0)
                o_idx = (od * 3 + oh) * 3 + ow
                acc = acc + jnp.dot(slab.astype(jnp.bfloat16), w_ref[o_idx],
                                    preferred_element_type=jnp.float32)
    y = jnp.maximum(acc, 0.0)
    if fuse_out:
        y = jnp.dot(y.astype(jnp.bfloat16), wout_ref[...],
                    preferred_element_type=jnp.float32) + bout_ref[...]
    o_ref[0, 0] = y.astype(o_ref.dtype)


# --------------------------- pallas_call wrappers ---------------------------

def attention_layer(x2d, ctx2d, p, *, B, S, Sc, dim, heads, dim_head, self_attn):
    inner = heads * dim_head
    kernel = partial(_attn_kernel, heads=heads, dim_head=dim_head,
                     scale=dim_head ** -0.5, self_attn=self_attn)
    return pl.pallas_call(
        kernel,
        out_shape=jax.ShapeDtypeStruct((B * S, dim), jnp.float32),
        grid=(B,),
        in_specs=[
            pl.BlockSpec((S, dim), lambda b: (b, 0)),
            pl.BlockSpec((Sc, dim), lambda b: (b, 0)),
            pl.BlockSpec((1, dim), lambda b: (0, 0)),
            pl.BlockSpec((1, dim), lambda b: (0, 0)),
            pl.BlockSpec((dim, inner), lambda b: (0, 0)),
            pl.BlockSpec((dim, inner), lambda b: (0, 0)),
            pl.BlockSpec((dim, inner), lambda b: (0, 0)),
            pl.BlockSpec((inner, dim), lambda b: (0, 0)),
            pl.BlockSpec((1, dim), lambda b: (0, 0)),
        ],
        out_specs=pl.BlockSpec((S, dim), lambda b: (b, 0)),
        compiler_params=pltpu.CompilerParams(dimension_semantics=("parallel",)),
    )(x2d, ctx2d, p["ln_g"], p["ln_b"], p["wq"], p["wk"], p["wv"], p["wo"], p["bo"])


def ff_layer(x2d, p, *, B, S, dim, ffi):
    return pl.pallas_call(
        _ff_kernel,
        out_shape=jax.ShapeDtypeStruct((B * S, dim), jnp.float32),
        grid=(B,),
        in_specs=[
            pl.BlockSpec((S, dim), lambda b: (b, 0)),
            pl.BlockSpec((1, dim), lambda b: (0, 0)),
            pl.BlockSpec((1, dim), lambda b: (0, 0)),
            pl.BlockSpec((dim, ffi), lambda b: (0, 0)),
            pl.BlockSpec((1, ffi), lambda b: (0, 0)),
            pl.BlockSpec((ffi, dim), lambda b: (0, 0)),
            pl.BlockSpec((1, dim), lambda b: (0, 0)),
        ],
        out_specs=pl.BlockSpec((S, dim), lambda b: (b, 0)),
        compiler_params=pltpu.CompilerParams(dimension_semantics=("parallel",)),
    )(x2d, p["ln_g"], p["ln_b"], p["w1"], p["b1"], p["w2"], p["b2"])


def ln_in_conv(x2d, ln_g, ln_b, w, b, *, B, S, dim, C):
    return pl.pallas_call(
        _ln_proj_kernel,
        out_shape=jax.ShapeDtypeStruct((B * S, C), jnp.float32),
        grid=(B,),
        in_specs=[
            pl.BlockSpec((S, dim), lambda i: (i, 0)),
            pl.BlockSpec((1, dim), lambda i: (0, 0)),
            pl.BlockSpec((1, dim), lambda i: (0, 0)),
            pl.BlockSpec((dim, C), lambda i: (0, 0)),
            pl.BlockSpec((1, C), lambda i: (0, 0)),
        ],
        out_specs=pl.BlockSpec((S, C), lambda i: (i, 0)),
        compiler_params=pltpu.CompilerParams(dimension_semantics=("parallel",)),
    )(x2d, ln_g, ln_b, w, b)


def resblock(xflat, p):
    B, N = xflat.shape
    return pl.pallas_call(
        _resblock_kernel,
        out_shape=jax.ShapeDtypeStruct((B, N), jnp.float32),
        grid=(1,),
        in_specs=[pl.BlockSpec((B, N), lambda i: (0, 0)),
                  pl.BlockSpec((N, N), lambda i: (0, 0)),
                  pl.BlockSpec((1, N), lambda i: (0, 0)),
                  pl.BlockSpec((N, N), lambda i: (0, 0)),
                  pl.BlockSpec((1, N), lambda i: (0, 0)),
                  pl.BlockSpec((N, N), lambda i: (0, 0)),
                  pl.BlockSpec((1, N), lambda i: (0, 0))],
        out_specs=pl.BlockSpec((B, N), lambda i: (0, 0)),
    )(xflat, p["w1"], p["b1"], p["w2"], p["b2"], p["w3"], p["b3"])


def upsample(vol, p, *, fuse_out=False, out_params=None):
    # vol: channels-last (B, D, H, W, C) float32
    B, D, H, W, C = vol.shape
    HW = H * W
    xpad = jnp.pad(vol.reshape(B, D, HW, C),
                   ((0, 0), (1, 1), (W + 1, W + 1), (0, 0)))   # tiny layout plumbing
    HWpad = HW + 2 * (W + 1)
    n_out = 8 if fuse_out else 8 * C
    kernel = partial(_upsample_kernel, HW=HW, W=W, C=C, fuse_out=fuse_out)
    in_specs = [
        pl.BlockSpec((1, D + 2, HWpad, C), lambda b, d: (b, 0, 0, 0)),
        pl.BlockSpec((27, C, 8 * C), lambda b, d: (0, 0, 0)),
        pl.BlockSpec((1, 8 * C), lambda b, d: (0, 0)),
    ]
    args = [xpad, p["w"], p["b"]]
    if fuse_out:
        in_specs += [pl.BlockSpec((8 * C, 8), lambda b, d: (0, 0)),
                     pl.BlockSpec((1, 8), lambda b, d: (0, 0))]
        args += [out_params["w"], out_params["b"]]
    y = pl.pallas_call(
        kernel,
        out_shape=jax.ShapeDtypeStruct((B, D, HW, n_out), jnp.float32),
        grid=(B, D),
        in_specs=in_specs,
        out_specs=pl.BlockSpec((1, 1, HW, n_out), lambda b, d: (b, d, 0, 0)),
        compiler_params=pltpu.CompilerParams(
            dimension_semantics=("parallel", "parallel")),
    )(*args)
    # interleave sub-pixel phases: (B, D, HW, 8*Cy) -> (B, 2D, 2H, 2W, Cy)
    Cy = 1 if fuse_out else C
    y = y.reshape(B, D, H, W, 2, 2, 2, Cy)
    y = jnp.transpose(y, (0, 1, 4, 2, 5, 3, 6, 7))
    return y.reshape(B, 2 * D, 2 * H, 2 * W, Cy)


# --------------------------- weight packing (done once at init) ---------------------------

def _pack_dense_conv3(w_pt, P):
    """Dense-unroll a same-padded 3x3x3 conv on a P^3 volume.

    w_pt: PyTorch (Cout, Cin, 3, 3, 3).  Returns M of shape (P^3*Cin, P^3*Cout) with
    out[p_out*Cout+co] = sum_{p_in, ci} x[p_in*Cin+ci] * M[p_in*Cin+ci, p_out*Cout+co].
    """
    Cout, Cin = w_pt.shape[:2]
    idx = jnp.arange(P)
    k = idx[:, None] - idx[None, :] + 1                 # p_in - p_out + 1
    valid = (k >= 0) & (k < 3)
    kc = jnp.clip(k, 0, 2)
    Wt = jnp.transpose(w_pt, (2, 3, 4, 1, 0))           # (3,3,3,Cin,Cout)
    big = Wt[kc[:, :, None, None, None, None],
             kc[None, None, :, :, None, None],
             kc[None, None, None, None, :, :]]          # (Pi,Po,Pi,Po,Pi,Po,Cin,Cout)
    v = (valid[:, :, None, None, None, None]
         & valid[None, None, :, :, None, None]
         & valid[None, None, None, None, :, :])
    big = big * v[..., None, None].astype(big.dtype)
    big = jnp.transpose(big, (0, 2, 4, 6, 1, 3, 5, 7))  # (pi_d,pi_h,pi_w,ci, po_d,po_h,po_w,co)
    return big.reshape(P ** 3 * Cin, P ** 3 * Cout)


def _pack_blockdiag(w2, reps):
    """Apply (Cin, Cout) map independently at `reps` positions: (reps*Cin, reps*Cout)."""
    Cin, Cout = w2.shape
    eye = jnp.eye(reps, dtype=w2.dtype)
    return jnp.einsum("pq,io->piqo", eye, w2).reshape(reps * Cin, reps * Cout)


def _pack_convT_phases(w_pt):
    """PyTorch ConvTranspose3d(C, C, 4, stride=2, padding=1) weight (Cin, Cout, 4,4,4)
    packed for sub-pixel decomposition: returns (27, Cin, 8*Cout).

    Offset o in {0,1,2}^3 addresses input index m + o - 1 (zero padded); phase r in
    {0,1}^3 addresses output fine index 2m + r; the kernel tap is k = 3 + r - 2*o
    (zero block when k is out of [0,4)).
    """
    Cin, Cout = w_pt.shape[:2]
    blocks = []
    for od in range(3):
        for oh in range(3):
            for ow in range(3):
                cols = []
                for rd in range(2):
                    for rh in range(2):
                        for rw in range(2):
                            kd, kh, kw = 3 + rd - 2 * od, 3 + rh - 2 * oh, 3 + rw - 2 * ow
                            if 0 <= kd < 4 and 0 <= kh < 4 and 0 <= kw < 4:
                                cols.append(w_pt[:, :, kd, kh, kw])
                            else:
                                cols.append(jnp.zeros((Cin, Cout), w_pt.dtype))
                blocks.append(jnp.concatenate(cols, axis=1))   # (Cin, 8*Cout)
    return jnp.stack(blocks, axis=0)


def pack_decoder(in_w, in_b, res, ups, out_w, out_b, P, C):
    assert len(ups) >= 1
    dec = {
        "in_w": in_w.reshape(in_w.shape[0], in_w.shape[1]).T.astype(jnp.bfloat16),  # (dim, C)
        "in_b": in_b.reshape(1, -1),
        "res": [],
        "ups": [],
    }
    for rb in res:
        dec["res"].append({
            "w1": _pack_dense_conv3(rb["c1_w"], P).astype(jnp.bfloat16),
            "b1": jnp.tile(rb["c1_b"], P ** 3).reshape(1, -1),
            "w2": _pack_dense_conv3(rb["c2_w"], P).astype(jnp.bfloat16),
            "b2": jnp.tile(rb["c2_b"], P ** 3).reshape(1, -1),
            "w3": _pack_blockdiag(rb["c3_w"].reshape(C, C).T, P ** 3).astype(jnp.bfloat16),
            "b3": jnp.tile(rb["c3_b"], P ** 3).reshape(1, -1),
        })
    for u in ups:
        dec["ups"].append({
            "w": _pack_convT_phases(u["w"]).astype(jnp.bfloat16),
            "b": jnp.tile(u["b"], 8).reshape(1, -1),
        })
    # Final Conv3d(C, 1, 1), block-diagonal over the 8 phases so it fuses into the
    # last upsample's epilogue.
    dec["out_w"] = _pack_blockdiag(out_w.reshape(1, C).T, 8).astype(jnp.bfloat16)  # (8C, 8)
    dec["out_b"] = jnp.tile(out_b, 8).reshape(1, -1)
    return dec


# --------------------------- full forward ---------------------------

def voxel_decoder_forward(context, params, cfg):
    B, Sc, dim = context.shape
    P = cfg["patch_num"]
    S = P ** 3
    heads, dh = cfg["heads"], cfg["dim_head"]
    C = cfg["cnn_hidden_dim"]
    ffi = dim * cfg["ff_mult"]

    ctx2d = context.reshape(B * Sc, dim).astype(jnp.float32)
    x2d = jnp.tile(params["emb"], (B, 1))                      # emb(arange(P^3)) per batch

    layer_types = ("a", "c", "f") * cfg["depth"]
    for ltype, lp in zip(layer_types, params["transformer"]):
        if ltype == "a":
            x2d = attention_layer(x2d, x2d, lp, B=B, S=S, Sc=S, dim=dim,
                                  heads=heads, dim_head=dh, self_attn=True)
        elif ltype == "c":
            # TODO(synk): context_mask is not implemented (mask is None in this example).
            x2d = attention_layer(x2d, ctx2d, lp, B=B, S=S, Sc=Sc, dim=dim,
                                  heads=heads, dim_head=dh, self_attn=False)
        else:
            x2d = ff_layer(x2d, lp, B=B, S=S, dim=dim, ffi=ffi)

    dec = params["decoder"]
    # final LayerNorm fused with the first Conv3d(dim, C, 1); rows are already in
    # (b, d, h, w) order so the output is the channels-last volume, flattened.
    y = ln_in_conv(x2d, params["ln_g"], params["ln_b"], dec["in_w"], dec["in_b"],
                   B=B, S=S, dim=dim, C=C)                     # (B*P^3, C)
    yflat = y.reshape(B, S * C)                                # contiguous (free) reshape

    for rp in dec["res"]:
        yflat = resblock(yflat, rp)

    vol = yflat.reshape(B, P, P, P, C)
    n_ups = len(dec["ups"])
    for i, up in enumerate(dec["ups"]):
        last = i == n_ups - 1
        vol = upsample(vol, up, fuse_out=last,
                       out_params=({"w": dec["out_w"], "b": dec["out_b"]} if last else None))
    # vol: (B, V, V, V, 1) channels-last -> NCDHW (B, 1, V, V, V)
    return jnp.transpose(vol, (0, 4, 1, 2, 3))


# --------------------------- params ---------------------------

def init_params(key, cfg):
    P, dim = cfg["patch_num"], cfg["dim"]
    heads, dh = cfg["heads"], cfg["dim_head"]
    inner = heads * dh
    C = cfg["cnn_hidden_dim"]
    ffi = dim * cfg["ff_mult"]
    keys = iter(jax.random.split(key, 512))

    def w(shape, scale=0.02):
        return jax.random.normal(next(keys), shape, jnp.float32) * scale

    params = {"emb": w((P ** 3, dim))}

    layers = []
    for _ in range(cfg["depth"]):
        for ltype in ("a", "c", "f"):
            lp = {"ln_g": jnp.ones((1, dim), jnp.float32),
                  "ln_b": jnp.zeros((1, dim), jnp.float32)}
            if ltype in ("a", "c"):
                lp.update(
                    wq=w((dim, inner)).astype(jnp.bfloat16),
                    wk=w((dim, inner)).astype(jnp.bfloat16),
                    wv=w((dim, inner)).astype(jnp.bfloat16),
                    wo=w((inner, dim)).astype(jnp.bfloat16),
                    bo=w((1, dim)),
                )
            else:
                lp.update(
                    w1=w((dim, ffi)).astype(jnp.bfloat16),
                    b1=w((1, ffi)),
                    w2=w((ffi, dim)).astype(jnp.bfloat16),
                    b2=w((1, dim)),
                )
            layers.append(lp)
    params["transformer"] = layers
    params["ln_g"] = jnp.ones((1, dim), jnp.float32)
    params["ln_b"] = jnp.zeros((1, dim), jnp.float32)

    # Decoder weights initialised in PyTorch layout, then packed once for the kernels.
    in_w, in_b = w((C, dim, 1, 1, 1)), w((C,))
    res = [dict(c1_w=w((C, C, 3, 3, 3)), c1_b=w((C,)),
                c2_w=w((C, C, 3, 3, 3)), c2_b=w((C,)),
                c3_w=w((C, C, 1, 1, 1)), c3_b=w((C,)))
           for _ in range(cfg["num_resnet_blocks"])]
    ups = [dict(w=w((C, C, 4, 4, 4)), b=w((C,))) for _ in range(cfg["num_cnn_layers"])]
    out_w, out_b = w((1, C, 1, 1, 1)), w((1,))
    params["decoder"] = pack_decoder(in_w, in_b, res, ups, out_w, out_b, P, C)
    # NOTE: self.to_patch (Linear(dim, patch_size**3)) is unused in forward() -> omitted.
    return params


if __name__ == "__main__":
    cfg = dict(patch_num=2, voxel_size=8, dim=64, depth=1, heads=4, dim_head=16,
               cnn_hidden_dim=8, num_cnn_layers=2, num_resnet_blocks=1, ff_mult=4)
    key = jax.random.PRNGKey(0)
    ctx_key, param_key = jax.random.split(key)
    B, Sc = 2, 8
    context = jax.random.normal(ctx_key, (B, Sc, cfg["dim"]), jnp.float32)
    params = init_params(param_key, cfg)

    fwd = jax.jit(lambda c, p: voxel_decoder_forward(c, p, cfg))
    out = jax.block_until_ready(fwd(context, params))
    assert out.shape == (B, 1, cfg["voxel_size"], cfg["voxel_size"], cfg["voxel_size"]), out.shape
    assert bool(jnp.all(jnp.isfinite(out)))
    print("KERNEL_OK")
</pallas_src>

<mosaic_0001>
module attributes {stable_mosaic.version = 11 : i64} {
  func.func @_attn_kernel(%arg0: i32, %arg1: memref<8x64xf32, #tpu.memory_space<vmem>>, %arg2: memref<8x64xf32, #tpu.memory_space<vmem>>, %arg3: memref<1x64xf32, #tpu.memory_space<vmem>>, %arg4: memref<1x64xf32, #tpu.memory_space<vmem>>, %arg5: memref<64x64xbf16, #tpu.memory_space<vmem>>, %arg6: memref<64x64xbf16, #tpu.memory_space<vmem>>, %arg7: memref<64x64xbf16, #tpu.memory_space<vmem>>, %arg8: memref<64x64xbf16, #tpu.memory_space<vmem>>, %arg9: memref<1x64xf32, #tpu.memory_space<vmem>>, %arg10: memref<8x64xf32, #tpu.memory_space<vmem>>) attributes {dimension_semantics = [#tpu.dimension_semantics<parallel>], iteration_bounds = array<i64: 2>, scalar_prefetch = 0 : i64, scratch_operands = 0 : i64, tpu.core_type = #tpu.core_type<tc>, window_params = [{transform_indices = @transform_0, window_bounds = array<i64: 8, 64>}, {transform_indices = @transform_1, window_bounds = array<i64: 8, 64>}, {pipeline_mode = #tpu.pipeline_mode<synchronous>, transform_indices = @transform_2, window_bounds = array<i64: 1, 64>}, {pipeline_mode = #tpu.pipeline_mode<synchronous>, transform_indices = @transform_3, window_bounds = array<i64: 1, 64>}, {pipeline_mode = #tpu.pipeline_mode<synchronous>, transform_indices = @transform_4, window_bounds = array<i64: 64, 64>}, {pipeline_mode = #tpu.pipeline_mode<synchronous>, transform_indices = @transform_5, window_bounds = array<i64: 64, 64>}, {pipeline_mode = #tpu.pipeline_mode<synchronous>, transform_indices = @transform_6, window_bounds = array<i64: 64, 64>}, {pipeline_mode = #tpu.pipeline_mode<synchronous>, transform_indices = @transform_7, window_bounds = array<i64: 64, 64>}, {pipeline_mode = #tpu.pipeline_mode<synchronous>, transform_indices = @transform_8, window_bounds = array<i64: 1, 64>}, {transform_indices = @transform_9, window_bounds = array<i64: 8, 64>}]} {
    %c0 = arith.constant 0 : index
    %c0_0 = arith.constant 0 : index
    %0 = vector.load %arg1[%c0, %c0_0] : memref<8x64xf32, #tpu.memory_space<vmem>>, vector<8x64xf32>
    %c0_1 = arith.constant 0 : index
    %c0_2 = arith.constant 0 : index
    %1 = vector.load %arg3[%c0_1, %c0_2] : memref<1x64xf32, #tpu.memory_space<vmem>>, vector<1x64xf32>
    %c0_3 = arith.constant 0 : index
    %c0_4 = arith.constant 0 : index
    %2 = vector.load %arg4[%c0_3, %c0_4] : memref<1x64xf32, #tpu.memory_space<vmem>>, vector<1x64xf32>
    %cst = arith.constant dense<0.000000e+00> : vector<8xf32>
    %3 = vector.multi_reduction <add>, %0, %cst [1] : vector<8x64xf32> to vector<8xf32>
    %4 = vector.shape_cast %3 : vector<8xf32> to vector<8x1xf32>
    %cst_5 = arith.constant 6.400000e+01 : f32
    %5 = vector.broadcast %cst_5 : f32 to vector<8x1xf32>
    %6 = arith.divf %4, %5 : vector<8x1xf32>
    %7 = vector.broadcast %6 : vector<8x1xf32> to vector<8x64xf32>
    %8 = arith.subf %0, %7 : vector<8x64xf32>
    %9 = arith.mulf %8, %8 : vector<8x64xf32>
    %cst_6 = arith.constant dense<0.000000e+00> : vector<8xf32>
    %10 = vector.multi_reduction <add>, %9, %cst_6 [1] : vector<8x64xf32> to vector<8xf32>
    %11 = vector.shape_cast %10 : vector<8xf32> to vector<8x1xf32>
    %cst_7 = arith.constant 6.400000e+01 : f32
    %12 = vector.broadcast %cst_7 : f32 to vector<8x1xf32>
    %13 = arith.divf %11, %12 : vector<8x1xf32>
    %cst_8 = arith.constant 9.99999974E-6 : f32
    %14 = vector.broadcast %cst_8 : f32 to vector<8x1xf32>
    %15 = arith.addf %13, %14 : vector<8x1xf32>
    %16 = math.rsqrt %15 : vector<8x1xf32>
    %17 = vector.broadcast %16 : vector<8x1xf32> to vector<8x64xf32>
    %18 = arith.mulf %8, %17 : vector<8x64xf32>
    %19 = vector.broadcast %1 : vector<1x64xf32> to vector<8x64xf32>
    %20 = arith.mulf %18, %19 : vector<8x64xf32>
    %21 = vector.broadcast %2 : vector<1x64xf32> to vector<8x64xf32>
    %22 = arith.addf %20, %21 : vector<8x64xf32>
    %23 = arith.truncf %22 : vector<8x64xf32> to vector<8x64xbf16>
    %c0_9 = arith.constant 0 : index
    %c0_10 = arith.constant 0 : index
    %24 = vector.load %arg5[%c0_9, %c0_10] : memref<64x64xbf16, #tpu.memory_space<vmem>>, vector<64x64xbf16>
    %cst_11 = arith.constant dense<0.000000e+00> : vector<8x64xf32>
    %25 = tpu.matmul %23, %24, %cst_11 {dimension_numbers = #tpu.dot_dimension_numbers<[1], [0], [0], [1], [0, 0, 1, 1], [], []>} : vector<8x64xbf16>, vector<64x64xbf16>, vector<8x64xf32> -> vector<8x64xf32>
    %c0_12 = arith.constant 0 : index
    %c0_13 = arith.constant 0 : index
    %26 = vector.load %arg6[%c0_12, %c0_13] : memref<64x64xbf16, #tpu.memory_space<vmem>>, vector<64x64xbf16>
    %cst_14 = arith.constant dense<0.000000e+00> : vector<8x64xf32>
    %27 = tpu.matmul %23, %26, %cst_14 {dimension_numbers = #tpu.dot_dimension_numbers<[1], [0], [0], [1], [0, 0, 1, 1], [], []>} : vector<8x64xbf16>, vector<64x64xbf16>, vector<8x64xf32> -> vector<8x64xf32>
    %c0_15 = arith.constant 0 : index
    %c0_16 = arith.constant 0 : index
    %28 = vector.load %arg7[%c0_15, %c0_16] : memref<64x64xbf16, #tpu.memory_space<vmem>>, vector<64x64xbf16>
    %cst_17 = arith.constant dense<0.000000e+00> : vector<8x64xf32>
    %29 = tpu.matmul %23, %28, %cst_17 {dimension_numbers = #tpu.dot_dimension_numbers<[1], [0], [0], [1], [0, 0, 1, 1], [], []>} : vector<8x64xbf16>, vector<64x64xbf16>, vector<8x64xf32> -> vector<8x64xf32>
    %c0_18 = arith.constant 0 : index
    %c0_19 = arith.constant 0 : index
    %30 = vector.load %arg9[%c0_18, %c0_19] : memref<1x64xf32, #tpu.memory_space<vmem>>, vector<1x64xf32>
    %31 = vector.broadcast %30 : vector<1x64xf32> to vector<8x64xf32>
    %32 = arith.addf %0, %31 : vector<8x64xf32>
    %33 = vector.extract_strided_slice %25 {offsets = [0, 0], sizes = [8, 16], strides = [1, 1]} : vector<8x64xf32> to vector<8x16xf32>
    %34 = vector.extract_strided_slice %27 {offsets = [0, 0], sizes = [8, 16], strides = [1, 1]} : vector<8x64xf32> to vector<8x16xf32>
    %35 = vector.extract_strided_slice %29 {offsets = [0, 0], sizes = [8, 16], strides = [1, 1]} : vector<8x64xf32> to vector<8x16xf32>
    %cst_20 = arith.constant dense<0.000000e+00> : vector<8x8xf32>
    %36 = tpu.matmul %33, %34, %cst_20 {dimension_numbers = #tpu.dot_dimension_numbers<[1], [1], [0], [0], [0, 0, 1, 0], [], []>} : vector<8x16xf32>, vector<8x16xf32>, vector<8x8xf32> -> vector<8x8xf32>
    %cst_21 = arith.constant 2.500000e-01 : f32
    %37 = vector.broadcast %cst_21 : f32 to vector<8x8xf32>
    %38 = arith.mulf %36, %37 : vector<8x8xf32>
    %cst_22 = arith.constant dense<0xFF800000> : vector<8xf32>
    %39 = vector.multi_reduction <maximumf>, %38, %cst_22 [1] : vector<8x8xf32> to vector<8xf32>
    %40 = vector.shape_cast %39 : vector<8xf32> to vector<8x1xf32>
    %41 = vector.broadcast %40 : vector<8x1xf32> to vector<8x8xf32>
    %42 = arith.subf %38, %41 : vector<8x8xf32>
    %43 = math.exp %42 : vector<8x8xf32>
    %cst_23 = arith.constant dense<0.000000e+00> : vector<8xf32>
    %44 = vector.multi_reduction <add>, %43, %cst_23 [1] : vector<8x8xf32> to vector<8xf32>
    %45 = vector.shape_cast %44 : vector<8xf32> to vector<8x1xf32>
    %46 = tpu.reciprocal %45 {approx = true} : vector<8x1xf32> -> vector<8x1xf32>
    %47 = vector.broadcast %46 : vector<8x1xf32> to vector<8x8xf32>
    %48 = arith.mulf %43, %47 : vector<8x8xf32>
    %cst_24 = arith.constant dense<0.000000e+00> : vector<8x16xf32>
    %49 = tpu.matmul %48, %35, %cst_24 {dimension_numbers = #tpu.dot_dimension_numbers<[1], [0], [0], [1], [0, 0, 1, 1], [], []>} : vector<8x8xf32>, vector<8x16xf32>, vector<8x16xf32> -> vector<8x16xf32>
    %50 = arith.truncf %49 : vector<8x16xf32> to vector<8x16xbf16>
    %c0_25 = arith.constant 0 : index
    %c0_26 = arith.constant 0 : index
    %51 = vector.load %arg8[%c0_25, %c0_26] : memref<64x64xbf16, #tpu.memory_space<vmem>>, vector<16x64xbf16>
    %cst_27 = arith.constant dense<0.000000e+00> : vector<8x64xf32>
    %52 = tpu.matmul %50, %51, %cst_27 {dimension_numbers = #tpu.dot_dimension_numbers<[1], [0], [0], [1], [0, 0, 1, 1], [], []>} : vector<8x16xbf16>, vector<16x64xbf16>, vector<8x64xf32> -> vector<8x64xf32>
    %53 = arith.addf %32, %52 : vector<8x64xf32>
    %54 = vector.extract_strided_slice %25 {offsets = [0, 16], sizes = [8, 16], strides = [1, 1]} : vector<8x64xf32> to vector<8x16xf32>
    %55 = vector.extract_strided_slice %27 {offsets = [0, 16], sizes = [8, 16], strides = [1, 1]} : vector<8x64xf32> to vector<8x16xf32>
    %56 = vector.extract_strided_slice %29 {offsets = [0, 16], sizes = [8, 16], strides = [1, 1]} : vector<8x64xf32> to vector<8x16xf32>
    %cst_28 = arith.constant dense<0.000000e+00> : vector<8x8xf32>
    %57 = tpu.matmul %54, %55, %cst_28 {dimension_numbers = #tpu.dot_dimension_numbers<[1], [1], [0], [0], [0, 0, 1, 0], [], []>} : vector<8x16xf32>, vector<8x16xf32>, vector<8x8xf32> -> vector<8x8xf32>
    %cst_29 = arith.constant 2.500000e-01 : f32
    %58 = vector.broadcast %cst_29 : f32 to vector<8x8xf32>
    %59 = arith.mulf %57, %58 : vector<8x8xf32>
    %cst_30 = arith.constant dense<0xFF800000> : vector<8xf32>
    %60 = vector.multi_reduction <maximumf>, %59, %cst_30 [1] : vector<8x8xf32> to vector<8xf32>
    %61 = vector.shape_cast %60 : vector<8xf32> to vector<8x1xf32>
    %62 = vector.broadcast %61 : vector<8x1xf32> to vector<8x8xf32>
    %63 = arith.subf %59, %62 : vector<8x8xf32>
    %64 = math.exp %63 : vector<8x8xf32>
    %cst_31 = arith.constant dense<0.000000e+00> : vector<8xf32>
    %65 = vector.multi_reduction <add>, %64, %cst_31 [1] : vector<8x8xf32> to vector<8xf32>
    %66 = vector.shape_cast %65 : vector<8xf32> to vector<8x1xf32>
    %67 = tpu.reciprocal %66 {approx = true} : vector<8x1xf32> -> vector<8x1xf32>
    %68 = vector.broadcast %67 : vector<8x1xf32> to vector<8x8xf32>
    %69 = arith.mulf %64, %68 : vector<8x8xf32>
    %cst_32 = arith.constant dense<0.000000e+00> : vector<8x16xf32>
    %70 = tpu.matmul %69, %56, %cst_32 {dimension_numbers = #tpu.dot_dimension_numbers<[1], [0], [0], [1], [0, 0, 1, 1], [], []>} : vector<8x8xf32>, vector<8x16xf32>, vector<8x16xf32> -> vector<8x16xf32>
    %71 = arith.truncf %70 : vector<8x16xf32> to vector<8x16xbf16>
    %c16 = arith.constant 16 : index
    %c0_33 = arith.constant 0 : index
    %72 = vector.load %arg8[%c16, %c0_33] : memref<64x64xbf16, #tpu.memory_space<vmem>>, vector<16x64xbf16>
    %cst_34 = arith.constant dense<0.000000e+00> : vector<8x64xf32>
    %73 = tpu.matmul %71, %72, %cst_34 {dimension_numbers = #tpu.dot_dimension_numbers<[1], [0], [0], [1], [0, 0, 1, 1], [], []>} : vector<8x16xbf16>, vector<16x64xbf16>, vector<8x64xf32> -> vector<8x64xf32>
    %74 = arith.addf %53, %73 : vector<8x64xf32>
    %75 = vector.extract_strided_slice %25 {offsets = [0, 32], sizes = [8, 16], strides = [1, 1]} : vector<8x64xf32> to vector<8x16xf32>
    %76 = vector.extract_strided_slice %27 {offsets = [0, 32], sizes = [8, 16], strides = [1, 1]} : vector<8x64xf32> to vector<8x16xf32>
    %77 = vector.extract_strided_slice %29 {offsets = [0, 32], sizes = [8, 16], strides = [1, 1]} : vector<8x64xf32> to vector<8x16xf32>
    %cst_35 = arith.constant dense<0.000000e+00> : vector<8x8xf32>
    %78 = tpu.matmul %75, %76, %cst_35 {dimension_numbers = #tpu.dot_dimension_numbers<[1], [1], [0], [0], [0, 0, 1, 0], [], []>} : vector<8x16xf32>, vector<8x16xf32>, vector<8x8xf32> -> vector<8x8xf32>
    %cst_36 = arith.constant 2.500000e-01 : f32
    %79 = vector.broadcast %cst_36 : f32 to vector<8x8xf32>
    %80 = arith.mulf %78, %79 : vector<8x8xf32>
    %cst_37 = arith.constant dense<0xFF800000> : vector<8xf32>
    %81 = vector.multi_reduction <maximumf>, %80, %cst_37 [1] : vector<8x8xf32> to vector<8xf32>
    %82 = vector.shape_cast %81 : vector<8xf32> to vector<8x1xf32>
    %83 = vector.broadcast %82 : vector<8x1xf32> to vector<8x8xf32>
    %84 = arith.subf %80, %83 : vector<8x8xf32>
    %85 = math.exp %84 : vector<8x8xf32>
    %cst_38 = arith.constant dense<0.000000e+00> : vector<8xf32>
    %86 = vector.multi_reduction <add>, %85, %cst_38 [1] : vector<8x8xf32> to vector<8xf32>
    %87 = vector.shape_cast %86 : vector<8xf32> to vector<8x1xf32>
    %88 = tpu.reciprocal %87 {approx = true} : vector<8x1xf32> -> vector<8x1xf32>
    %89 = vector.broadcast %88 : vector<8x1xf32> to vector<8x8xf32>
    %90 = arith.mulf %85, %89 : vector<8x8xf32>
    %cst_39 = arith.constant dense<0.000000e+00> : vector<8x16xf32>
    %91 = tpu.matmul %90, %77, %cst_39 {dimension_numbers = #tpu.dot_dimension_numbers<[1], [0], [0], [1], [0, 0, 1, 1], [], []>} : vector<8x8xf32>, vector<8x16xf32>, vector<8x16xf32> -> vector<8x16xf32>
    %92 = arith.truncf %91 : vector<8x16xf32> to vector<8x16xbf16>
    %c32 = arith.constant 32 : index
    %c0_40 = arith.constant 0 : index
    %93 = vector.load %arg8[%c32, %c0_40] : memref<64x64xbf16, #tpu.memory_space<vmem>>, vector<16x64xbf16>
    %cst_41 = arith.constant dense<0.000000e+00> : vector<8x64xf32>
    %94 = tpu.matmul %92, %93, %cst_41 {dimension_numbers = #tpu.dot_dimension_numbers<[1], [0], [0], [1], [0, 0, 1, 1], [], []>} : vector<8x16xbf16>, vector<16x64xbf16>, vector<8x64xf32> -> vector<8x64xf32>
    %95 = arith.addf %74, %94 : vector<8x64xf32>
    %96 = vector.extract_strided_slice %25 {offsets = [0, 48], sizes = [8, 16], strides = [1, 1]} : vector<8x64xf32> to vector<8x16xf32>
    %97 = vector.extract_strided_slice %27 {offsets = [0, 48], sizes = [8, 16], strides = [1, 1]} : vector<8x64xf32> to vector<8x16xf32>
    %98 = vector.extract_strided_slice %29 {offsets = [0, 48], sizes = [8, 16], strides = [1, 1]} : vector<8x64xf32> to vector<8x16xf32>
    %cst_42 = arith.constant dense<0.000000e+00> : vector<8x8xf32>
    %99 = tpu.matmul %96, %97, %cst_42 {dimension_numbers = #tpu.dot_dimension_numbers<[1], [1], [0], [0], [0, 0, 1, 0], [], []>} : vector<8x16xf32>, vector<8x16xf32>, vector<8x8xf32> -> vector<8x8xf32>
    %cst_43 = arith.constant 2.500000e-01 : f32
    %100 = vector.broadcast %cst_43 : f32 to vector<8x8xf32>
    %101 = arith.mulf %99, %100 : vector<8x8xf32>
    %cst_44 = arith.constant dense<0xFF800000> : vector<8xf32>
    %102 = vector.multi_reduction <maximumf>, %101, %cst_44 [1] : vector<8x8xf32> to vector<8xf32>
    %103 = vector.shape_cast %102 : vector<8xf32> to vector<8x1xf32>
    %104 = vector.broadcast %103 : vector<8x1xf32> to vector<8x8xf32>
    %105 = arith.subf %101, %104 : vector<8x8xf32>
    %106 = math.exp %105 : vector<8x8xf32>
    %cst_45 = arith.constant dense<0.000000e+00> : vector<8xf32>
    %107 = vector.multi_reduction <add>, %106, %cst_45 [1] : vector<8x8xf32> to vector<8xf32>
    %108 = vector.shape_cast %107 : vector<8xf32> to vector<8x1xf32>
    %109 = tpu.reciprocal %108 {approx = true} : vector<8x1xf32> -> vector<8x1xf32>
    %110 = vector.broadcast %109 : vector<8x1xf32> to vector<8x8xf32>
    %111 = arith.mulf %106, %110 : vector<8x8xf32>
    %cst_46 = arith.constant dense<0.000000e+00> : vector<8x16xf32>
    %112 = tpu.matmul %111, %98, %cst_46 {dimension_numbers = #tpu.dot_dimension_numbers<[1], [0], [0], [1], [0, 0, 1, 1], [], []>} : vector<8x8xf32>, vector<8x16xf32>, vector<8x16xf32> -> vector<8x16xf32>
    %113 = arith.truncf %112 : vector<8x16xf32> to vector<8x16xbf16>
    %c48 = arith.constant 48 : index
    %c0_47 = arith.constant 0 : index
    %114 = vector.load %arg8[%c48, %c0_47] : memref<64x64xbf16, #tpu.memory_space<vmem>>, vector<16x64xbf16>
    %cst_48 = arith.constant dense<0.000000e+00> : vector<8x64xf32>
    %115 = tpu.matmul %113, %114, %cst_48 {dimension_numbers = #tpu.dot_dimension_numbers<[1], [0], [0], [1], [0, 0, 1, 1], [], []>} : vector<8x16xbf16>, vector<16x64xbf16>, vector<8x64xf32> -> vector<8x64xf32>
    %116 = arith.addf %95, %115 : vector<8x64xf32>
    %c0_49 = arith.constant 0 : index
    %c0_50 = arith.constant 0 : index
    %117 = vector.load %arg10[%c0_49, %c0_50] : memref<8x64xf32, #tpu.memory_space<vmem>>, vector<8x64xf32>
    tpu.vector_store %arg10[%c0_49, %c0_50], %116 {strides = array<i32>} : memref<8x64xf32, #tpu.memory_space<vmem>>, vector<8x64xf32>,
    return
  }
  func.func @transform_0(%arg0: i32) -> (i32, i32) {
    %c0_i32 = arith.constant 0 : i32
    %c0_i32_0 = arith.constant 0 : i32
    return %arg0, %c0_i32 : i32, i32
  }
  func.func @transform_1(%arg0: i32) -> (i32, i32) {
    %c0_i32 = arith.constant 0 : i32
    %c0_i32_0 = arith.constant 0 : i32
    return %arg0, %c0_i32 : i32, i32
  }
  func.func @transform_2(%arg0: i32) -> (i32, i32) {
    %c0_i32 = arith.constant 0 : i32
    %c0_i32_0 = arith.constant 0 : i32
    %c0_i32_1 = arith.constant 0 : i32
    return %c0_i32, %c0_i32_0 : i32, i32
  }
  func.func @transform_3(%arg0: i32) -> (i32, i32) {
    %c0_i32 = arith.constant 0 : i32
    %c0_i32_0 = arith.constant 0 : i32
    %c0_i32_1 = arith.constant 0 : i32
    return %c0_i32, %c0_i32_0 : i32, i32
  }
  func.func @transform_4(%arg0: i32) -> (i32, i32) {
    %c0_i32 = arith.constant 0 : i32
    %c0_i32_0 = arith.constant 0 : i32
    %c0_i32_1 = arith.constant 0 : i32
    return %c0_i32, %c0_i32_0 : i32, i32
  }
  func.func @transform_5(%arg0: i32) -> (i32, i32) {
    %c0_i32 = arith.constant 0 : i32
    %c0_i32_0 = arith.constant 0 : i32
    %c0_i32_1 = arith.constant 0 : i32
    return %c0_i32, %c0_i32_0 : i32, i32
  }
  func.func @transform_6(%arg0: i32) -> (i32, i32) {
    %c0_i32 = arith.constant 0 : i32
    %c0_i32_0 = arith.constant 0 : i32
    %c0_i32_1 = arith.constant 0 : i32
    return %c0_i32, %c0_i32_0 : i32, i32
  }
  func.func @transform_7(%arg0: i32) -> (i32, i32) {
    %c0_i32 = arith.constant 0 : i32
    %c0_i32_0 = arith.constant 0 : i32
    %c0_i32_1 = arith.constant 0 : i32
    return %c0_i32, %c0_i32_0 : i32, i32
  }
  func.func @transform_8(%arg0: i32) -> (i32, i32) {
    %c0_i32 = arith.constant 0 : i32
    %c0_i32_0 = arith.constant 0 : i32
    %c0_i32_1 = arith.constant 0 : i32
    return %c0_i32, %c0_i32_0 : i32, i32
  }
  func.func @transform_9(%arg0: i32) -> (i32, i32) {
    %c0_i32 = arith.constant 0 : i32
    %c0_i32_0 = arith.constant 0 : i32
    return %arg0, %c0_i32 : i32, i32
  }
}

module attributes {stable_mosaic.version = 11 : i64} {
  func.func @_attn_kernel(%arg0: i32, %arg1: memref<8x64xf32, #tpu.memory_space<vmem>>, %arg2: memref<8x64xf32, #tpu.memory_space<vmem>>, %arg3: memref<1x64xf32, #tpu.memory_space<vmem>>, %arg4: memref<1x64xf32, #tpu.memory_space<vmem>>, %arg5: memref<64x64xbf16, #tpu.memory_space<vmem>>, %arg6: memref<64x64xbf16, #tpu.memory_space<vmem>>, %arg7: memref<64x64xbf16, #tpu.memory_space<vmem>>, %arg8: memref<64x64xbf16, #tpu.memory_space<vmem>>, %arg9: memref<1x64xf32, #tpu.memory_space<vmem>>, %arg10: memref<8x64xf32, #tpu.memory_space<vmem>>) attributes {dimension_semantics = [#tpu.dimension_semantics<parallel>], iteration_bounds = array<i64: 2>, scalar_prefetch = 0 : i64, scratch_operands = 0 : i64, tpu.core_type = #tpu.core_type<tc>, window_params = [{transform_indices = @transform_0, window_bounds = array<i64: 8, 64>}, {transform_indices = @transform_1, window_bounds = array<i64: 8, 64>}, {pipeline_mode = #tpu.pipeline_mode<synchronous>, transform_indices = @transform_2, window_bounds = array<i64: 1, 64>}, {pipeline_mode = #tpu.pipeline_mode<synchronous>, transform_indices = @transform_3, window_bounds = array<i64: 1, 64>}, {pipeline_mode = #tpu.pipeline_mode<synchronous>, transform_indices = @transform_4, window_bounds = array<i64: 64, 64>}, {pipeline_mode = #tpu.pipeline_mode<synchronous>, transform_indices = @transform_5, window_bounds = array<i64: 64, 64>}, {pipeline_mode = #tpu.pipeline_mode<synchronous>, transform_indices = @transform_6, window_bounds = array<i64: 64, 64>}, {pipeline_mode = #tpu.pipeline_mode<synchronous>, transform_indices = @transform_7, window_bounds = array<i64: 64, 64>}, {pipeline_mode = #tpu.pipeline_mode<synchronous>, transform_indices = @transform_8, window_bounds = array<i64: 1, 64>}, {transform_indices = @transform_9, window_bounds = array<i64: 8, 64>}]} {
    %c0 = arith.constant 0 : index
    %c0_0 = arith.constant 0 : index
    %0 = vector.load %arg1[%c0, %c0_0] : memref<8x64xf32, #tpu.memory_space<vmem>>, vector<8x64xf32>
    %c0_1 = arith.constant 0 : index
    %c0_2 = arith.constant 0 : index
    %1 = vector.load %arg3[%c0_1, %c0_2] : memref<1x64xf32, #tpu.memory_space<vmem>>, vector<1x64xf32>
    %c0_3 = arith.constant 0 : index
    %c0_4 = arith.constant 0 : index
    %2 = vector.load %arg4[%c0_3, %c0_4] : memref<1x64xf32, #tpu.memory_space<vmem>>, vector<1x64xf32>
    %cst = arith.constant dense<0.000000e+00> : vector<8xf32>
    %3 = vector.multi_reduction <add>, %0, %cst [1] : vector<8x64xf32> to vector<8xf32>
    %4 = vector.shape_cast %3 : vector<8xf32> to vector<8x1xf32>
    %cst_5 = arith.constant 6.400000e+01 : f32
    %5 = vector.broadcast %cst_5 : f32 to vector<8x1xf32>
    %6 = arith.divf %4, %5 : vector<8x1xf32>
    %7 = vector.broadcast %6 : vector<8x1xf32> to vector<8x64xf32>
    %8 = arith.subf %0, %7 : vector<8x64xf32>
    %9 = arith.mulf %8, %8 : vector<8x64xf32>
    %cst_6 = arith.constant dense<0.000000e+00> : vector<8xf32>
    %10 = vector.multi_reduction <add>, %9, %cst_6 [1] : vector<8x64xf32> to vector<8xf32>
    %11 = vector.shape_cast %10 : vector<8xf32> to vector<8x1xf32>
    %cst_7 = arith.constant 6.400000e+01 : f32
    %12 = vector.broadcast %cst_7 : f32 to vector<8x1xf32>
    %13 = arith.divf %11, %12 : vector<8x1xf32>
    %cst_8 = arith.constant 9.99999974E-6 : f32
    %14 = vector.broadcast %cst_8 : f32 to vector<8x1xf32>
    %15 = arith.addf %13, %14 : vector<8x1xf32>
    %16 = math.rsqrt %15 : vector<8x1xf32>
    %17 = vector.broadcast %16 : vector<8x1xf32> to vector<8x64xf32>
    %18 = arith.mulf %8, %17 : vector<8x64xf32>
    %19 = vector.broadcast %1 : vector<1x64xf32> to vector<8x64xf32>
    %20 = arith.mulf %18, %19 : vector<8x64xf32>
    %21 = vector.broadcast %2 : vector<1x64xf32> to vector<8x64xf32>
    %22 = arith.addf %20, %21 : vector<8x64xf32>
    %23 = arith.truncf %22 : vector<8x64xf32> to vector<8x64xbf16>
    %c0_9 = arith.constant 0 : index
    %c0_10 = arith.constant 0 : index
    %24 = vector.load %arg2[%c0_9, %c0_10] : memref<8x64xf32, #tpu.memory_space<vmem>>, vector<8x64xf32>
    %25 = arith.truncf %24 : vector<8x64xf32> to vector<8x64xbf16>
    %c0_11 = arith.constant 0 : index
    %c0_12 = arith.constant 0 : index
    %26 = vector.load %arg5[%c0_11, %c0_12] : memref<64x64xbf16, #tpu.memory_space<vmem>>, vector<64x64xbf16>
    %cst_13 = arith.constant dense<0.000000e+00> : vector<8x64xf32>
    %27 = tpu.matmul %23, %26, %cst_13 {dimension_numbers = #tpu.dot_dimension_numbers<[1], [0], [0], [1], [0, 0, 1, 1], [], []>} : vector<8x64xbf16>, vector<64x64xbf16>, vector<8x64xf32> -> vector<8x64xf32>
    %c0_14 = arith.constant 0 : index
    %c0_15 = arith.constant 0 : index
    %28 = vector.load %arg6[%c0_14, %c0_15] : memref<64x64xbf16, #tpu.memory_space<vmem>>, vector<64x64xbf16>
    %cst_16 = arith.constant dense<0.000000e+00> : vector<8x64xf32>
    %29 = tpu.matmul %25, %28, %cst_16 {dimension_numbers = #tpu.dot_dimension_numbers<[1], [0], [0], [1], [0, 0, 1, 1], [], []>} : vector<8x64xbf16>, vector<64x64xbf16>, vector<8x64xf32> -> vector<8x64xf32>
    %c0_17 = arith.constant 0 : index
    %c0_18 = arith.constant 0 : index
    %30 = vector.load %arg7[%c0_17, %c0_18] : memref<64x64xbf16, #tpu.memory_space<vmem>>, vector<64x64xbf16>
    %cst_19 = arith.constant dense<0.000000e+00> : vector<8x64xf32>
    %31 = tpu.matmul %25, %30, %cst_19 {dimension_numbers = #tpu.dot_dimension_numbers<[1], [0], [0], [1], [0, 0, 1, 1], [], []>} : vector<8x64xbf16>, vector<64x64xbf16>, vector<8x64xf32> -> vector<8x64xf32>
    %c0_20 = arith.constant 0 : index
    %c0_21 = arith.constant 0 : index
    %32 = vector.load %arg9[%c0_20, %c0_21] : memref<1x64xf32, #tpu.memory_space<vmem>>, vector<1x64xf32>
    %33 = vector.broadcast %32 : vector<1x64xf32> to vector<8x64xf32>
    %34 = arith.addf %0, %33 : vector<8x64xf32>
    %35 = vector.extract_strided_slice %27 {offsets = [0, 0], sizes = [8, 16], strides = [1, 1]} : vector<8x64xf32> to vector<8x16xf32>
    %36 = vector.extract_strided_slice %29 {offsets = [0, 0], sizes = [8, 16], strides = [1, 1]} : vector<8x64xf32> to vector<8x16xf32>
    %37 = vector.extract_strided_slice %31 {offsets = [0, 0], sizes = [8, 16], strides = [1, 1]} : vector<8x64xf32> to vector<8x16xf32>
    %cst_22 = arith.constant dense<0.000000e+00> : vector<8x8xf32>
    %38 = tpu.matmul %35, %36, %cst_22 {dimension_numbers = #tpu.dot_dimension_numbers<[1], [1], [0], [0], [0, 0, 1, 0], [], []>} : vector<8x16xf32>, vector<8x16xf32>, vector<8x8xf32> -> vector<8x8xf32>
    %cst_23 = arith.constant 2.500000e-01 : f32
    %39 = vector.broadcast %cst_23 : f32 to vector<8x8xf32>
    %40 = arith.mulf %38, %39 : vector<8x8xf32>
    %cst_24 = arith.constant dense<0xFF800000> : vector<8xf32>
    %41 = vector.multi_reduction <maximumf>, %40, %cst_24 [1] : vector<8x8xf32> to vector<8xf32>
    %42 = vector.shape_cast %41 : vector<8xf32> to vector<8x1xf32>
    %43 = vector.broadcast %42 : vector<8x1xf32> to vector<8x8xf32>
    %44 = arith.subf %40, %43 : vector<8x8xf32>
    %45 = math.exp %44 : vector<8x8xf32>
    %cst_25 = arith.constant dense<0.000000e+00> : vector<8xf32>
    %46 = vector.multi_reduction <add>, %45, %cst_25 [1] : vector<8x8xf32> to vector<8xf32>
    %47 = vector.shape_cast %46 : vector<8xf32> to vector<8x1xf32>
    %48 = tpu.reciprocal %47 {approx = true} : vector<8x1xf32> -> vector<8x1xf32>
    %49 = vector.broadcast %48 : vector<8x1xf32> to vector<8x8xf32>
    %50 = arith.mulf %45, %49 : vector<8x8xf32>
    %cst_26 = arith.constant dense<0.000000e+00> : vector<8x16xf32>
    %51 = tpu.matmul %50, %37, %cst_26 {dimension_numbers = #tpu.dot_dimension_numbers<[1], [0], [0], [1], [0, 0, 1, 1], [], []>} : vector<8x8xf32>, vector<8x16xf32>, vector<8x16xf32> -> vector<8x16xf32>
    %52 = arith.truncf %51 : vector<8x16xf32> to vector<8x16xbf16>
    %c0_27 = arith.constant 0 : index
    %c0_28 = arith.constant 0 : index
    %53 = vector.load %arg8[%c0_27, %c0_28] : memref<64x64xbf16, #tpu.memory_space<vmem>>, vector<16x64xbf16>
    %cst_29 = arith.constant dense<0.000000e+00> : vector<8x64xf32>
    %54 = tpu.matmul %52, %53, %cst_29 {dimension_numbers = #tpu.dot_dimension_numbers<[1], [0], [0], [1], [0, 0, 1, 1], [], []>} : vector<8x16xbf16>, vector<16x64xbf16>, vector<8x64xf32> -> vector<8x64xf32>
    %55 = arith.addf %34, %54 : vector<8x64xf32>
    %56 = vector.extract_strided_slice %27 {offsets = [0, 16], sizes = [8, 16], strides = [1, 1]} : vector<8x64xf32> to vector<8x16xf32>
    %57 = vector.extract_strided_slice %29 {offsets = [0, 16], sizes = [8, 16], strides = [1, 1]} : vector<8x64xf32> to vector<8x16xf32>
    %58 = vector.extract_strided_slice %31 {offsets = [0, 16], sizes = [8, 16], strides = [1, 1]} : vector<8x64xf32> to vector<8x16xf32>
    %cst_30 = arith.constant dense<0.000000e+00> : vector<8x8xf32>
    %59 = tpu.matmul %56, %57, %cst_30 {dimension_numbers = #tpu.dot_dimension_numbers<[1], [1], [0], [0], [0, 0, 1, 0], [], []>} : vector<8x16xf32>, vector<8x16xf32>, vector<8x8xf32> -> vector<8x8xf32>
    %cst_31 = arith.constant 2.500000e-01 : f32
    %60 = vector.broadcast %cst_31 : f32 to vector<8x8xf32>
    %61 = arith.mulf %59, %60 : vector<8x8xf32>
    %cst_32 = arith.constant dense<0xFF800000> : vector<8xf32>
    %62 = vector.multi_reduction <maximumf>, %61, %cst_32 [1] : vector<8x8xf32> to vector<8xf32>
    %63 = vector.shape_cast %62 : vector<8xf32> to vector<8x1xf32>
    %64 = vector.broadcast %63 : vector<8x1xf32> to vector<8x8xf32>
    %65 = arith.subf %61, %64 : vector<8x8xf32>
    %66 = math.exp %65 : vector<8x8xf32>
    %cst_33 = arith.constant dense<0.000000e+00> : vector<8xf32>
    %67 = vector.multi_reduction <add>, %66, %cst_33 [1] : vector<8x8xf32> to vector<8xf32>
    %68 = vector.shape_cast %67 : vector<8xf32> to vector<8x1xf32>
    %69 = tpu.reciprocal %68 {approx = true} : vector<8x1xf32> -> vector<8x1xf32>
    %70 = vector.broadcast %69 : vector<8x1xf32> to vector<8x8xf32>
    %71 = arith.mulf %66, %70 : vector<8x8xf32>
    %cst_34 = arith.constant dense<0.000000e+00> : vector<8x16xf32>
    %72 = tpu.matmul %71, %58, %cst_34 {dimension_numbers = #tpu.dot_dimension_numbers<[1], [0], [0], [1], [0, 0, 1, 1], [], []>} : vector<8x8xf32>, vector<8x16xf32>, vector<8x16xf32> -> vector<8x16xf32>
    %73 = arith.truncf %72 : vector<8x16xf32> to vector<8x16xbf16>
    %c16 = arith.constant 16 : index
    %c0_35 = arith.constant 0 : index
    %74 = vector.load %arg8[%c16, %c0_35] : memref<64x64xbf16, #tpu.memory_space<vmem>>, vector<16x64xbf16>
    %cst_36 = arith.constant dense<0.000000e+00> : vector<8x64xf32>
    %75 = tpu.matmul %73, %74, %cst_36 {dimension_numbers = #tpu.dot_dimension_numbers<[1], [0], [0], [1], [0, 0, 1, 1], [], []>} : vector<8x16xbf16>, vector<16x64xbf16>, vector<8x64xf32> -> vector<8x64xf32>
    %76 = arith.addf %55, %75 : vector<8x64xf32>
    %77 = vector.extract_strided_slice %27 {offsets = [0, 32], sizes = [8, 16], strides = [1, 1]} : vector<8x64xf32> to vector<8x16xf32>
    %78 = vector.extract_strided_slice %29 {offsets = [0, 32], sizes = [8, 16], strides = [1, 1]} : vector<8x64xf32> to vector<8x16xf32>
    %79 = vector.extract_strided_slice %31 {offsets = [0, 32], sizes = [8, 16], strides = [1, 1]} : vector<8x64xf32> to vector<8x16xf32>
    %cst_37 = arith.constant dense<0.000000e+00> : vector<8x8xf32>
    %80 = tpu.matmul %77, %78, %cst_37 {dimension_numbers = #tpu.dot_dimension_numbers<[1], [1], [0], [0], [0, 0, 1, 0], [], []>} : vector<8x16xf32>, vector<8x16xf32>, vector<8x8xf32> -> vector<8x8xf32>
    %cst_38 = arith.constant 2.500000e-01 : f32
    %81 = vector.broadcast %cst_38 : f32 to vector<8x8xf32>
    %82 = arith.mulf %80, %81 : vector<8x8xf32>
    %cst_39 = arith.constant dense<0xFF800000> : vector<8xf32>
    %83 = vector.multi_reduction <maximumf>, %82, %cst_39 [1] : vector<8x8xf32> to vector<8xf32>
    %84 = vector.shape_cast %83 : vector<8xf32> to vector<8x1xf32>
    %85 = vector.broadcast %84 : vector<8x1xf32> to vector<8x8xf32>
    %86 = arith.subf %82, %85 : vector<8x8xf32>
    %87 = math.exp %86 : vector<8x8xf32>
    %cst_40 = arith.constant dense<0.000000e+00> : vector<8xf32>
    %88 = vector.multi_reduction <add>, %87, %cst_40 [1] : vector<8x8xf32> to vector<8xf32>
    %89 = vector.shape_cast %88 : vector<8xf32> to vector<8x1xf32>
    %90 = tpu.reciprocal %89 {approx = true} : vector<8x1xf32> -> vector<8x1xf32>
    %91 = vector.broadcast %90 : vector<8x1xf32> to vector<8x8xf32>
    %92 = arith.mulf %87, %91 : vector<8x8xf32>
    %cst_41 = arith.constant dense<0.000000e+00> : vector<8x16xf32>
    %93 = tpu.matmul %92, %79, %cst_41 {dimension_numbers = #tpu.dot_dimension_numbers<[1], [0], [0], [1], [0, 0, 1, 1], [], []>} : vector<8x8xf32>, vector<8x16xf32>, vector<8x16xf32> -> vector<8x16xf32>
    %94 = arith.truncf %93 : vector<8x16xf32> to vector<8x16xbf16>
    %c32 = arith.constant 32 : index
    %c0_42 = arith.constant 0 : index
    %95 = vector.load %arg8[%c32, %c0_42] : memref<64x64xbf16, #tpu.memory_space<vmem>>, vector<16x64xbf16>
    %cst_43 = arith.constant dense<0.000000e+00> : vector<8x64xf32>
    %96 = tpu.matmul %94, %95, %cst_43 {dimension_numbers = #tpu.dot_dimension_numbers<[1], [0], [0], [1], [0, 0, 1, 1], [], []>} : vector<8x16xbf16>, vector<16x64xbf16>, vector<8x64xf32> -> vector<8x64xf32>
    %97 = arith.addf %76, %96 : vector<8x64xf32>
    %98 = vector.extract_strided_slice %27 {offsets = [0, 48], sizes = [8, 16], strides = [1, 1]} : vector<8x64xf32> to vector<8x16xf32>
    %99 = vector.extract_strided_slice %29 {offsets = [0, 48], sizes = [8, 16], strides = [1, 1]} : vector<8x64xf32> to vector<8x16xf32>
    %100 = vector.extract_strided_slice %31 {offsets = [0, 48], sizes = [8, 16], strides = [1, 1]} : vector<8x64xf32> to vector<8x16xf32>
    %cst_44 = arith.constant dense<0.000000e+00> : vector<8x8xf32>
    %101 = tpu.matmul %98, %99, %cst_44 {dimension_numbers = #tpu.dot_dimension_numbers<[1], [1], [0], [0], [0, 0, 1, 0], [], []>} : vector<8x16xf32>, vector<8x16xf32>, vector<8x8xf32> -> vector<8x8xf32>
    %cst_45 = arith.constant 2.500000e-01 : f32
    %102 = vector.broadcast %cst_45 : f32 to vector<8x8xf32>
    %103 = arith.mulf %101, %102 : vector<8x8xf32>
    %cst_46 = arith.constant dense<0xFF800000> : vector<8xf32>
    %104 = vector.multi_reduction <maximumf>, %103, %cst_46 [1] : vector<8x8xf32> to vector<8xf32>
    %105 = vector.shape_cast %104 : vector<8xf32> to vector<8x1xf32>
    %106 = vector.broadcast %105 : vector<8x1xf32> to vector<8x8xf32>
    %107 = arith.subf %103, %106 : vector<8x8xf32>
    %108 = math.exp %107 : vector<8x8xf32>
    %cst_47 = arith.constant dense<0.000000e+00> : vector<8xf32>
    %109 = vector.multi_reduction <add>, %108, %cst_47 [1] : vector<8x8xf32> to vector<8xf32>
    %110 = vector.shape_cast %109 : vector<8xf32> to vector<8x1xf32>
    %111 = tpu.reciprocal %110 {approx = true} : vector<8x1xf32> -> vector<8x1xf32>
    %112 = vector.broadcast %111 : vector<8x1xf32> to vector<8x8xf32>
    %113 = arith.mulf %108, %112 : vector<8x8xf32>
    %cst_48 = arith.constant dense<0.000000e+00> : vector<8x16xf32>
    %114 = tpu.matmul %113, %100, %cst_48 {dimension_numbers = #tpu.dot_dimension_numbers<[1], [0], [0], [1], [0, 0, 1, 1], [], []>} : vector<8x8xf32>, vector<8x16xf32>, vector<8x16xf32> -> vector<8x16xf32>
    %115 = arith.truncf %114 : vector<8x16xf32> to vector<8x16xbf16>
    %c48 = arith.constant 48 : index
    %c0_49 = arith.constant 0 : index
    %116 = vector.load %arg8[%c48, %c0_49] : memref<64x64xbf16, #tpu.memory_space<vmem>>, vector<16x64xbf16>
    %cst_50 = arith.constant dense<0.000000e+00> : vector<8x64xf32>
    %117 = tpu.matmul %115, %116, %cst_50 {dimension_numbers = #tpu.dot_dimension_numbers<[1], [0], [0], [1], [0, 0, 1, 1], [], []>} : vector<8x16xbf16>, vector<16x64xbf16>, vector<8x64xf32> -> vector<8x64xf32>
    %118 = arith.addf %97, %117 : vector<8x64xf32>
    %c0_51 = arith.constant 0 : index
    %c0_52 = arith.constant 0 : index
    %119 = vector.load %arg10[%c0_51, %c0_52] : memref<8x64xf32, #tpu.memory_space<vmem>>, vector<8x64xf32>
    tpu.vector_store %arg10[%c0_51, %c0_52], %118 {strides = array<i32>} : memref<8x64xf32, #tpu.memory_space<vmem>>, vector<8x64xf32>,
    return
  }
  func.func @transform_0(%arg0: i32) -> (i32, i32) {
    %c0_i32 = arith.constant 0 : i32
    %c0_i32_0 = arith.constant 0 : i32
    return %arg0, %c0_i32 : i32, i32
  }
  func.func @transform_1(%arg0: i32) -> (i32, i32) {
    %c0_i32 = arith.constant 0 : i32
    %c0_i32_0 = arith.constant 0 : i32
    return %arg0, %c0_i32 : i32, i32
  }
  func.func @transform_2(%arg0: i32) -> (i32, i32) {
    %c0_i32 = arith.constant 0 : i32
    %c0_i32_0 = arith.constant 0 : i32
    %c0_i32_1 = arith.constant 0 : i32
    return %c0_i32, %c0_i32_0 : i32, i32
  }
  func.func @transform_3(%arg0: i32) -> (i32, i32) {
    %c0_i32 = arith.constant 0 : i32
    %c0_i32_0 = arith.constant 0 : i32
    %c0_i32_1 = arith.constant 0 : i32
    return %c0_i32, %c0_i32_0 : i32, i32
  }
  func.func @transform_4(%arg0: i32) -> (i32, i32) {
    %c0_i32 = arith.constant 0 : i32
    %c0_i32_0 = arith.constant 0 : i32
    %c0_i32_1 = arith.constant 0 : i32
    return %c0_i32, %c0_i32_0 : i32, i32
  }
  func.func @transform_5(%arg0: i32) -> (i32, i32) {
    %c0_i32 = arith.constant 0 : i32
    %c0_i32_0 = arith.constant 0 : i32
    %c0_i32_1 = arith.constant 0 : i32
    return %c0_i32, %c0_i32_0 : i32, i32
  }
  func.func @transform_6(%arg0: i32) -> (i32, i32) {
    %c0_i32 = arith.constant 0 : i32
    %c0_i32_0 = arith.constant 0 : i32
    %c0_i32_1 = arith.constant 0 : i32
    return %c0_i32, %c0_i32_0 : i32, i32
  }
  func.func @transform_7(%arg0: i32) -> (i32, i32) {
    %c0_i32 = arith.constant 0 : i32
    %c0_i32_0 = arith.constant 0 : i32
    %c0_i32_1 = arith.constant 0 : i32
    return %c0_i32, %c0_i32_0 : i32, i32
  }
  func.func @transform_8(%arg0: i32) -> (i32, i32) {
    %c0_i32 = arith.constant 0 : i32
    %c0_i32_0 = arith.constant 0 : i32
    %c0_i32_1 = arith.constant 0 : i32
    return %c0_i32, %c0_i32_0 : i32, i32
  }
  func.func @transform_9(%arg0: i32) -> (i32, i32) {
    %c0_i32 = arith.constant 0 : i32
    %c0_i32_0 = arith.constant 0 : i32
    return %arg0, %c0_i32 : i32, i32
  }
}

module attributes {stable_mosaic.version = 11 : i64} {
  func.func @_ff_kernel(%arg0: i32, %arg1: memref<8x64xf32, #tpu.memory_space<vmem>>, %arg2: memref<1x64xf32, #tpu.memory_space<vmem>>, %arg3: memref<1x64xf32, #tpu.memory_space<vmem>>, %arg4: memref<64x256xbf16, #tpu.memory_space<vmem>>, %arg5: memref<1x256xf32, #tpu.memory_space<vmem>>, %arg6: memref<256x64xbf16, #tpu.memory_space<vmem>>, %arg7: memref<1x64xf32, #tpu.memory_space<vmem>>, %arg8: memref<8x64xf32, #tpu.memory_space<vmem>>) attributes {dimension_semantics = [#tpu.dimension_semantics<parallel>], iteration_bounds = array<i64: 2>, scalar_prefetch = 0 : i64, scratch_operands = 0 : i64, tpu.core_type = #tpu.core_type<tc>, window_params = [{transform_indices = @transform_0, window_bounds = array<i64: 8, 64>}, {pipeline_mode = #tpu.pipeline_mode<synchronous>, transform_indices = @transform_1, window_bounds = array<i64: 1, 64>}, {pipeline_mode = #tpu.pipeline_mode<synchronous>, transform_indices = @transform_2, window_bounds = array<i64: 1, 64>}, {pipeline_mode = #tpu.pipeline_mode<synchronous>, transform_indices = @transform_3, window_bounds = array<i64: 64, 256>}, {pipeline_mode = #tpu.pipeline_mode<synchronous>, transform_indices = @transform_4, window_bounds = array<i64: 1, 256>}, {pipeline_mode = #tpu.pipeline_mode<synchronous>, transform_indices = @transform_5, window_bounds = array<i64: 256, 64>}, {pipeline_mode = #tpu.pipeline_mode<synchronous>, transform_indices = @transform_6, window_bounds = array<i64: 1, 64>}, {transform_indices = @transform_7, window_bounds = array<i64: 8, 64>}]} {
    %c0 = arith.constant 0 : index
    %c0_0 = arith.constant 0 : index
    %0 = vector.load %arg1[%c0, %c0_0] : memref<8x64xf32, #tpu.memory_space<vmem>>, vector<8x64xf32>
    %c0_1 = arith.constant 0 : index
    %c0_2 = arith.constant 0 : index
    %1 = vector.load %arg2[%c0_1, %c0_2] : memref<1x64xf32, #tpu.memory_space<vmem>>, vector<1x64xf32>
    %c0_3 = arith.constant 0 : index
    %c0_4 = arith.constant 0 : index
    %2 = vector.load %arg3[%c0_3, %c0_4] : memref<1x64xf32, #tpu.memory_space<vmem>>, vector<1x64xf32>
    %cst = arith.constant dense<0.000000e+00> : vector<8xf32>
    %3 = vector.multi_reduction <add>, %0, %cst [1] : vector<8x64xf32> to vector<8xf32>
    %4 = vector.shape_cast %3 : vector<8xf32> to vector<8x1xf32>
    %cst_5 = arith.constant 6.400000e+01 : f32
    %5 = vector.broadcast %cst_5 : f32 to vector<8x1xf32>
    %6 = arith.divf %4, %5 : vector<8x1xf32>
    %7 = vector.broadcast %6 : vector<8x1xf32> to vector<8x64xf32>
    %8 = arith.subf %0, %7 : vector<8x64xf32>
    %9 = arith.mulf %8, %8 : vector<8x64xf32>
    %cst_6 = arith.constant dense<0.000000e+00> : vector<8xf32>
    %10 = vector.multi_reduction <add>, %9, %cst_6 [1] : vector<8x64xf32> to vector<8xf32>
    %11 = vector.shape_cast %10 : vector<8xf32> to vector<8x1xf32>
    %cst_7 = arith.constant 6.400000e+01 : f32
    %12 = vector.broadcast %cst_7 : f32 to vector<8x1xf32>
    %13 = arith.divf %11, %12 : vector<8x1xf32>
    %cst_8 = arith.constant 9.99999974E-6 : f32
    %14 = vector.broadcast %cst_8 : f32 to vector<8x1xf32>
    %15 = arith.addf %13, %14 : vector<8x1xf32>
    %16 = math.rsqrt %15 : vector<8x1xf32>
    %17 = vector.broadcast %16 : vector<8x1xf32> to vector<8x64xf32>
    %18 = arith.mulf %8, %17 : vector<8x64xf32>
    %19 = vector.broadcast %1 : vector<1x64xf32> to vector<8x64xf32>
    %20 = arith.mulf %18, %19 : vector<8x64xf32>
    %21 = vector.broadcast %2 : vector<1x64xf32> to vector<8x64xf32>
    %22 = arith.addf %20, %21 : vector<8x64xf32>
    %23 = arith.truncf %22 : vector<8x64xf32> to vector<8x64xbf16>
    %c0_9 = arith.constant 0 : index
    %c0_10 = arith.constant 0 : index
    %24 = vector.load %arg4[%c0_9, %c0_10] : memref<64x256xbf16, #tpu.memory_space<vmem>>, vector<64x256xbf16>
    %cst_11 = arith.constant dense<0.000000e+00> : vector<8x256xf32>
    %25 = tpu.matmul %23, %24, %cst_11 {dimension_numbers = #tpu.dot_dimension_numbers<[1], [0], [0], [1], [0, 0, 1, 1], [], []>} : vector<8x64xbf16>, vector<64x256xbf16>, vector<8x256xf32> -> vector<8x256xf32>
    %c0_12 = arith.constant 0 : index
    %c0_13 = arith.constant 0 : index
    %26 = vector.load %arg5[%c0_12, %c0_13] : memref<1x256xf32, #tpu.memory_space<vmem>>, vector<1x256xf32>
    %27 = vector.broadcast %26 : vector<1x256xf32> to vector<8x256xf32>
    %28 = arith.addf %25, %27 : vector<8x256xf32>
    %cst_14 = arith.constant 5.000000e-01 : f32
    %29 = vector.broadcast %cst_14 : f32 to vector<8x256xf32>
    %30 = arith.mulf %29, %28 : vector<8x256xf32>
    %cst_15 = arith.constant 0.707106769 : f32
    %31 = vector.broadcast %cst_15 : f32 to vector<8x256xf32>
    %32 = arith.mulf %28, %31 : vector<8x256xf32>
    %33 = math.absf %32 : vector<8x256xf32>
    %cst_16 = arith.constant 0.327591091 : f32
    %34 = vector.broadcast %cst_16 : f32 to vector<8x256xf32>
    %35 = arith.mulf %34, %33 : vector<8x256xf32>
    %cst_17 = arith.constant 1.000000e+00 : f32
    %36 = vector.broadcast %cst_17 : f32 to vector<8x256xf32>
    %37 = arith.addf %36, %35 : vector<8x256xf32>
    %cst_18 = arith.constant 1.000000e+00 : f32
    %38 = vector.broadcast %cst_18 : f32 to vector<8x256xf32>
    %39 = arith.divf %38, %37 : vector<8x256xf32>
    %cst_19 = arith.constant 1.06140542 : f32
    %40 = vector.broadcast %cst_19 : f32 to vector<8x256xf32>
    %41 = arith.mulf %40, %39 : vector<8x256xf32>
    %cst_20 = arith.constant -1.45315206 : f32
    %42 = vector.broadcast %cst_20 : f32 to vector<8x256xf32>
    %43 = arith.addf %41, %42 : vector<8x256xf32>
    %44 = arith.mulf %43, %39 : vector<8x256xf32>
    %cst_21 = arith.constant 1.42141378 : f32
    %45 = vector.broadcast %cst_21 : f32 to vector<8x256xf32>
    %46 = arith.addf %44, %45 : vector<8x256xf32>
    %47 = arith.mulf %46, %39 : vector<8x256xf32>
    %cst_22 = arith.constant -0.284496725 : f32
    %48 = vector.broadcast %cst_22 : f32 to vector<8x256xf32>
    %49 = arith.addf %47, %48 : vector<8x256xf32>
    %50 = arith.mulf %49, %39 : vector<8x256xf32>
    %cst_23 = arith.constant 0.254829586 : f32
    %51 = vector.broadcast %cst_23 : f32 to vector<8x256xf32>
    %52 = arith.addf %50, %51 : vector<8x256xf32>
    %53 = arith.mulf %52, %39 : vector<8x256xf32>
    %cst_24 = arith.constant 0.000000e+00 : f32
    %54 = vector.broadcast %cst_24 : f32 to vector<8x256xf32>
    %55 = arith.subf %54, %33 : vector<8x256xf32>
    %56 = arith.mulf %55, %33 : vector<8x256xf32>
    %57 = math.exp %56 : vector<8x256xf32>
    %58 = arith.mulf %53, %57 : vector<8x256xf32>
    %cst_25 = arith.constant 1.000000e+00 : f32
    %59 = vector.broadcast %cst_25 : f32 to vector<8x256xf32>
    %60 = arith.subf %59, %58 : vector<8x256xf32>
    %cst_26 = arith.constant 0.000000e+00 : f32
    %61 = vector.broadcast %cst_26 : f32 to vector<8x256xf32>
    %62 = arith.cmpf oge, %32, %61 : vector<8x256xf32>
    %cst_27 = arith.constant 0.000000e+00 : f32
    %63 = vector.broadcast %cst_27 : f32 to vector<8x256xf32>
    %64 = arith.subf %63, %60 : vector<8x256xf32>
    %65 = arith.select %62, %60, %64 : vector<8x256xi1>, vector<8x256xf32>
    %cst_28 = arith.constant 1.000000e+00 : f32
    %66 = vector.broadcast %cst_28 : f32 to vector<8x256xf32>
    %67 = arith.addf %66, %65 : vector<8x256xf32>
    %68 = arith.mulf %30, %67 : vector<8x256xf32>
    %69 = arith.truncf %68 : vector<8x256xf32> to vector<8x256xbf16>
    %c0_29 = arith.constant 0 : index
    %c0_30 = arith.constant 0 : index
    %70 = vector.load %arg6[%c0_29, %c0_30] : memref<256x64xbf16, #tpu.memory_space<vmem>>, vector<256x64xbf16>
    %cst_31 = arith.constant dense<0.000000e+00> : vector<8x64xf32>
    %71 = tpu.matmul %69, %70, %cst_31 {dimension_numbers = #tpu.dot_dimension_numbers<[1], [0], [0], [1], [0, 0, 1, 1], [], []>} : vector<8x256xbf16>, vector<256x64xbf16>, vector<8x64xf32> -> vector<8x64xf32>
    %72 = arith.addf %0, %71 : vector<8x64xf32>
    %c0_32 = arith.constant 0 : index
    %c0_33 = arith.constant 0 : index
    %73 = vector.load %arg7[%c0_32, %c0_33] : memref<1x64xf32, #tpu.memory_space<vmem>>, vector<1x64xf32>
    %74 = vector.broadcast %73 : vector<1x64xf32> to vector<8x64xf32>
    %75 = arith.addf %72, %74 : vector<8x64xf32>
    %c0_34 = arith.constant 0 : index
    %c0_35 = arith.constant 0 : index
    %76 = vector.load %arg8[%c0_34, %c0_35] : memref<8x64xf32, #tpu.memory_space<vmem>>, vector<8x64xf32>
    tpu.vector_store %arg8[%c0_34, %c0_35], %75 {strides = array<i32>} : memref<8x64xf32, #tpu.memory_space<vmem>>, vector<8x64xf32>,
    return
  }
  func.func @transform_0(%arg0: i32) -> (i32, i32) {
    %c0_i32 = arith.constant 0 : i32
    %c0_i32_0 = arith.constant 0 : i32
    return %arg0, %c0_i32 : i32, i32
  }
  func.func @transform_1(%arg0: i32) -> (i32, i32) {
    %c0_i32 = arith.constant 0 : i32
    %c0_i32_0 = arith.constant 0 : i32
    %c0_i32_1 = arith.constant 0 : i32
    return %c0_i32, %c0_i32_0 : i32, i32
  }
  func.func @transform_2(%arg0: i32) -> (i32, i32) {
    %c0_i32 = arith.constant 0 : i32
    %c0_i32_0 = arith.constant 0 : i32
    %c0_i32_1 = arith.constant 0 : i32
    return %c0_i32, %c0_i32_0 : i32, i32
  }
  func.func @transform_3(%arg0: i32) -> (i32, i32) {
    %c0_i32 = arith.constant 0 : i32
    %c0_i32_0 = arith.constant 0 : i32
    %c0_i32_1 = arith.constant 0 : i32
    return %c0_i32, %c0_i32_0 : i32, i32
  }
  func.func @transform_4(%arg0: i32) -> (i32, i32) {
    %c0_i32 = arith.constant 0 : i32
    %c0_i32_0 = arith.constant 0 : i32
    %c0_i32_1 = arith.constant 0 : i32
    return %c0_i32, %c0_i32_0 : i32, i32
  }
  func.func @transform_5(%arg0: i32) -> (i32, i32) {
    %c0_i32 = arith.constant 0 : i32
    %c0_i32_0 = arith.constant 0 : i32
    %c0_i32_1 = arith.constant 0 : i32
    return %c0_i32, %c0_i32_0 : i32, i32
  }
  func.func @transform_6(%arg0: i32) -> (i32, i32) {
    %c0_i32 = arith.constant 0 : i32
    %c0_i32_0 = arith.constant 0 : i32
    %c0_i32_1 = arith.constant 0 : i32
    return %c0_i32, %c0_i32_0 : i32, i32
  }
  func.func @transform_7(%arg0: i32) -> (i32, i32) {
    %c0_i32 = arith.constant 0 : i32
    %c0_i32_0 = arith.constant 0 : i32
    return %arg0, %c0_i32 : i32, i32
  }
}

module attributes {stable_mosaic.version = 11 : i64} {
  func.func @_ln_proj_kernel(%arg0: i32, %arg1: memref<8x64xf32, #tpu.memory_space<vmem>>, %arg2: memref<1x64xf32, #tpu.memory_space<vmem>>, %arg3: memref<1x64xf32, #tpu.memory_space<vmem>>, %arg4: memref<64x8xbf16, #tpu.memory_space<vmem>>, %arg5: memref<1x8xf32, #tpu.memory_space<vmem>>, %arg6: memref<8x8xf32, #tpu.memory_space<vmem>>) attributes {dimension_semantics = [#tpu.dimension_semantics<parallel>], iteration_bounds = array<i64: 2>, scalar_prefetch = 0 : i64, scratch_operands = 0 : i64, tpu.core_type = #tpu.core_type<tc>, window_params = [{transform_indices = @transform_0, window_bounds = array<i64: 8, 64>}, {pipeline_mode = #tpu.pipeline_mode<synchronous>, transform_indices = @transform_1, window_bounds = array<i64: 1, 64>}, {pipeline_mode = #tpu.pipeline_mode<synchronous>, transform_indices = @transform_2, window_bounds = array<i64: 1, 64>}, {pipeline_mode = #tpu.pipeline_mode<synchronous>, transform_indices = @transform_3, window_bounds = array<i64: 64, 8>}, {pipeline_mode = #tpu.pipeline_mode<synchronous>, transform_indices = @transform_4, window_bounds = array<i64: 1, 8>}, {transform_indices = @transform_5, window_bounds = array<i64: 8, 8>}]} {
    %c0 = arith.constant 0 : index
    %c0_0 = arith.constant 0 : index
    %0 = vector.load %arg1[%c0, %c0_0] : memref<8x64xf32, #tpu.memory_space<vmem>>, vector<8x64xf32>
    %c0_1 = arith.constant 0 : index
    %c0_2 = arith.constant 0 : index
    %1 = vector.load %arg2[%c0_1, %c0_2] : memref<1x64xf32, #tpu.memory_space<vmem>>, vector<1x64xf32>
    %c0_3 = arith.constant 0 : index
    %c0_4 = arith.constant 0 : index
    %2 = vector.load %arg3[%c0_3, %c0_4] : memref<1x64xf32, #tpu.memory_space<vmem>>, vector<1x64xf32>
    %cst = arith.constant dense<0.000000e+00> : vector<8xf32>
    %3 = vector.multi_reduction <add>, %0, %cst [1] : vector<8x64xf32> to vector<8xf32>
    %4 = vector.shape_cast %3 : vector<8xf32> to vector<8x1xf32>
    %cst_5 = arith.constant 6.400000e+01 : f32
    %5 = vector.broadcast %cst_5 : f32 to vector<8x1xf32>
    %6 = arith.divf %4, %5 : vector<8x1xf32>
    %7 = vector.broadcast %6 : vector<8x1xf32> to vector<8x64xf32>
    %8 = arith.subf %0, %7 : vector<8x64xf32>
    %9 = arith.mulf %8, %8 : vector<8x64xf32>
    %cst_6 = arith.constant dense<0.000000e+00> : vector<8xf32>
    %10 = vector.multi_reduction <add>, %9, %cst_6 [1] : vector<8x64xf32> to vector<8xf32>
    %11 = vector.shape_cast %10 : vector<8xf32> to vector<8x1xf32>
    %cst_7 = arith.constant 6.400000e+01 : f32
    %12 = vector.broadcast %cst_7 : f32 to vector<8x1xf32>
    %13 = arith.divf %11, %12 : vector<8x1xf32>
    %cst_8 = arith.constant 9.99999974E-6 : f32
    %14 = vector.broadcast %cst_8 : f32 to vector<8x1xf32>
    %15 = arith.addf %13, %14 : vector<8x1xf32>
    %16 = math.rsqrt %15 : vector<8x1xf32>
    %17 = vector.broadcast %16 : vector<8x1xf32> to vector<8x64xf32>
    %18 = arith.mulf %8, %17 : vector<8x64xf32>
    %19 = vector.broadcast %1 : vector<1x64xf32> to vector<8x64xf32>
    %20 = arith.mulf %18, %19 : vector<8x64xf32>
    %21 = vector.broadcast %2 : vector<1x64xf32> to vector<8x64xf32>
    %22 = arith.addf %20, %21 : vector<8x64xf32>
    %23 = arith.truncf %22 : vector<8x64xf32> to vector<8x64xbf16>
    %c0_9 = arith.constant 0 : index
    %c0_10 = arith.constant 0 : index
    %24 = vector.load %arg4[%c0_9, %c0_10] : memref<64x8xbf16, #tpu.memory_space<vmem>>, vector<64x8xbf16>
    %cst_11 = arith.constant dense<0.000000e+00> : vector<8x8xf32>
    %25 = tpu.matmul %23, %24, %cst_11 {dimension_numbers = #tpu.dot_dimension_numbers<[1], [0], [0], [1], [0, 0, 1, 1], [], []>} : vector<8x64xbf16>, vector<64x8xbf16>, vector<8x8xf32> -> vector<8x8xf32>
    %c0_12 = arith.constant 0 : index
    %c0_13 = arith.constant 0 : index
    %26 = vector.load %arg5[%c0_12, %c0_13] : memref<1x8xf32, #tpu.memory_space<vmem>>, vector<1x8xf32>
    %27 = vector.broadcast %26 : vector<1x8xf32> to vector<8x8xf32>
    %28 = arith.addf %25, %27 : vector<8x8xf32>
    %c0_14 = arith.constant 0 : index
    %c0_15 = arith.constant 0 : index
    %29 = vector.load %arg6[%c0_14, %c0_15] : memref<8x8xf32, #tpu.memory_space<vmem>>, vector<8x8xf32>
    tpu.vector_store %arg6[%c0_14, %c0_15], %28 {strides = array<i32>} : memref<8x8xf32, #tpu.memory_space<vmem>>, vector<8x8xf32>,
    return
  }
  func.func @transform_0(%arg0: i32) -> (i32, i32) {
    %c0_i32 = arith.constant 0 : i32
    %c0_i32_0 = arith.constant 0 : i32
    return %arg0, %c0_i32 : i32, i32
  }
  func.func @transform_1(%arg0: i32) -> (i32, i32) {
    %c0_i32 = arith.constant 0 : i32
    %c0_i32_0 = arith.constant 0 : i32
    %c0_i32_1 = arith.constant 0 : i32
    return %c0_i32, %c0_i32_0 : i32, i32
  }
  func.func @transform_2(%arg0: i32) -> (i32, i32) {
    %c0_i32 = arith.constant 0 : i32
    %c0_i32_0 = arith.constant 0 : i32
    %c0_i32_1 = arith.constant 0 : i32
    return %c0_i32, %c0_i32_0 : i32, i32
  }
  func.func @transform_3(%arg0: i32) -> (i32, i32) {
    %c0_i32 = arith.constant 0 : i32
    %c0_i32_0 = arith.constant 0 : i32
    %c0_i32_1 = arith.constant 0 : i32
    return %c0_i32, %c0_i32_0 : i32, i32
  }
  func.func @transform_4(%arg0: i32) -> (i32, i32) {
    %c0_i32 = arith.constant 0 : i32
    %c0_i32_0 = arith.constant 0 : i32
    %c0_i32_1 = arith.constant 0 : i32
    return %c0_i32, %c0_i32_0 : i32, i32
  }
  func.func @transform_5(%arg0: i32) -> (i32, i32) {
    %c0_i32 = arith.constant 0 : i32
    %c0_i32_0 = arith.constant 0 : i32
    return %arg0, %c0_i32 : i32, i32
  }
}

module attributes {stable_mosaic.version = 11 : i64} {
  func.func @_resblock_kernel(%arg0: i32, %arg1: memref<2x64xf32, #tpu.memory_space<vmem>>, %arg2: memref<64x64xbf16, #tpu.memory_space<vmem>>, %arg3: memref<1x64xf32, #tpu.memory_space<vmem>>, %arg4: memref<64x64xbf16, #tpu.memory_space<vmem>>, %arg5: memref<1x64xf32, #tpu.memory_space<vmem>>, %arg6: memref<64x64xbf16, #tpu.memory_space<vmem>>, %arg7: memref<1x64xf32, #tpu.memory_space<vmem>>, %arg8: memref<2x64xf32, #tpu.memory_space<vmem>>) attributes {dimension_semantics = [#tpu.dimension_semantics<arbitrary>], iteration_bounds = array<i64: 1>, scalar_prefetch = 0 : i64, scratch_operands = 0 : i64, tpu.core_type = #tpu.core_type<tc>, window_params = [{pipeline_mode = #tpu.pipeline_mode<synchronous>, transform_indices = @transform_0, window_bounds = array<i64: 2, 64>}, {pipeline_mode = #tpu.pipeline_mode<synchronous>, transform_indices = @transform_1, window_bounds = array<i64: 64, 64>}, {pipeline_mode = #tpu.pipeline_mode<synchronous>, transform_indices = @transform_2, window_bounds = array<i64: 1, 64>}, {pipeline_mode = #tpu.pipeline_mode<synchronous>, transform_indices = @transform_3, window_bounds = array<i64: 64, 64>}, {pipeline_mode = #tpu.pipeline_mode<synchronous>, transform_indices = @transform_4, window_bounds = array<i64: 1, 64>}, {pipeline_mode = #tpu.pipeline_mode<synchronous>, transform_indices = @transform_5, window_bounds = array<i64: 64, 64>}, {pipeline_mode = #tpu.pipeline_mode<synchronous>, transform_indices = @transform_6, window_bounds = array<i64: 1, 64>}, {pipeline_mode = #tpu.pipeline_mode<synchronous>, transform_indices = @transform_7, window_bounds = array<i64: 2, 64>}]} {
    %c0 = arith.constant 0 : index
    %c0_0 = arith.constant 0 : index
    %0 = vector.load %arg1[%c0, %c0_0] : memref<2x64xf32, #tpu.memory_space<vmem>>, vector<2x64xf32>
    %1 = arith.truncf %0 : vector<2x64xf32> to vector<2x64xbf16>
    %c0_1 = arith.constant 0 : index
    %c0_2 = arith.constant 0 : index
    %2 = vector.load %arg2[%c0_1, %c0_2] : memref<64x64xbf16, #tpu.memory_space<vmem>>, vector<64x64xbf16>
    %cst = arith.constant dense<0.000000e+00> : vector<2x64xf32>
    %3 = tpu.matmul %1, %2, %cst {dimension_numbers = #tpu.dot_dimension_numbers<[1], [0], [0], [1], [0, 0, 1, 1], [], []>} : vector<2x64xbf16>, vector<64x64xbf16>, vector<2x64xf32> -> vector<2x64xf32>
    %c0_3 = arith.constant 0 : index
    %c0_4 = arith.constant 0 : index
    %4 = vector.load %arg3[%c0_3, %c0_4] : memref<1x64xf32, #tpu.memory_space<vmem>>, vector<1x64xf32>
    %5 = vector.broadcast %4 : vector<1x64xf32> to vector<2x64xf32>
    %6 = arith.addf %3, %5 : vector<2x64xf32>
    %cst_5 = arith.constant 0.000000e+00 : f32
    %7 = vector.broadcast %cst_5 : f32 to vector<2x64xf32>
    %8 = arith.maximumf %6, %7 : vector<2x64xf32>
    %9 = arith.truncf %8 : vector<2x64xf32> to vector<2x64xbf16>
    %c0_6 = arith.constant 0 : index
    %c0_7 = arith.constant 0 : index
    %10 = vector.load %arg4[%c0_6, %c0_7] : memref<64x64xbf16, #tpu.memory_space<vmem>>, vector<64x64xbf16>
    %cst_8 = arith.constant dense<0.000000e+00> : vector<2x64xf32>
    %11 = tpu.matmul %9, %10, %cst_8 {dimension_numbers = #tpu.dot_dimension_numbers<[1], [0], [0], [1], [0, 0, 1, 1], [], []>} : vector<2x64xbf16>, vector<64x64xbf16>, vector<2x64xf32> -> vector<2x64xf32>
    %c0_9 = arith.constant 0 : index
    %c0_10 = arith.constant 0 : index
    %12 = vector.load %arg5[%c0_9, %c0_10] : memref<1x64xf32, #tpu.memory_space<vmem>>, vector<1x64xf32>
    %13 = vector.broadcast %12 : vector<1x64xf32> to vector<2x64xf32>
    %14 = arith.addf %11, %13 : vector<2x64xf32>
    %cst_11 = arith.constant 0.000000e+00 : f32
    %15 = vector.broadcast %cst_11 : f32 to vector<2x64xf32>
    %16 = arith.maximumf %14, %15 : vector<2x64xf32>
    %17 = arith.truncf %16 : vector<2x64xf32> to vector<2x64xbf16>
    %c0_12 = arith.constant 0 : index
    %c0_13 = arith.constant 0 : index
    %18 = vector.load %arg6[%c0_12, %c0_13] : memref<64x64xbf16, #tpu.memory_space<vmem>>, vector<64x64xbf16>
    %cst_14 = arith.constant dense<0.000000e+00> : vector<2x64xf32>
    %19 = tpu.matmul %17, %18, %cst_14 {dimension_numbers = #tpu.dot_dimension_numbers<[1], [0], [0], [1], [0, 0, 1, 1], [], []>} : vector<2x64xbf16>, vector<64x64xbf16>, vector<2x64xf32> -> vector<2x64xf32>
    %c0_15 = arith.constant 0 : index
    %c0_16 = arith.constant 0 : index
    %20 = vector.load %arg7[%c0_15, %c0_16] : memref<1x64xf32, #tpu.memory_space<vmem>>, vector<1x64xf32>
    %21 = vector.broadcast %20 : vector<1x64xf32> to vector<2x64xf32>
    %22 = arith.addf %19, %21 : vector<2x64xf32>
    %23 = arith.addf %22, %0 : vector<2x64xf32>
    %c0_17 = arith.constant 0 : index
    %c0_18 = arith.constant 0 : index
    %24 = vector.load %arg8[%c0_17, %c0_18] : memref<2x64xf32, #tpu.memory_space<vmem>>, vector<2x64xf32>
    tpu.vector_store %arg8[%c0_17, %c0_18], %23 {strides = array<i32>} : memref<2x64xf32, #tpu.memory_space<vmem>>, vector<2x64xf32>,
    return
  }
  func.func @transform_0(%arg0: i32) -> (i32, i32) {
    %c0_i32 = arith.constant 0 : i32
    %c0_i32_0 = arith.constant 0 : i32
    %c0_i32_1 = arith.constant 0 : i32
    return %c0_i32, %c0_i32_0 : i32, i32
  }
  func.func @transform_1(%arg0: i32) -> (i32, i32) {
    %c0_i32 = arith.constant 0 : i32
    %c0_i32_0 = arith.constant 0 : i32
    %c0_i32_1 = arith.constant 0 : i32
    return %c0_i32, %c0_i32_0 : i32, i32
  }
  func.func @transform_2(%arg0: i32) -> (i32, i32) {
    %c0_i32 = arith.constant 0 : i32
    %c0_i32_0 = arith.constant 0 : i32
    %c0_i32_1 = arith.constant 0 : i32
    return %c0_i32, %c0_i32_0 : i32, i32
  }
  func.func @transform_3(%arg0: i32) -> (i32, i32) {
    %c0_i32 = arith.constant 0 : i32
    %c0_i32_0 = arith.constant 0 : i32
    %c0_i32_1 = arith.constant 0 : i32
    return %c0_i32, %c0_i32_0 : i32, i32
  }
  func.func @transform_4(%arg0: i32) -> (i32, i32) {
    %c0_i32 = arith.constant 0 : i32
    %c0_i32_0 = arith.constant 0 : i32
    %c0_i32_1 = arith.constant 0 : i32
    return %c0_i32, %c0_i32_0 : i32, i32
  }
  func.func @transform_5(%arg0: i32) -> (i32, i32) {
    %c0_i32 = arith.constant 0 : i32
    %c0_i32_0 = arith.constant 0 : i32
    %c0_i32_1 = arith.constant 0 : i32
    return %c0_i32, %c0_i32_0 : i32, i32
  }
  func.func @transform_6(%arg0: i32) -> (i32, i32) {
    %c0_i32 = arith.constant 0 : i32
    %c0_i32_0 = arith.constant 0 : i32
    %c0_i32_1 = arith.constant 0 : i32
    return %c0_i32, %c0_i32_0 : i32, i32
  }
  func.func @transform_7(%arg0: i32) -> (i32, i32) {
    %c0_i32 = arith.constant 0 : i32
    %c0_i32_0 = arith.constant 0 : i32
    %c0_i32_1 = arith.constant 0 : i32
    return %c0_i32, %c0_i32_0 : i32, i32
  }
}

module attributes {stable_mosaic.version = 11 : i64} {
  func.func @_upsample_kernel(%arg0: i32, %arg1: i32, %arg2: memref<1x4x10x8xf32, #tpu.memory_space<vmem>>, %arg3: memref<27x8x64xbf16, #tpu.memory_space<vmem>>, %arg4: memref<1x64xf32, #tpu.memory_space<vmem>>, %arg5: memref<1x1x4x64xf32, #tpu.memory_space<vmem>>) attributes {dimension_semantics = [#tpu.dimension_semantics<parallel>, #tpu.dimension_semantics<parallel>], iteration_bounds = array<i64: 2, 2>, scalar_prefetch = 0 : i64, scratch_operands = 0 : i64, tpu.core_type = #tpu.core_type<tc>, window_params = [{transform_indices = @transform_0, window_bounds = array<i64: 1, 4, 10, 8>}, {pipeline_mode = #tpu.pipeline_mode<synchronous>, transform_indices = @transform_1, window_bounds = array<i64: 27, 8, 64>}, {pipeline_mode = #tpu.pipeline_mode<synchronous>, transform_indices = @transform_2, window_bounds = array<i64: 1, 64>}, {transform_indices = @transform_3, window_bounds = array<i64: 1, 1, 4, 64>}]} {
    %0 = tpu.iota {dimensions = array<i32: 0>} : vector<4x8xi32>
    %c2_i32 = arith.constant 2 : i32
    %c0_i32 = arith.constant 0 : i32
    %1 = arith.cmpi eq, %c2_i32, %c0_i32 : i32
    %c1_i32 = arith.constant 1 : i32
    %2 = arith.select %1, %c1_i32, %c2_i32 : i32
    %3 = vector.broadcast %2 : i32 to vector<4x8xi32>
    %4 = arith.remsi %0, %3 : vector<4x8xi32>
    %c0_i32_0 = arith.constant 0 : i32
    %5 = vector.broadcast %c0_i32_0 : i32 to vector<4x8xi32>
    %6 = arith.cmpi ne, %4, %5 : vector<4x8xi32>
    %c0_i32_1 = arith.constant 0 : i32
    %7 = vector.broadcast %c0_i32_1 : i32 to vector<4x8xi32>
    %8 = arith.cmpi slt, %4, %7 : vector<4x8xi32>
    %c0_i32_2 = arith.constant 0 : i32
    %9 = arith.cmpi slt, %2, %c0_i32_2 : i32
    %10 = vector.broadcast %9 : i1 to vector<4x8xi1>
    %11 = vector.broadcast %10 : vector<4x8xi1> to vector<4x8xi1>
    %12 = arith.xori %8, %11 : vector<4x8xi1>
    %13 = arith.andi %12, %6 : vector<4x8xi1>
    %14 = vector.broadcast %2 : i32 to vector<4x8xi32>
    %15 = arith.addi %4, %14 : vector<4x8xi32>
    %16 = arith.select %13, %15, %4 : vector<4x8xi1>, vector<4x8xi32>
    %c0_i32_3 = arith.constant 0 : i32
    %17 = vector.broadcast %c0_i32_3 : i32 to vector<4x8xi32>
    %18 = arith.cmpi ne, %16, %17 : vector<4x8xi32>
    %c1_i32_4 = arith.constant 1 : i32
    %19 = vector.broadcast %c1_i32_4 : i32 to vector<4x8xi32>
    %20 = arith.cmpi ne, %16, %19 : vector<4x8xi32>
    %cst = arith.constant 0.000000e+00 : f32
    %21 = vector.broadcast %cst : f32 to vector<4x64xf32>
    %c0 = arith.constant 0 : index
    %c0_5 = arith.constant 0 : index
    %22 = vector.load %arg4[%c0, %c0_5] : memref<1x64xf32, #tpu.memory_space<vmem>>, vector<1x64xf32>
    %23 = vector.broadcast %22 : vector<1x64xf32> to vector<4x64xf32>
    %24 = arith.addf %21, %23 : vector<4x64xf32>
    %c0_i32_6 = arith.constant 0 : i32
    %25 = arith.addi %arg1, %c0_i32_6 : i32
    %c0_7 = arith.constant 0 : index
    %26 = arith.index_cast %25 : i32 to index
    %c0_8 = arith.constant 0 : index
    %c0_9 = arith.constant 0 : index
    %27 = vector.load %arg2[%c0_7, %26, %c0_8, %c0_9] : memref<1x4x10x8xf32, #tpu.memory_space<vmem>>, vector<1x1x4x8xf32>
    %28 = vector.shape_cast %27 : vector<1x1x4x8xf32> to vector<1x4x8xf32>
    %29 = vector.shape_cast %28 : vector<1x4x8xf32> to vector<4x8xf32>
    %cst_10 = arith.constant 0.000000e+00 : f32
    %30 = vector.broadcast %cst_10 : f32 to vector<4x8xf32>
    %31 = arith.select %18, %29, %30 : vector<4x8xi1>, vector<4x8xf32>
    %32 = arith.truncf %31 : vector<4x8xf32> to vector<4x8xbf16>
    %c0_11 = arith.constant 0 : index
    %c0_12 = arith.constant 0 : index
    %c0_13 = arith.constant 0 : index
    %33 = vector.load %arg3[%c0_11, %c0_12, %c0_13] : memref<27x8x64xbf16, #tpu.memory_space<vmem>>, vector<1x8x64xbf16>
    %34 = vector.shape_cast %33 : vector<1x8x64xbf16> to vector<8x64xbf16>
    %cst_14 = arith.constant dense<0.000000e+00> : vector<4x64xf32>
    %35 = tpu.matmul %32, %34, %cst_14 {dimension_numbers = #tpu.dot_dimension_numbers<[1], [0], [0], [1], [0, 0, 1, 1], [], []>} : vector<4x8xbf16>, vector<8x64xbf16>, vector<4x64xf32> -> vector<4x64xf32>
    %36 = arith.addf %24, %35 : vector<4x64xf32>
    %c0_i32_15 = arith.constant 0 : i32
    %37 = arith.addi %arg1, %c0_i32_15 : i32
    %c0_16 = arith.constant 0 : index
    %38 = arith.index_cast %37 : i32 to index
    %c1 = arith.constant 1 : index
    %c0_17 = arith.constant 0 : index
    %39 = vector.load %arg2[%c0_16, %38, %c1, %c0_17] : memref<1x4x10x8xf32, #tpu.memory_space<vmem>>, vector<1x1x4x8xf32>
    %40 = vector.shape_cast %39 : vector<1x1x4x8xf32> to vector<1x4x8xf32>
    %41 = vector.shape_cast %40 : vector<1x4x8xf32> to vector<4x8xf32>
    %42 = arith.truncf %41 : vector<4x8xf32> to vector<4x8xbf16>
    %c1_18 = arith.constant 1 : index
    %c0_19 = arith.constant 0 : index
    %c0_20 = arith.constant 0 : index
    %43 = vector.load %arg3[%c1_18, %c0_19, %c0_20] : memref<27x8x64xbf16, #tpu.memory_space<vmem>>, vector<1x8x64xbf16>
    %44 = vector.shape_cast %43 : vector<1x8x64xbf16> to vector<8x64xbf16>
    %cst_21 = arith.constant dense<0.000000e+00> : vector<4x64xf32>
    %45 = tpu.matmul %42, %44, %cst_21 {dimension_numbers = #tpu.dot_dimension_numbers<[1], [0], [0], [1], [0, 0, 1, 1], [], []>} : vector<4x8xbf16>, vector<8x64xbf16>, vector<4x64xf32> -> vector<4x64xf32>
    %46 = arith.addf %36, %45 : vector<4x64xf32>
    %c0_i32_22 = arith.constant 0 : i32
    %47 = arith.addi %arg1, %c0_i32_22 : i32
    %c0_23 = arith.constant 0 : index
    %48 = arith.index_cast %47 : i32 to index
    %c2 = arith.constant 2 : index
    %c0_24 = arith.constant 0 : index
    %49 = vector.load %arg2[%c0_23, %48, %c2, %c0_24] : memref<1x4x10x8xf32, #tpu.memory_space<vmem>>, vector<1x1x4x8xf32>
    %50 = vector.shape_cast %49 : vector<1x1x4x8xf32> to vector<1x4x8xf32>
    %51 = vector.shape_cast %50 : vector<1x4x8xf32> to vector<4x8xf32>
    %cst_25 = arith.constant 0.000000e+00 : f32
    %52 = vector.broadcast %cst_25 : f32 to vector<4x8xf32>
    %53 = arith.select %20, %51, %52 : vector<4x8xi1>, vector<4x8xf32>
    %54 = arith.truncf %53 : vector<4x8xf32> to vector<4x8xbf16>
    %c2_26 = arith.constant 2 : index
    %c0_27 = arith.constant 0 : index
    %c0_28 = arith.constant 0 : index
    %55 = vector.load %arg3[%c2_26, %c0_27, %c0_28] : memref<27x8x64xbf16, #tpu.memory_space<vmem>>, vector<1x8x64xbf16>
    %56 = vector.shape_cast %55 : vector<1x8x64xbf16> to vector<8x64xbf16>
    %cst_29 = arith.constant dense<0.000000e+00> : vector<4x64xf32>
    %57 = tpu.matmul %54, %56, %cst_29 {dimension_numbers = #tpu.dot_dimension_numbers<[1], [0], [0], [1], [0, 0, 1, 1], [], []>} : vector<4x8xbf16>, vector<8x64xbf16>, vector<4x64xf32> -> vector<4x64xf32>
    %58 = arith.addf %46, %57 : vector<4x64xf32>
    %c0_i32_30 = arith.constant 0 : i32
    %59 = arith.addi %arg1, %c0_i32_30 : i32
    %c0_31 = arith.constant 0 : index
    %60 = arith.index_cast %59 : i32 to index
    %c2_32 = arith.constant 2 : index
    %c0_33 = arith.constant 0 : index
    %61 = vector.load %arg2[%c0_31, %60, %c2_32, %c0_33] : memref<1x4x10x8xf32, #tpu.memory_space<vmem>>, vector<1x1x4x8xf32>
    %62 = vector.shape_cast %61 : vector<1x1x4x8xf32> to vector<1x4x8xf32>
    %63 = vector.shape_cast %62 : vector<1x4x8xf32> to vector<4x8xf32>
    %cst_34 = arith.constant 0.000000e+00 : f32
    %64 = vector.broadcast %cst_34 : f32 to vector<4x8xf32>
    %65 = arith.select %18, %63, %64 : vector<4x8xi1>, vector<4x8xf32>
    %66 = arith.truncf %65 : vector<4x8xf32> to vector<4x8xbf16>
    %c3 = arith.constant 3 : index
    %c0_35 = arith.constant 0 : index
    %c0_36 = arith.constant 0 : index
    %67 = vector.load %arg3[%c3, %c0_35, %c0_36] : memref<27x8x64xbf16, #tpu.memory_space<vmem>>, vector<1x8x64xbf16>
    %68 = vector.shape_cast %67 : vector<1x8x64xbf16> to vector<8x64xbf16>
    %cst_37 = arith.constant dense<0.000000e+00> : vector<4x64xf32>
    %69 = tpu.matmul %66, %68, %cst_37 {dimension_numbers = #tpu.dot_dimension_numbers<[1], [0], [0], [1], [0, 0, 1, 1], [], []>} : vector<4x8xbf16>, vector<8x64xbf16>, vector<4x64xf32> -> vector<4x64xf32>
    %70 = arith.addf %58, %69 : vector<4x64xf32>
    %c0_i32_38 = arith.constant 0 : i32
    %71 = arith.addi %arg1, %c0_i32_38 : i32
    %c0_39 = arith.constant 0 : index
    %72 = arith.index_cast %71 : i32 to index
    %c3_40 = arith.constant 3 : index
    %c0_41 = arith.constant 0 : index
    %73 = vector.load %arg2[%c0_39, %72, %c3_40, %c0_41] : memref<1x4x10x8xf32, #tpu.memory_space<vmem>>, vector<1x1x4x8xf32>
    %74 = vector.shape_cast %73 : vector<1x1x4x8xf32> to vector<1x4x8xf32>
    %75 = vector.shape_cast %74 : vector<1x4x8xf32> to vector<4x8xf32>
    %76 = arith.truncf %75 : vector<4x8xf32> to vector<4x8xbf16>
    %c4 = arith.constant 4 : index
    %c0_42 = arith.constant 0 : index
    %c0_43 = arith.constant 0 : index
    %77 = vector.load %arg3[%c4, %c0_42, %c0_43] : memref<27x8x64xbf16, #tpu.memory_space<vmem>>, vector<1x8x64xbf16>
    %78 = vector.shape_cast %77 : vector<1x8x64xbf16> to vector<8x64xbf16>
    %cst_44 = arith.constant dense<0.000000e+00> : vector<4x64xf32>
    %79 = tpu.matmul %76, %78, %cst_44 {dimension_numbers = #tpu.dot_dimension_numbers<[1], [0], [0], [1], [0, 0, 1, 1], [], []>} : vector<4x8xbf16>, vector<8x64xbf16>, vector<4x64xf32> -> vector<4x64xf32>
    %80 = arith.addf %70, %79 : vector<4x64xf32>
    %c0_i32_45 = arith.constant 0 : i32
    %81 = arith.addi %arg1, %c0_i32_45 : i32
    %c0_46 = arith.constant 0 : index
    %82 = arith.index_cast %81 : i32 to index
    %c4_47 = arith.constant 4 : index
    %c0_48 = arith.constant 0 : index
    %83 = vector.load %arg2[%c0_46, %82, %c4_47, %c0_48] : memref<1x4x10x8xf32, #tpu.memory_space<vmem>>, vector<1x1x4x8xf32>
    %84 = vector.shape_cast %83 : vector<1x1x4x8xf32> to vector<1x4x8xf32>
    %85 = vector.shape_cast %84 : vector<1x4x8xf32> to vector<4x8xf32>
    %cst_49 = arith.constant 0.000000e+00 : f32
    %86 = vector.broadcast %cst_49 : f32 to vector<4x8xf32>
    %87 = arith.select %20, %85, %86 : vector<4x8xi1>, vector<4x8xf32>
    %88 = arith.truncf %87 : vector<4x8xf32> to vector<4x8xbf16>
    %c5 = arith.constant 5 : index
    %c0_50 = arith.constant 0 : index
    %c0_51 = arith.constant 0 : index
    %89 = vector.load %arg3[%c5, %c0_50, %c0_51] : memref<27x8x64xbf16, #tpu.memory_space<vmem>>, vector<1x8x64xbf16>
    %90 = vector.shape_cast %89 : vector<1x8x64xbf16> to vector<8x64xbf16>
    %cst_52 = arith.constant dense<0.000000e+00> : vector<4x64xf32>
    %91 = tpu.matmul %88, %90, %cst_52 {dimension_numbers = #tpu.dot_dimension_numbers<[1], [0], [0], [1], [0, 0, 1, 1], [], []>} : vector<4x8xbf16>, vector<8x64xbf16>, vector<4x64xf32> -> vector<4x64xf32>
    %92 = arith.addf %80, %91 : vector<4x64xf32>
    %c0_i32_53 = arith.constant 0 : i32
    %93 = arith.addi %arg1, %c0_i32_53 : i32
    %c0_54 = arith.constant 0 : index
    %94 = arith.index_cast %93 : i32 to index
    %c4_55 = arith.constant 4 : index
    %c0_56 = arith.constant 0 : index
    %95 = vector.load %arg2[%c0_54, %94, %c4_55, %c0_56] : memref<1x4x10x8xf32, #tpu.memory_space<vmem>>, vector<1x1x4x8xf32>
    %96 = vector.shape_cast %95 : vector<1x1x4x8xf32> to vector<1x4x8xf32>
    %97 = vector.shape_cast %96 : vector<1x4x8xf32> to vector<4x8xf32>
    %cst_57 = arith.constant 0.000000e+00 : f32
    %98 = vector.broadcast %cst_57 : f32 to vector<4x8xf32>
    %99 = arith.select %18, %97, %98 : vector<4x8xi1>, vector<4x8xf32>
    %100 = arith.truncf %99 : vector<4x8xf32> to vector<4x8xbf16>
    %c6 = arith.constant 6 : index
    %c0_58 = arith.constant 0 : index
    %c0_59 = arith.constant 0 : index
    %101 = vector.load %arg3[%c6, %c0_58, %c0_59] : memref<27x8x64xbf16, #tpu.memory_space<vmem>>, vector<1x8x64xbf16>
    %102 = vector.shape_cast %101 : vector<1x8x64xbf16> to vector<8x64xbf16>
    %cst_60 = arith.constant dense<0.000000e+00> : vector<4x64xf32>
    %103 = tpu.matmul %100, %102, %cst_60 {dimension_numbers = #tpu.dot_dimension_numbers<[1], [0], [0], [1], [0, 0, 1, 1], [], []>} : vector<4x8xbf16>, vector<8x64xbf16>, vector<4x64xf32> -> vector<4x64xf32>
    %104 = arith.addf %92, %103 : vector<4x64xf32>
    %c0_i32_61 = arith.constant 0 : i32
    %105 = arith.addi %arg1, %c0_i32_61 : i32
    %c0_62 = arith.constant 0 : index
    %106 = arith.index_cast %105 : i32 to index
    %c5_63 = arith.constant 5 : index
    %c0_64 = arith.constant 0 : index
    %107 = vector.load %arg2[%c0_62, %106, %c5_63, %c0_64] : memref<1x4x10x8xf32, #tpu.memory_space<vmem>>, vector<1x1x4x8xf32>
    %108 = vector.shape_cast %107 : vector<1x1x4x8xf32> to vector<1x4x8xf32>
    %109 = vector.shape_cast %108 : vector<1x4x8xf32> to vector<4x8xf32>
    %110 = arith.truncf %109 : vector<4x8xf32> to vector<4x8xbf16>
    %c7 = arith.constant 7 : index
    %c0_65 = arith.constant 0 : index
    %c0_66 = arith.constant 0 : index
    %111 = vector.load %arg3[%c7, %c0_65, %c0_66] : memref<27x8x64xbf16, #tpu.memory_space<vmem>>, vector<1x8x64xbf16>
    %112 = vector.shape_cast %111 : vector<1x8x64xbf16> to vector<8x64xbf16>
    %cst_67 = arith.constant dense<0.000000e+00> : vector<4x64xf32>
    %113 = tpu.matmul %110, %112, %cst_67 {dimension_numbers = #tpu.dot_dimension_numbers<[1], [0], [0], [1], [0, 0, 1, 1], [], []>} : vector<4x8xbf16>, vector<8x64xbf16>, vector<4x64xf32> -> vector<4x64xf32>
    %114 = arith.addf %104, %113 : vector<4x64xf32>
    %c0_i32_68 = arith.constant 0 : i32
    %115 = arith.addi %arg1, %c0_i32_68 : i32
    %c0_69 = arith.constant 0 : index
    %116 = arith.index_cast %115 : i32 to index
    %c6_70 = arith.constant 6 : index
    %c0_71 = arith.constant 0 : index
    %117 = vector.load %arg2[%c0_69, %116, %c6_70, %c0_71] : memref<1x4x10x8xf32, #tpu.memory_space<vmem>>, vector<1x1x4x8xf32>
    %118 = vector.shape_cast %117 : vector<1x1x4x8xf32> to vector<1x4x8xf32>
    %119 = vector.shape_cast %118 : vector<1x4x8xf32> to vector<4x8xf32>
    %cst_72 = arith.constant 0.000000e+00 : f32
    %120 = vector.broadcast %cst_72 : f32 to vector<4x8xf32>
    %121 = arith.select %20, %119, %120 : vector<4x8xi1>, vector<4x8xf32>
    %122 = arith.truncf %121 : vector<4x8xf32> to vector<4x8xbf16>
    %c8 = arith.constant 8 : index
    %c0_73 = arith.constant 0 : index
    %c0_74 = arith.constant 0 : index
    %123 = vector.load %arg3[%c8, %c0_73, %c0_74] : memref<27x8x64xbf16, #tpu.memory_space<vmem>>, vector<1x8x64xbf16>
    %124 = vector.shape_cast %123 : vector<1x8x64xbf16> to vector<8x64xbf16>
    %cst_75 = arith.constant dense<0.000000e+00> : vector<4x64xf32>
    %125 = tpu.matmul %122, %124, %cst_75 {dimension_numbers = #tpu.dot_dimension_numbers<[1], [0], [0], [1], [0, 0, 1, 1], [], []>} : vector<4x8xbf16>, vector<8x64xbf16>, vector<4x64xf32> -> vector<4x64xf32>
    %126 = arith.addf %114, %125 : vector<4x64xf32>
    %c1_i32_76 = arith.constant 1 : i32
    %127 = arith.addi %arg1, %c1_i32_76 : i32
    %c0_77 = arith.constant 0 : index
    %128 = arith.index_cast %127 : i32 to index
    %c0_78 = arith.constant 0 : index
    %c0_79 = arith.constant 0 : index
    %129 = vector.load %arg2[%c0_77, %128, %c0_78, %c0_79] : memref<1x4x10x8xf32, #tpu.memory_space<vmem>>, vector<1x1x4x8xf32>
    %130 = vector.shape_cast %129 : vector<1x1x4x8xf32> to vector<1x4x8xf32>
    %131 = vector.shape_cast %130 : vector<1x4x8xf32> to vector<4x8xf32>
    %cst_80 = arith.constant 0.000000e+00 : f32
    %132 = vector.broadcast %cst_80 : f32 to vector<4x8xf32>
    %133 = arith.select %18, %131, %132 : vector<4x8xi1>, vector<4x8xf32>
    %134 = arith.truncf %133 : vector<4x8xf32> to vector<4x8xbf16>
    %c9 = arith.constant 9 : index
    %c0_81 = arith.constant 0 : index
    %c0_82 = arith.constant 0 : index
    %135 = vector.load %arg3[%c9, %c0_81, %c0_82] : memref<27x8x64xbf16, #tpu.memory_space<vmem>>, vector<1x8x64xbf16>
    %136 = vector.shape_cast %135 : vector<1x8x64xbf16> to vector<8x64xbf16>
    %cst_83 = arith.constant dense<0.000000e+00> : vector<4x64xf32>
    %137 = tpu.matmul %134, %136, %cst_83 {dimension_numbers = #tpu.dot_dimension_numbers<[1], [0], [0], [1], [0, 0, 1, 1], [], []>} : vector<4x8xbf16>, vector<8x64xbf16>, vector<4x64xf32> -> vector<4x64xf32>
    %138 = arith.addf %126, %137 : vector<4x64xf32>
    %c1_i32_84 = arith.constant 1 : i32
    %139 = arith.addi %arg1, %c1_i32_84 : i32
    %c0_85 = arith.constant 0 : index
    %140 = arith.index_cast %139 : i32 to index
    %c1_86 = arith.constant 1 : index
    %c0_87 = arith.constant 0 : index
    %141 = vector.load %arg2[%c0_85, %140, %c1_86, %c0_87] : memref<1x4x10x8xf32, #tpu.memory_space<vmem>>, vector<1x1x4x8xf32>
    %142 = vector.shape_cast %141 : vector<1x1x4x8xf32> to vector<1x4x8xf32>
    %143 = vector.shape_cast %142 : vector<1x4x8xf32> to vector<4x8xf32>
    %144 = arith.truncf %143 : vector<4x8xf32> to vector<4x8xbf16>
    %c10 = arith.constant 10 : index
    %c0_88 = arith.constant 0 : index
    %c0_89 = arith.constant 0 : index
    %145 = vector.load %arg3[%c10, %c0_88, %c0_89] : memref<27x8x64xbf16, #tpu.memory_space<vmem>>, vector<1x8x64xbf16>
    %146 = vector.shape_cast %145 : vector<1x8x64xbf16> to vector<8x64xbf16>
    %cst_90 = arith.constant dense<0.000000e+00> : vector<4x64xf32>
    %147 = tpu.matmul %144, %146, %cst_90 {dimension_numbers = #tpu.dot_dimension_numbers<[1], [0], [0], [1], [0, 0, 1, 1], [], []>} : vector<4x8xbf16>, vector<8x64xbf16>, vector<4x64xf32> -> vector<4x64xf32>
    %148 = arith.addf %138, %147 : vector<4x64xf32>
    %c1_i32_91 = arith.constant 1 : i32
    %149 = arith.addi %arg1, %c1_i32_91 : i32
    %c0_92 = arith.constant 0 : index
    %150 = arith.index_cast %149 : i32 to index
    %c2_93 = arith.constant 2 : index
    %c0_94 = arith.constant 0 : index
    %151 = vector.load %arg2[%c0_92, %150, %c2_93, %c0_94] : memref<1x4x10x8xf32, #tpu.memory_space<vmem>>, vector<1x1x4x8xf32>
    %152 = vector.shape_cast %151 : vector<1x1x4x8xf32> to vector<1x4x8xf32>
    %153 = vector.shape_cast %152 : vector<1x4x8xf32> to vector<4x8xf32>
    %cst_95 = arith.constant 0.000000e+00 : f32
    %154 = vector.broadcast %cst_95 : f32 to vector<4x8xf32>
    %155 = arith.select %20, %153, %154 : vector<4x8xi1>, vector<4x8xf32>
    %156 = arith.truncf %155 : vector<4x8xf32> to vector<4x8xbf16>
    %c11 = arith.constant 11 : index
    %c0_96 = arith.constant 0 : index
    %c0_97 = arith.constant 0 : index
    %157 = vector.load %arg3[%c11, %c0_96, %c0_97] : memref<27x8x64xbf16, #tpu.memory_space<vmem>>, vector<1x8x64xbf16>
    %158 = vector.shape_cast %157 : vector<1x8x64xbf16> to vector<8x64xbf16>
    %cst_98 = arith.constant dense<0.000000e+00> : vector<4x64xf32>
    %159 = tpu.matmul %156, %158, %cst_98 {dimension_numbers = #tpu.dot_dimension_numbers<[1], [0], [0], [1], [0, 0, 1, 1], [], []>} : vector<4x8xbf16>, vector<8x64xbf16>, vector<4x64xf32> -> vector<4x64xf32>
    %160 = arith.addf %148, %159 : vector<4x64xf32>
    %c1_i32_99 = arith.constant 1 : i32
    %161 = arith.addi %arg1, %c1_i32_99 : i32
    %c0_100 = arith.constant 0 : index
    %162 = arith.index_cast %161 : i32 to index
    %c2_101 = arith.constant 2 : index
    %c0_102 = arith.constant 0 : index
    %163 = vector.load %arg2[%c0_100, %162, %c2_101, %c0_102] : memref<1x4x10x8xf32, #tpu.memory_space<vmem>>, vector<1x1x4x8xf32>
    %164 = vector.shape_cast %163 : vector<1x1x4x8xf32> to vector<1x4x8xf32>
    %165 = vector.shape_cast %164 : vector<1x4x8xf32> to vector<4x8xf32>
    %cst_103 = arith.constant 0.000000e+00 : f32
    %166 = vector.broadcast %cst_103 : f32 to vector<4x8xf32>
    %167 = arith.select %18, %165, %166 : vector<4x8xi1>, vector<4x8xf32>
    %168 = arith.truncf %167 : vector<4x8xf32> to vector<4x8xbf16>
    %c12 = arith.constant 12 : index
    %c0_104 = arith.constant 0 : index
    %c0_105 = arith.constant 0 : index
    %169 = vector.load %arg3[%c12, %c0_104, %c0_105] : memref<27x8x64xbf16, #tpu.memory_space<vmem>>, vector<1x8x64xbf16>
    %170 = vector.shape_cast %169 : vector<1x8x64xbf16> to vector<8x64xbf16>
    %cst_106 = arith.constant dense<0.000000e+00> : vector<4x64xf32>
    %171 = tpu.matmul %168, %170, %cst_106 {dimension_numbers = #tpu.dot_dimension_numbers<[1], [0], [0], [1], [0, 0, 1, 1], [], []>} : vector<4x8xbf16>, vector<8x64xbf16>, vector<4x64xf32> -> vector<4x64xf32>
    %172 = arith.addf %160, %171 : vector<4x64xf32>
    %c1_i32_107 = arith.constant 1 : i32
    %173 = arith.addi %arg1, %c1_i32_107 : i32
    %c0_108 = arith.constant 0 : index
    %174 = arith.index_cast %173 : i32 to index
    %c3_109 = arith.constant 3 : index
    %c0_110 = arith.constant 0 : index
    %175 = vector.load %arg2[%c0_108, %174, %c3_109, %c0_110] : memref<1x4x10x8xf32, #tpu.memory_space<vmem>>, vector<1x1x4x8xf32>
    %176 = vector.shape_cast %175 : vector<1x1x4x8xf32> to vector<1x4x8xf32>
    %177 = vector.shape_cast %176 : vector<1x4x8xf32> to vector<4x8xf32>
    %178 = arith.truncf %177 : vector<4x8xf32> to vector<4x8xbf16>
    %c13 = arith.constant 13 : index
    %c0_111 = arith.constant 0 : index
    %c0_112 = arith.constant 0 : index
    %179 = vector.load %arg3[%c13, %c0_111, %c0_112] : memref<27x8x64xbf16, #tpu.memory_space<vmem>>, vector<1x8x64xbf16>
    %180 = vector.shape_cast %179 : vector<1x8x64xbf16> to vector<8x64xbf16>
    %cst_113 = arith.constant dense<0.000000e+00> : vector<4x64xf32>
    %181 = tpu.matmul %178, %180, %cst_113 {dimension_numbers = #tpu.dot_dimension_numbers<[1], [0], [0], [1], [0, 0, 1, 1], [], []>} : vector<4x8xbf16>, vector<8x64xbf16>, vector<4x64xf32> -> vector<4x64xf32>
    %182 = arith.addf %172, %181 : vector<4x64xf32>
    %c1_i32_114 = arith.constant 1 : i32
    %183 = arith.addi %arg1, %c1_i32_114 : i32
    %c0_115 = arith.constant 0 : index
    %184 = arith.index_cast %183 : i32 to index
    %c4_116 = arith.constant 4 : index
    %c0_117 = arith.constant 0 : index
    %185 = vector.load %arg2[%c0_115, %184, %c4_116, %c0_117] : memref<1x4x10x8xf32, #tpu.memory_space<vmem>>, vector<1x1x4x8xf32>
    %186 = vector.shape_cast %185 : vector<1x1x4x8xf32> to vector<1x4x8xf32>
    %187 = vector.shape_cast %186 : vector<1x4x8xf32> to vector<4x8xf32>
    %cst_118 = arith.constant 0.000000e+00 : f32
    %188 = vector.broadcast %cst_118 : f32 to vector<4x8xf32>
    %189 = arith.select %20, %187, %188 : vector<4x8xi1>, vector<4x8xf32>
    %190 = arith.truncf %189 : vector<4x8xf32> to vector<4x8xbf16>
    %c14 = arith.constant 14 : index
    %c0_119 = arith.constant 0 : index
    %c0_120 = arith.constant 0 : index
    %191 = vector.load %arg3[%c14, %c0_119, %c0_120] : memref<27x8x64xbf16, #tpu.memory_space<vmem>>, vector<1x8x64xbf16>
    %192 = vector.shape_cast %191 : vector<1x8x64xbf16> to vector<8x64xbf16>
    %cst_121 = arith.constant dense<0.000000e+00> : vector<4x64xf32>
    %193 = tpu.matmul %190, %192, %cst_121 {dimension_numbers = #tpu.dot_dimension_numbers<[1], [0], [0], [1], [0, 0, 1, 1], [], []>} : vector<4x8xbf16>, vector<8x64xbf16>, vector<4x64xf32> -> vector<4x64xf32>
    %194 = arith.addf %182, %193 : vector<4x64xf32>
    %c1_i32_122 = arith.constant 1 : i32
    %195 = arith.addi %arg1, %c1_i32_122 : i32
    %c0_123 = arith.constant 0 : index
    %196 = arith.index_cast %195 : i32 to index
    %c4_124 = arith.constant 4 : index
    %c0_125 = arith.constant 0 : index
    %197 = vector.load %arg2[%c0_123, %196, %c4_124, %c0_125] : memref<1x4x10x8xf32, #tpu.memory_space<vmem>>, vector<1x1x4x8xf32>
    %198 = vector.shape_cast %197 : vector<1x1x4x8xf32> to vector<1x4x8xf32>
    %199 = vector.shape_cast %198 : vector<1x4x8xf32> to vector<4x8xf32>
    %cst_126 = arith.constant 0.000000e+00 : f32
    %200 = vector.broadcast %cst_126 : f32 to vector<4x8xf32>
    %201 = arith.select %18, %199, %200 : vector<4x8xi1>, vector<4x8xf32>
    %202 = arith.truncf %201 : vector<4x8xf32> to vector<4x8xbf16>
    %c15 = arith.constant 15 : index
    %c0_127 = arith.constant 0 : index
    %c0_128 = arith.constant 0 : index
    %203 = vector.load %arg3[%c15, %c0_127, %c0_128] : memref<27x8x64xbf16, #tpu.memory_space<vmem>>, vector<1x8x64xbf16>
    %204 = vector.shape_cast %203 : vector<1x8x64xbf16> to vector<8x64xbf16>
    %cst_129 = arith.constant dense<0.000000e+00> : vector<4x64xf32>
    %205 = tpu.matmul %202, %204, %cst_129 {dimension_numbers = #tpu.dot_dimension_numbers<[1], [0], [0], [1], [0, 0, 1, 1], [], []>} : vector<4x8xbf16>, vector<8x64xbf16>, vector<4x64xf32> -> vector<4x64xf32>
    %206 = arith.addf %194, %205 : vector<4x64xf32>
    %c1_i32_130 = arith.constant 1 : i32
    %207 = arith.addi %arg1, %c1_i32_130 : i32
    %c0_131 = arith.constant 0 : index
    %208 = arith.index_cast %207 : i32 to index
    %c5_132 = arith.constant 5 : index
    %c0_133 = arith.constant 0 : index
    %209 = vector.load %arg2[%c0_131, %208, %c5_132, %c0_133] : memref<1x4x10x8xf32, #tpu.memory_space<vmem>>, vector<1x1x4x8xf32>
    %210 = vector.shape_cast %209 : vector<1x1x4x8xf32> to vector<1x4x8xf32>
    %211 = vector.shape_cast %210 : vector<1x4x8xf32> to vector<4x8xf32>
    %212 = arith.truncf %211 : vector<4x8xf32> to vector<4x8xbf16>
    %c16 = arith.constant 16 : index
    %c0_134 = arith.constant 0 : index
    %c0_135 = arith.constant 0 : index
    %213 = vector.load %arg3[%c16, %c0_134, %c0_135] : memref<27x8x64xbf16, #tpu.memory_space<vmem>>, vector<1x8x64xbf16>
    %214 = vector.shape_cast %213 : vector<1x8x64xbf16> to vector<8x64xbf16>
    %cst_136 = arith.constant dense<0.000000e+00> : vector<4x64xf32>
    %215 = tpu.matmul %212, %214, %cst_136 {dimension_numbers = #tpu.dot_dimension_numbers<[1], [0], [0], [1], [0, 0, 1, 1], [], []>} : vector<4x8xbf16>, vector<8x64xbf16>, vector<4x64xf32> -> vector<4x64xf32>
    %216 = arith.addf %206, %215 : vector<4x64xf32>
    %c1_i32_137 = arith.constant 1 : i32
    %217 = arith.addi %arg1, %c1_i32_137 : i32
    %c0_138 = arith.constant 0 : index
    %218 = arith.index_cast %217 : i32 to index
    %c6_139 = arith.constant 6 : index
    %c0_140 = arith.constant 0 : index
    %219 = vector.load %arg2[%c0_138, %218, %c6_139, %c0_140] : memref<1x4x10x8xf32, #tpu.memory_space<vmem>>, vector<1x1x4x8xf32>
    %220 = vector.shape_cast %219 : vector<1x1x4x8xf32> to vector<1x4x8xf32>
    %221 = vector.shape_cast %220 : vector<1x4x8xf32> to vector<4x8xf32>
    %cst_141 = arith.constant 0.000000e+00 : f32
    %222 = vector.broadcast %cst_141 : f32 to vector<4x8xf32>
    %223 = arith.select %20, %221, %222 : vector<4x8xi1>, vector<4x8xf32>
    %224 = arith.truncf %223 : vector<4x8xf32> to vector<4x8xbf16>
    %c17 = arith.constant 17 : index
    %c0_142 = arith.constant 0 : index
    %c0_143 = arith.constant 0 : index
    %225 = vector.load %arg3[%c17, %c0_142, %c0_143] : memref<27x8x64xbf16, #tpu.memory_space<vmem>>, vector<1x8x64xbf16>
    %226 = vector.shape_cast %225 : vector<1x8x64xbf16> to vector<8x64xbf16>
    %cst_144 = arith.constant dense<0.000000e+00> : vector<4x64xf32>
    %227 = tpu.matmul %224, %226, %cst_144 {dimension_numbers = #tpu.dot_dimension_numbers<[1], [0], [0], [1], [0, 0, 1, 1], [], []>} : vector<4x8xbf16>, vector<8x64xbf16>, vector<4x64xf32> -> vector<4x64xf32>
    %228 = arith.addf %216, %227 : vector<4x64xf32>
    %c2_i32_145 = arith.constant 2 : i32
    %229 = arith.addi %arg1, %c2_i32_145 : i32
    %c0_146 = arith.constant 0 : index
    %230 = arith.index_cast %229 : i32 to index
    %c0_147 = arith.constant 0 : index
    %c0_148 = arith.constant 0 : index
    %231 = vector.load %arg2[%c0_146, %230, %c0_147, %c0_148] : memref<1x4x10x8xf32, #tpu.memory_space<vmem>>, vector<1x1x4x8xf32>
    %232 = vector.shape_cast %231 : vector<1x1x4x8xf32> to vector<1x4x8xf32>
    %233 = vector.shape_cast %232 : vector<1x4x8xf32> to vector<4x8xf32>
    %cst_149 = arith.constant 0.000000e+00 : f32
    %234 = vector.broadcast %cst_149 : f32 to vector<4x8xf32>
    %235 = arith.select %18, %233, %234 : vector<4x8xi1>, vector<4x8xf32>
    %236 = arith.truncf %235 : vector<4x8xf32> to vector<4x8xbf16>
    %c18 = arith.constant 18 : index
    %c0_150 = arith.constant 0 : index
    %c0_151 = arith.constant 0 : index
    %237 = vector.load %arg3[%c18, %c0_150, %c0_151] : memref<27x8x64xbf16, #tpu.memory_space<vmem>>, vector<1x8x64xbf16>
    %238 = vector.shape_cast %237 : vector<1x8x64xbf16> to vector<8x64xbf16>
    %cst_152 = arith.constant dense<0.000000e+00> : vector<4x64xf32>
    %239 = tpu.matmul %236, %238, %cst_152 {dimension_numbers = #tpu.dot_dimension_numbers<[1], [0], [0], [1], [0, 0, 1, 1], [], []>} : vector<4x8xbf16>, vector<8x64xbf16>, vector<4x64xf32> -> vector<4x64xf32>
    %240 = arith.addf %228, %239 : vector<4x64xf32>
    %c2_i32_153 = arith.constant 2 : i32
    %241 = arith.addi %arg1, %c2_i32_153 : i32
    %c0_154 = arith.constant 0 : index
    %242 = arith.index_cast %241 : i32 to index
    %c1_155 = arith.constant 1 : index
    %c0_156 = arith.constant 0 : index
    %243 = vector.load %arg2[%c0_154, %242, %c1_155, %c0_156] : memref<1x4x10x8xf32, #tpu.memory_space<vmem>>, vector<1x1x4x8xf32>
    %244 = vector.shape_cast %243 : vector<1x1x4x8xf32> to vector<1x4x8xf32>
    %245 = vector.shape_cast %244 : vector<1x4x8xf32> to vector<4x8xf32>
    %246 = arith.truncf %245 : vector<4x8xf32> to vector<4x8xbf16>
    %c19 = arith.constant 19 : index
    %c0_157 = arith.constant 0 : index
    %c0_158 = arith.constant 0 : index
    %247 = vector.load %arg3[%c19, %c0_157, %c0_158] : memref<27x8x64xbf16, #tpu.memory_space<vmem>>, vector<1x8x64xbf16>
    %248 = vector.shape_cast %247 : vector<1x8x64xbf16> to vector<8x64xbf16>
    %cst_159 = arith.constant dense<0.000000e+00> : vector<4x64xf32>
    %249 = tpu.matmul %246, %248, %cst_159 {dimension_numbers = #tpu.dot_dimension_numbers<[1], [0], [0], [1], [0, 0, 1, 1], [], []>} : vector<4x8xbf16>, vector<8x64xbf16>, vector<4x64xf32> -> vector<4x64xf32>
    %250 = arith.addf %240, %249 : vector<4x64xf32>
    %c2_i32_160 = arith.constant 2 : i32
    %251 = arith.addi %arg1, %c2_i32_160 : i32
    %c0_161 = arith.constant 0 : index
    %252 = arith.index_cast %251 : i32 to index
    %c2_162 = arith.constant 2 : index
    %c0_163 = arith.constant 0 : index
    %253 = vector.load %arg2[%c0_161, %252, %c2_162, %c0_163] : memref<1x4x10x8xf32, #tpu.memory_space<vmem>>, vector<1x1x4x8xf32>
    %254 = vector.shape_cast %253 : vector<1x1x4x8xf32> to vector<1x4x8xf32>
    %255 = vector.shape_cast %254 : vector<1x4x8xf32> to vector<4x8xf32>
    %cst_164 = arith.constant 0.000000e+00 : f32
    %256 = vector.broadcast %cst_164 : f32 to vector<4x8xf32>
    %257 = arith.select %20, %255, %256 : vector<4x8xi1>, vector<4x8xf32>
    %258 = arith.truncf %257 : vector<4x8xf32> to vector<4x8xbf16>
    %c20 = arith.constant 20 : index
    %c0_165 = arith.constant 0 : index
    %c0_166 = arith.constant 0 : index
    %259 = vector.load %arg3[%c20, %c0_165, %c0_166] : memref<27x8x64xbf16, #tpu.memory_space<vmem>>, vector<1x8x64xbf16>
    %260 = vector.shape_cast %259 : vector<1x8x64xbf16> to vector<8x64xbf16>
    %cst_167 = arith.constant dense<0.000000e+00> : vector<4x64xf32>
    %261 = tpu.matmul %258, %260, %cst_167 {dimension_numbers = #tpu.dot_dimension_numbers<[1], [0], [0], [1], [0, 0, 1, 1], [], []>} : vector<4x8xbf16>, vector<8x64xbf16>, vector<4x64xf32> -> vector<4x64xf32>
    %262 = arith.addf %250, %261 : vector<4x64xf32>
    %c2_i32_168 = arith.constant 2 : i32
    %263 = arith.addi %arg1, %c2_i32_168 : i32
    %c0_169 = arith.constant 0 : index
    %264 = arith.index_cast %263 : i32 to index
    %c2_170 = arith.constant 2 : index
    %c0_171 = arith.constant 0 : index
    %265 = vector.load %arg2[%c0_169, %264, %c2_170, %c0_171] : memref<1x4x10x8xf32, #tpu.memory_space<vmem>>, vector<1x1x4x8xf32>
    %266 = vector.shape_cast %265 : vector<1x1x4x8xf32> to vector<1x4x8xf32>
    %267 = vector.shape_cast %266 : vector<1x4x8xf32> to vector<4x8xf32>
    %cst_172 = arith.constant 0.000000e+00 : f32
    %268 = vector.broadcast %cst_172 : f32 to vector<4x8xf32>
    %269 = arith.select %18, %267, %268 : vector<4x8xi1>, vector<4x8xf32>
    %270 = arith.truncf %269 : vector<4x8xf32> to vector<4x8xbf16>
    %c21 = arith.constant 21 : index
    %c0_173 = arith.constant 0 : index
    %c0_174 = arith.constant 0 : index
    %271 = vector.load %arg3[%c21, %c0_173, %c0_174] : memref<27x8x64xbf16, #tpu.memory_space<vmem>>, vector<1x8x64xbf16>
    %272 = vector.shape_cast %271 : vector<1x8x64xbf16> to vector<8x64xbf16>
    %cst_175 = arith.constant dense<0.000000e+00> : vector<4x64xf32>
    %273 = tpu.matmul %270, %272, %cst_175 {dimension_numbers = #tpu.dot_dimension_numbers<[1], [0], [0], [1], [0, 0, 1, 1], [], []>} : vector<4x8xbf16>, vector<8x64xbf16>, vector<4x64xf32> -> vector<4x64xf32>
    %274 = arith.addf %262, %273 : vector<4x64xf32>
    %c2_i32_176 = arith.constant 2 : i32
    %275 = arith.addi %arg1, %c2_i32_176 : i32
    %c0_177 = arith.constant 0 : index
    %276 = arith.index_cast %275 : i32 to index
    %c3_178 = arith.constant 3 : index
    %c0_179 = arith.constant 0 : index
    %277 = vector.load %arg2[%c0_177, %276, %c3_178, %c0_179] : memref<1x4x10x8xf32, #tpu.memory_space<vmem>>, vector<1x1x4x8xf32>
    %278 = vector.shape_cast %277 : vector<1x1x4x8xf32> to vector<1x4x8xf32>
    %279 = vector.shape_cast %278 : vector<1x4x8xf32> to vector<4x8xf32>
    %280 = arith.truncf %279 : vector<4x8xf32> to vector<4x8xbf16>
    %c22 = arith.constant 22 : index
    %c0_180 = arith.constant 0 : index
    %c0_181 = arith.constant 0 : index
    %281 = vector.load %arg3[%c22, %c0_180, %c0_181] : memref<27x8x64xbf16, #tpu.memory_space<vmem>>, vector<1x8x64xbf16>
    %282 = vector.shape_cast %281 : vector<1x8x64xbf16> to vector<8x64xbf16>
    %cst_182 = arith.constant dense<0.000000e+00> : vector<4x64xf32>
    %283 = tpu.matmul %280, %282, %cst_182 {dimension_numbers = #tpu.dot_dimension_numbers<[1], [0], [0], [1], [0, 0, 1, 1], [], []>} : vector<4x8xbf16>, vector<8x64xbf16>, vector<4x64xf32> -> vector<4x64xf32>
    %284 = arith.addf %274, %283 : vector<4x64xf32>
    %c2_i32_183 = arith.constant 2 : i32
    %285 = arith.addi %arg1, %c2_i32_183 : i32
    %c0_184 = arith.constant 0 : index
    %286 = arith.index_cast %285 : i32 to index
    %c4_185 = arith.constant 4 : index
    %c0_186 = arith.constant 0 : index
    %287 = vector.load %arg2[%c0_184, %286, %c4_185, %c0_186] : memref<1x4x10x8xf32, #tpu.memory_space<vmem>>, vector<1x1x4x8xf32>
    %288 = vector.shape_cast %287 : vector<1x1x4x8xf32> to vector<1x4x8xf32>
    %289 = vector.shape_cast %288 : vector<1x4x8xf32> to vector<4x8xf32>
    %cst_187 = arith.constant 0.000000e+00 : f32
    %290 = vector.broadcast %cst_187 : f32 to vector<4x8xf32>
    %291 = arith.select %20, %289, %290 : vector<4x8xi1>, vector<4x8xf32>
    %292 = arith.truncf %291 : vector<4x8xf32> to vector<4x8xbf16>
    %c23 = arith.constant 23 : index
    %c0_188 = arith.constant 0 : index
    %c0_189 = arith.constant 0 : index
    %293 = vector.load %arg3[%c23, %c0_188, %c0_189] : memref<27x8x64xbf16, #tpu.memory_space<vmem>>, vector<1x8x64xbf16>
    %294 = vector.shape_cast %293 : vector<1x8x64xbf16> to vector<8x64xbf16>
    %cst_190 = arith.constant dense<0.000000e+00> : vector<4x64xf32>
    %295 = tpu.matmul %292, %294, %cst_190 {dimension_numbers = #tpu.dot_dimension_numbers<[1], [0], [0], [1], [0, 0, 1, 1], [], []>} : vector<4x8xbf16>, vector<8x64xbf16>, vector<4x64xf32> -> vector<4x64xf32>
    %296 = arith.addf %284, %295 : vector<4x64xf32>
    %c2_i32_191 = arith.constant 2 : i32
    %297 = arith.addi %arg1, %c2_i32_191 : i32
    %c0_192 = arith.constant 0 : index
    %298 = arith.index_cast %297 : i32 to index
    %c4_193 = arith.constant 4 : index
    %c0_194 = arith.constant 0 : index
    %299 = vector.load %arg2[%c0_192, %298, %c4_193, %c0_194] : memref<1x4x10x8xf32, #tpu.memory_space<vmem>>, vector<1x1x4x8xf32>
    %300 = vector.shape_cast %299 : vector<1x1x4x8xf32> to vector<1x4x8xf32>
    %301 = vector.shape_cast %300 : vector<1x4x8xf32> to vector<4x8xf32>
    %cst_195 = arith.constant 0.000000e+00 : f32
    %302 = vector.broadcast %cst_195 : f32 to vector<4x8xf32>
    %303 = arith.select %18, %301, %302 : vector<4x8xi1>, vector<4x8xf32>
    %304 = arith.truncf %303 : vector<4x8xf32> to vector<4x8xbf16>
    %c24 = arith.constant 24 : index
    %c0_196 = arith.constant 0 : index
    %c0_197 = arith.constant 0 : index
    %305 = vector.load %arg3[%c24, %c0_196, %c0_197] : memref<27x8x64xbf16, #tpu.memory_space<vmem>>, vector<1x8x64xbf16>
    %306 = vector.shape_cast %305 : vector<1x8x64xbf16> to vector<8x64xbf16>
    %cst_198 = arith.constant dense<0.000000e+00> : vector<4x64xf32>
    %307 = tpu.matmul %304, %306, %cst_198 {dimension_numbers = #tpu.dot_dimension_numbers<[1], [0], [0], [1], [0, 0, 1, 1], [], []>} : vector<4x8xbf16>, vector<8x64xbf16>, vector<4x64xf32> -> vector<4x64xf32>
    %308 = arith.addf %296, %307 : vector<4x64xf32>
    %c2_i32_199 = arith.constant 2 : i32
    %309 = arith.addi %arg1, %c2_i32_199 : i32
    %c0_200 = arith.constant 0 : index
    %310 = arith.index_cast %309 : i32 to index
    %c5_201 = arith.constant 5 : index
    %c0_202 = arith.constant 0 : index
    %311 = vector.load %arg2[%c0_200, %310, %c5_201, %c0_202] : memref<1x4x10x8xf32, #tpu.memory_space<vmem>>, vector<1x1x4x8xf32>
    %312 = vector.shape_cast %311 : vector<1x1x4x8xf32> to vector<1x4x8xf32>
    %313 = vector.shape_cast %312 : vector<1x4x8xf32> to vector<4x8xf32>
    %314 = arith.truncf %313 : vector<4x8xf32> to vector<4x8xbf16>
    %c25 = arith.constant 25 : index
    %c0_203 = arith.constant 0 : index
    %c0_204 = arith.constant 0 : index
    %315 = vector.load %arg3[%c25, %c0_203, %c0_204] : memref<27x8x64xbf16, #tpu.memory_space<vmem>>, vector<1x8x64xbf16>
    %316 = vector.shape_cast %315 : vector<1x8x64xbf16> to vector<8x64xbf16>
    %cst_205 = arith.constant dense<0.000000e+00> : vector<4x64xf32>
    %317 = tpu.matmul %314, %316, %cst_205 {dimension_numbers = #tpu.dot_dimension_numbers<[1], [0], [0], [1], [0, 0, 1, 1], [], []>} : vector<4x8xbf16>, vector<8x64xbf16>, vector<4x64xf32> -> vector<4x64xf32>
    %318 = arith.addf %308, %317 : vector<4x64xf32>
    %c2_i32_206 = arith.constant 2 : i32
    %319 = arith.addi %arg1, %c2_i32_206 : i32
    %c0_207 = arith.constant 0 : index
    %320 = arith.index_cast %319 : i32 to index
    %c6_208 = arith.constant 6 : index
    %c0_209 = arith.constant 0 : index
    %321 = vector.load %arg2[%c0_207, %320, %c6_208, %c0_209] : memref<1x4x10x8xf32, #tpu.memory_space<vmem>>, vector<1x1x4x8xf32>
    %322 = vector.shape_cast %321 : vector<1x1x4x8xf32> to vector<1x4x8xf32>
    %323 = vector.shape_cast %322 : vector<1x4x8xf32> to vector<4x8xf32>
    %cst_210 = arith.constant 0.000000e+00 : f32
    %324 = vector.broadcast %cst_210 : f32 to vector<4x8xf32>
    %325 = arith.select %20, %323, %324 : vector<4x8xi1>, vector<4x8xf32>
    %326 = arith.truncf %325 : vector<4x8xf32> to vector<4x8xbf16>
    %c26 = arith.constant 26 : index
    %c0_211 = arith.constant 0 : index
    %c0_212 = arith.constant 0 : index
    %327 = vector.load %arg3[%c26, %c0_211, %c0_212] : memref<27x8x64xbf16, #tpu.memory_space<vmem>>, vector<1x8x64xbf16>
    %328 = vector.shape_cast %327 : vector<1x8x64xbf16> to vector<8x64xbf16>
    %cst_213 = arith.constant dense<0.000000e+00> : vector<4x64xf32>
    %329 = tpu.matmul %326, %328, %cst_213 {dimension_numbers = #tpu.dot_dimension_numbers<[1], [0], [0], [1], [0, 0, 1, 1], [], []>} : vector<4x8xbf16>, vector<8x64xbf16>, vector<4x64xf32> -> vector<4x64xf32>
    %330 = arith.addf %318, %329 : vector<4x64xf32>
    %cst_214 = arith.constant 0.000000e+00 : f32
    %331 = vector.broadcast %cst_214 : f32 to vector<4x64xf32>
    %332 = arith.maximumf %330, %331 : vector<4x64xf32>
    %c0_215 = arith.constant 0 : index
    %c0_216 = arith.constant 0 : index
    %c0_217 = arith.constant 0 : index
    %c0_218 = arith.constant 0 : index
    %333 = vector.load %arg5[%c0_215, %c0_216, %c0_217, %c0_218] : memref<1x1x4x64xf32, #tpu.memory_space<vmem>>, vector<1x1x4x64xf32>
    %334 = vector.shape_cast %333 : vector<1x1x4x64xf32> to vector<4x64xf32>
    %335 = vector.shape_cast %332 : vector<4x64xf32> to vector<1x1x4x64xf32>
    tpu.vector_store %arg5[%c0_215, %c0_216, %c0_217, %c0_218], %335 {strides = array<i32>} : memref<1x1x4x64xf32, #tpu.memory_space<vmem>>, vector<1x1x4x64xf32>,
    return
  }
  func.func @transform_0(%arg0: i32, %arg1: i32) -> (i32, i32, i32, i32) {
    %c0_i32 = arith.constant 0 : i32
    %c0_i32_0 = arith.constant 0 : i32
    %c0_i32_1 = arith.constant 0 : i32
    %c0_i32_2 = arith.constant 0 : i32
    return %arg0, %c0_i32, %c0_i32_0, %c0_i32_1 : i32, i32, i32, i32
  }
  func.func @transform_1(%arg0: i32, %arg1: i32) -> (i32, i32, i32) {
    %c0_i32 = arith.constant 0 : i32
    %c0_i32_0 = arith.constant 0 : i32
    %c0_i32_1 = arith.constant 0 : i32
    %c0_i32_2 = arith.constant 0 : i32
    return %c0_i32, %c0_i32_0, %c0_i32_1 : i32, i32, i32
  }
  func.func @transform_2(%arg0: i32, %arg1: i32) -> (i32, i32) {
    %c0_i32 = arith.constant 0 : i32
    %c0_i32_0 = arith.constant 0 : i32
    %c0_i32_1 = arith.constant 0 : i32
    return %c0_i32, %c0_i32_0 : i32, i32
  }
  func.func @transform_3(%arg0: i32, %arg1: i32) -> (i32, i32, i32, i32) {
    %c0_i32 = arith.constant 0 : i32
    %c0_i32_0 = arith.constant 0 : i32
    %c0_i32_1 = arith.constant 0 : i32
    return %arg0, %arg1, %c0_i32, %c0_i32_0 : i32, i32, i32, i32
  }
}

module attributes {stable_mosaic.version = 11 : i64} {
  func.func @_upsample_kernel(%arg0: i32, %arg1: i32, %arg2: memref<1x6x26x8xf32, #tpu.memory_space<vmem>>, %arg3: memref<27x8x64xbf16, #tpu.memory_space<vmem>>, %arg4: memref<1x64xf32, #tpu.memory_space<vmem>>, %arg5: memref<64x8xbf16, #tpu.memory_space<vmem>>, %arg6: memref<1x8xf32, #tpu.memory_space<vmem>>, %arg7: memref<1x1x16x8xf32, #tpu.memory_space<vmem>>) attributes {dimension_semantics = [#tpu.dimension_semantics<parallel>, #tpu.dimension_semantics<parallel>], iteration_bounds = array<i64: 2, 4>, scalar_prefetch = 0 : i64, scratch_operands = 0 : i64, tpu.core_type = #tpu.core_type<tc>, window_params = [{transform_indices = @transform_0, window_bounds = array<i64: 1, 6, 26, 8>}, {pipeline_mode = #tpu.pipeline_mode<synchronous>, transform_indices = @transform_1, window_bounds = array<i64: 27, 8, 64>}, {pipeline_mode = #tpu.pipeline_mode<synchronous>, transform_indices = @transform_2, window_bounds = array<i64: 1, 64>}, {pipeline_mode = #tpu.pipeline_mode<synchronous>, transform_indices = @transform_3, window_bounds = array<i64: 64, 8>}, {pipeline_mode = #tpu.pipeline_mode<synchronous>, transform_indices = @transform_4, window_bounds = array<i64: 1, 8>}, {transform_indices = @transform_5, window_bounds = array<i64: 1, 1, 16, 8>}]} {
    %0 = tpu.iota {dimensions = array<i32: 0>} : vector<16x8xi32>
    %c4_i32 = arith.constant 4 : i32
    %c0_i32 = arith.constant 0 : i32
    %1 = arith.cmpi eq, %c4_i32, %c0_i32 : i32
    %c1_i32 = arith.constant 1 : i32
    %2 = arith.select %1, %c1_i32, %c4_i32 : i32
    %3 = vector.broadcast %2 : i32 to vector<16x8xi32>
    %4 = arith.remsi %0, %3 : vector<16x8xi32>
    %c0_i32_0 = arith.constant 0 : i32
    %5 = vector.broadcast %c0_i32_0 : i32 to vector<16x8xi32>
    %6 = arith.cmpi ne, %4, %5 : vector<16x8xi32>
    %c0_i32_1 = arith.constant 0 : i32
    %7 = vector.broadcast %c0_i32_1 : i32 to vector<16x8xi32>
    %8 = arith.cmpi slt, %4, %7 : vector<16x8xi32>
    %c0_i32_2 = arith.constant 0 : i32
    %9 = arith.cmpi slt, %2, %c0_i32_2 : i32
    %10 = vector.broadcast %9 : i1 to vector<16x8xi1>
    %11 = vector.broadcast %10 : vector<16x8xi1> to vector<16x8xi1>
    %12 = arith.xori %8, %11 : vector<16x8xi1>
    %13 = arith.andi %12, %6 : vector<16x8xi1>
    %14 = vector.broadcast %2 : i32 to vector<16x8xi32>
    %15 = arith.addi %4, %14 : vector<16x8xi32>
    %16 = arith.select %13, %15, %4 : vector<16x8xi1>, vector<16x8xi32>
    %c0_i32_3 = arith.constant 0 : i32
    %17 = vector.broadcast %c0_i32_3 : i32 to vector<16x8xi32>
    %18 = arith.cmpi ne, %16, %17 : vector<16x8xi32>
    %c3_i32 = arith.constant 3 : i32
    %19 = vector.broadcast %c3_i32 : i32 to vector<16x8xi32>
    %20 = arith.cmpi ne, %16, %19 : vector<16x8xi32>
    %cst = arith.constant 0.000000e+00 : f32
    %21 = vector.broadcast %cst : f32 to vector<16x64xf32>
    %c0 = arith.constant 0 : index
    %c0_4 = arith.constant 0 : index
    %22 = vector.load %arg4[%c0, %c0_4] : memref<1x64xf32, #tpu.memory_space<vmem>>, vector<1x64xf32>
    %23 = vector.broadcast %22 : vector<1x64xf32> to vector<16x64xf32>
    %24 = arith.addf %21, %23 : vector<16x64xf32>
    %c0_i32_5 = arith.constant 0 : i32
    %25 = arith.addi %arg1, %c0_i32_5 : i32
    %c0_6 = arith.constant 0 : index
    %26 = arith.index_cast %25 : i32 to index
    %c0_7 = arith.constant 0 : index
    %c0_8 = arith.constant 0 : index
    %27 = vector.load %arg2[%c0_6, %26, %c0_7, %c0_8] : memref<1x6x26x8xf32, #tpu.memory_space<vmem>>, vector<1x1x16x8xf32>
    %28 = vector.shape_cast %27 : vector<1x1x16x8xf32> to vector<1x16x8xf32>
    %29 = vector.shape_cast %28 : vector<1x16x8xf32> to vector<16x8xf32>
    %cst_9 = arith.constant 0.000000e+00 : f32
    %30 = vector.broadcast %cst_9 : f32 to vector<16x8xf32>
    %31 = arith.select %18, %29, %30 : vector<16x8xi1>, vector<16x8xf32>
    %32 = arith.truncf %31 : vector<16x8xf32> to vector<16x8xbf16>
    %c0_10 = arith.constant 0 : index
    %c0_11 = arith.constant 0 : index
    %c0_12 = arith.constant 0 : index
    %33 = vector.load %arg3[%c0_10, %c0_11, %c0_12] : memref<27x8x64xbf16, #tpu.memory_space<vmem>>, vector<1x8x64xbf16>
    %34 = vector.shape_cast %33 : vector<1x8x64xbf16> to vector<8x64xbf16>
    %cst_13 = arith.constant dense<0.000000e+00> : vector<16x64xf32>
    %35 = tpu.matmul %32, %34, %cst_13 {dimension_numbers = #tpu.dot_dimension_numbers<[1], [0], [0], [1], [0, 0, 1, 1], [], []>} : vector<16x8xbf16>, vector<8x64xbf16>, vector<16x64xf32> -> vector<16x64xf32>
    %36 = arith.addf %24, %35 : vector<16x64xf32>
    %c0_i32_14 = arith.constant 0 : i32
    %37 = arith.addi %arg1, %c0_i32_14 : i32
    %c0_15 = arith.constant 0 : index
    %38 = arith.index_cast %37 : i32 to index
    %c1 = arith.constant 1 : index
    %c0_16 = arith.constant 0 : index
    %39 = vector.load %arg2[%c0_15, %38, %c1, %c0_16] : memref<1x6x26x8xf32, #tpu.memory_space<vmem>>, vector<1x1x16x8xf32>
    %40 = vector.shape_cast %39 : vector<1x1x16x8xf32> to vector<1x16x8xf32>
    %41 = vector.shape_cast %40 : vector<1x16x8xf32> to vector<16x8xf32>
    %42 = arith.truncf %41 : vector<16x8xf32> to vector<16x8xbf16>
    %c1_17 = arith.constant 1 : index
    %c0_18 = arith.constant 0 : index
    %c0_19 = arith.constant 0 : index
    %43 = vector.load %arg3[%c1_17, %c0_18, %c0_19] : memref<27x8x64xbf16, #tpu.memory_space<vmem>>, vector<1x8x64xbf16>
    %44 = vector.shape_cast %43 : vector<1x8x64xbf16> to vector<8x64xbf16>
    %cst_20 = arith.constant dense<0.000000e+00> : vector<16x64xf32>
    %45 = tpu.matmul %42, %44, %cst_20 {dimension_numbers = #tpu.dot_dimension_numbers<[1], [0], [0], [1], [0, 0, 1, 1], [], []>} : vector<16x8xbf16>, vector<8x64xbf16>, vector<16x64xf32> -> vector<16x64xf32>
    %46 = arith.addf %36, %45 : vector<16x64xf32>
    %c0_i32_21 = arith.constant 0 : i32
    %47 = arith.addi %arg1, %c0_i32_21 : i32
    %c0_22 = arith.constant 0 : index
    %48 = arith.index_cast %47 : i32 to index
    %c2 = arith.constant 2 : index
    %c0_23 = arith.constant 0 : index
    %49 = vector.load %arg2[%c0_22, %48, %c2, %c0_23] : memref<1x6x26x8xf32, #tpu.memory_space<vmem>>, vector<1x1x16x8xf32>
    %50 = vector.shape_cast %49 : vector<1x1x16x8xf32> to vector<1x16x8xf32>
    %51 = vector.shape_cast %50 : vector<1x16x8xf32> to vector<16x8xf32>
    %cst_24 = arith.constant 0.000000e+00 : f32
    %52 = vector.broadcast %cst_24 : f32 to vector<16x8xf32>
    %53 = arith.select %20, %51, %52 : vector<16x8xi1>, vector<16x8xf32>
    %54 = arith.truncf %53 : vector<16x8xf32> to vector<16x8xbf16>
    %c2_25 = arith.constant 2 : index
    %c0_26 = arith.constant 0 : index
    %c0_27 = arith.constant 0 : index
    %55 = vector.load %arg3[%c2_25, %c0_26, %c0_27] : memref<27x8x64xbf16, #tpu.memory_space<vmem>>, vector<1x8x64xbf16>
    %56 = vector.shape_cast %55 : vector<1x8x64xbf16> to vector<8x64xbf16>
    %cst_28 = arith.constant dense<0.000000e+00> : vector<16x64xf32>
    %57 = tpu.matmul %54, %56, %cst_28 {dimension_numbers = #tpu.dot_dimension_numbers<[1], [0], [0], [1], [0, 0, 1, 1], [], []>} : vector<16x8xbf16>, vector<8x64xbf16>, vector<16x64xf32> -> vector<16x64xf32>
    %58 = arith.addf %46, %57 : vector<16x64xf32>
    %c0_i32_29 = arith.constant 0 : i32
    %59 = arith.addi %arg1, %c0_i32_29 : i32
    %c0_30 = arith.constant 0 : index
    %60 = arith.index_cast %59 : i32 to index
    %c4 = arith.constant 4 : index
    %c0_31 = arith.constant 0 : index
    %61 = vector.load %arg2[%c0_30, %60, %c4, %c0_31] : memref<1x6x26x8xf32, #tpu.memory_space<vmem>>, vector<1x1x16x8xf32>
    %62 = vector.shape_cast %61 : vector<1x1x16x8xf32> to vector<1x16x8xf32>
    %63 = vector.shape_cast %62 : vector<1x16x8xf32> to vector<16x8xf32>
    %cst_32 = arith.constant 0.000000e+00 : f32
    %64 = vector.broadcast %cst_32 : f32 to vector<16x8xf32>
    %65 = arith.select %18, %63, %64 : vector<16x8xi1>, vector<16x8xf32>
    %66 = arith.truncf %65 : vector<16x8xf32> to vector<16x8xbf16>
    %c3 = arith.constant 3 : index
    %c0_33 = arith.constant 0 : index
    %c0_34 = arith.constant 0 : index
    %67 = vector.load %arg3[%c3, %c0_33, %c0_34] : memref<27x8x64xbf16, #tpu.memory_space<vmem>>, vector<1x8x64xbf16>
    %68 = vector.shape_cast %67 : vector<1x8x64xbf16> to vector<8x64xbf16>
    %cst_35 = arith.constant dense<0.000000e+00> : vector<16x64xf32>
    %69 = tpu.matmul %66, %68, %cst_35 {dimension_numbers = #tpu.dot_dimension_numbers<[1], [0], [0], [1], [0, 0, 1, 1], [], []>} : vector<16x8xbf16>, vector<8x64xbf16>, vector<16x64xf32> -> vector<16x64xf32>
    %70 = arith.addf %58, %69 : vector<16x64xf32>
    %c0_i32_36 = arith.constant 0 : i32
    %71 = arith.addi %arg1, %c0_i32_36 : i32
    %c0_37 = arith.constant 0 : index
    %72 = arith.index_cast %71 : i32 to index
    %c5 = arith.constant 5 : index
    %c0_38 = arith.constant 0 : index
    %73 = vector.load %arg2[%c0_37, %72, %c5, %c0_38] : memref<1x6x26x8xf32, #tpu.memory_space<vmem>>, vector<1x1x16x8xf32>
    %74 = vector.shape_cast %73 : vector<1x1x16x8xf32> to vector<1x16x8xf32>
    %75 = vector.shape_cast %74 : vector<1x16x8xf32> to vector<16x8xf32>
    %76 = arith.truncf %75 : vector<16x8xf32> to vector<16x8xbf16>
    %c4_39 = arith.constant 4 : index
    %c0_40 = arith.constant 0 : index
    %c0_41 = arith.constant 0 : index
    %77 = vector.load %arg3[%c4_39, %c0_40, %c0_41] : memref<27x8x64xbf16, #tpu.memory_space<vmem>>, vector<1x8x64xbf16>
    %78 = vector.shape_cast %77 : vector<1x8x64xbf16> to vector<8x64xbf16>
    %cst_42 = arith.constant dense<0.000000e+00> : vector<16x64xf32>
    %79 = tpu.matmul %76, %78, %cst_42 {dimension_numbers = #tpu.dot_dimension_numbers<[1], [0], [0], [1], [0, 0, 1, 1], [], []>} : vector<16x8xbf16>, vector<8x64xbf16>, vector<16x64xf32> -> vector<16x64xf32>
    %80 = arith.addf %70, %79 : vector<16x64xf32>
    %c0_i32_43 = arith.constant 0 : i32
    %81 = arith.addi %arg1, %c0_i32_43 : i32
    %c0_44 = arith.constant 0 : index
    %82 = arith.index_cast %81 : i32 to index
    %c6 = arith.constant 6 : index
    %c0_45 = arith.constant 0 : index
    %83 = vector.load %arg2[%c0_44, %82, %c6, %c0_45] : memref<1x6x26x8xf32, #tpu.memory_space<vmem>>, vector<1x1x16x8xf32>
    %84 = vector.shape_cast %83 : vector<1x1x16x8xf32> to vector<1x16x8xf32>
    %85 = vector.shape_cast %84 : vector<1x16x8xf32> to vector<16x8xf32>
    %cst_46 = arith.constant 0.000000e+00 : f32
    %86 = vector.broadcast %cst_46 : f32 to vector<16x8xf32>
    %87 = arith.select %20, %85, %86 : vector<16x8xi1>, vector<16x8xf32>
    %88 = arith.truncf %87 : vector<16x8xf32> to vector<16x8xbf16>
    %c5_47 = arith.constant 5 : index
    %c0_48 = arith.constant 0 : index
    %c0_49 = arith.constant 0 : index
    %89 = vector.load %arg3[%c5_47, %c0_48, %c0_49] : memref<27x8x64xbf16, #tpu.memory_space<vmem>>, vector<1x8x64xbf16>
    %90 = vector.shape_cast %89 : vector<1x8x64xbf16> to vector<8x64xbf16>
    %cst_50 = arith.constant dense<0.000000e+00> : vector<16x64xf32>
    %91 = tpu.matmul %88, %90, %cst_50 {dimension_numbers = #tpu.dot_dimension_numbers<[1], [0], [0], [1], [0, 0, 1, 1], [], []>} : vector<16x8xbf16>, vector<8x64xbf16>, vector<16x64xf32> -> vector<16x64xf32>
    %92 = arith.addf %80, %91 : vector<16x64xf32>
    %c0_i32_51 = arith.constant 0 : i32
    %93 = arith.addi %arg1, %c0_i32_51 : i32
    %c0_52 = arith.constant 0 : index
    %94 = arith.index_cast %93 : i32 to index
    %c8 = arith.constant 8 : index
    %c0_53 = arith.constant 0 : index
    %95 = vector.load %arg2[%c0_52, %94, %c8, %c0_53] : memref<1x6x26x8xf32, #tpu.memory_space<vmem>>, vector<1x1x16x8xf32>
    %96 = vector.shape_cast %95 : vector<1x1x16x8xf32> to vector<1x16x8xf32>
    %97 = vector.shape_cast %96 : vector<1x16x8xf32> to vector<16x8xf32>
    %cst_54 = arith.constant 0.000000e+00 : f32
    %98 = vector.broadcast %cst_54 : f32 to vector<16x8xf32>
    %99 = arith.select %18, %97, %98 : vector<16x8xi1>, vector<16x8xf32>
    %100 = arith.truncf %99 : vector<16x8xf32> to vector<16x8xbf16>
    %c6_55 = arith.constant 6 : index
    %c0_56 = arith.constant 0 : index
    %c0_57 = arith.constant 0 : index
    %101 = vector.load %arg3[%c6_55, %c0_56, %c0_57] : memref<27x8x64xbf16, #tpu.memory_space<vmem>>, vector<1x8x64xbf16>
    %102 = vector.shape_cast %101 : vector<1x8x64xbf16> to vector<8x64xbf16>
    %cst_58 = arith.constant dense<0.000000e+00> : vector<16x64xf32>
    %103 = tpu.matmul %100, %102, %cst_58 {dimension_numbers = #tpu.dot_dimension_numbers<[1], [0], [0], [1], [0, 0, 1, 1], [], []>} : vector<16x8xbf16>, vector<8x64xbf16>, vector<16x64xf32> -> vector<16x64xf32>
    %104 = arith.addf %92, %103 : vector<16x64xf32>
    %c0_i32_59 = arith.constant 0 : i32
    %105 = arith.addi %arg1, %c0_i32_59 : i32
    %c0_60 = arith.constant 0 : index
    %106 = arith.index_cast %105 : i32 to index
    %c9 = arith.constant 9 : index
    %c0_61 = arith.constant 0 : index
    %107 = vector.load %arg2[%c0_60, %106, %c9, %c0_61] : memref<1x6x26x8xf32, #tpu.memory_space<vmem>>, vector<1x1x16x8xf32>
    %108 = vector.shape_cast %107 : vector<1x1x16x8xf32> to vector<1x16x8xf32>
    %109 = vector.shape_cast %108 : vector<1x16x8xf32> to vector<16x8xf32>
    %110 = arith.truncf %109 : vector<16x8xf32> to vector<16x8xbf16>
    %c7 = arith.constant 7 : index
    %c0_62 = arith.constant 0 : index
    %c0_63 = arith.constant 0 : index
    %111 = vector.load %arg3[%c7, %c0_62, %c0_63] : memref<27x8x64xbf16, #tpu.memory_space<vmem>>, vector<1x8x64xbf16>
    %112 = vector.shape_cast %111 : vector<1x8x64xbf16> to vector<8x64xbf16>
    %cst_64 = arith.constant dense<0.000000e+00> : vector<16x64xf32>
    %113 = tpu.matmul %110, %112, %cst_64 {dimension_numbers = #tpu.dot_dimension_numbers<[1], [0], [0], [1], [0, 0, 1, 1], [], []>} : vector<16x8xbf16>, vector<8x64xbf16>, vector<16x64xf32> -> vector<16x64xf32>
    %114 = arith.addf %104, %113 : vector<16x64xf32>
    %c0_i32_65 = arith.constant 0 : i32
    %115 = arith.addi %arg1, %c0_i32_65 : i32
    %c0_66 = arith.constant 0 : index
    %116 = arith.index_cast %115 : i32 to index
    %c10 = arith.constant 10 : index
    %c0_67 = arith.constant 0 : index
    %117 = vector.load %arg2[%c0_66, %116, %c10, %c0_67] : memref<1x6x26x8xf32, #tpu.memory_space<vmem>>, vector<1x1x16x8xf32>
    %118 = vector.shape_cast %117 : vector<1x1x16x8xf32> to vector<1x16x8xf32>
    %119 = vector.shape_cast %118 : vector<1x16x8xf32> to vector<16x8xf32>
    %cst_68 = arith.constant 0.000000e+00 : f32
    %120 = vector.broadcast %cst_68 : f32 to vector<16x8xf32>
    %121 = arith.select %20, %119, %120 : vector<16x8xi1>, vector<16x8xf32>
    %122 = arith.truncf %121 : vector<16x8xf32> to vector<16x8xbf16>
    %c8_69 = arith.constant 8 : index
    %c0_70 = arith.constant 0 : index
    %c0_71 = arith.constant 0 : index
    %123 = vector.load %arg3[%c8_69, %c0_70, %c0_71] : memref<27x8x64xbf16, #tpu.memory_space<vmem>>, vector<1x8x64xbf16>
    %124 = vector.shape_cast %123 : vector<1x8x64xbf16> to vector<8x64xbf16>
    %cst_72 = arith.constant dense<0.000000e+00> : vector<16x64xf32>
    %125 = tpu.matmul %122, %124, %cst_72 {dimension_numbers = #tpu.dot_dimension_numbers<[1], [0], [0], [1], [0, 0, 1, 1], [], []>} : vector<16x8xbf16>, vector<8x64xbf16>, vector<16x64xf32> -> vector<16x64xf32>
    %126 = arith.addf %114, %125 : vector<16x64xf32>
    %c1_i32_73 = arith.constant 1 : i32
    %127 = arith.addi %arg1, %c1_i32_73 : i32
    %c0_74 = arith.constant 0 : index
    %128 = arith.index_cast %127 : i32 to index
    %c0_75 = arith.constant 0 : index
    %c0_76 = arith.constant 0 : index
    %129 = vector.load %arg2[%c0_74, %128, %c0_75, %c0_76] : memref<1x6x26x8xf32, #tpu.memory_space<vmem>>, vector<1x1x16x8xf32>
    %130 = vector.shape_cast %129 : vector<1x1x16x8xf32> to vector<1x16x8xf32>
    %131 = vector.shape_cast %130 : vector<1x16x8xf32> to vector<16x8xf32>
    %cst_77 = arith.constant 0.000000e+00 : f32
    %132 = vector.broadcast %cst_77 : f32 to vector<16x8xf32>
    %133 = arith.select %18, %131, %132 : vector<16x8xi1>, vector<16x8xf32>
    %134 = arith.truncf %133 : vector<16x8xf32> to vector<16x8xbf16>
    %c9_78 = arith.constant 9 : index
    %c0_79 = arith.constant 0 : index
    %c0_80 = arith.constant 0 : index
    %135 = vector.load %arg3[%c9_78, %c0_79, %c0_80] : memref<27x8x64xbf16, #tpu.memory_space<vmem>>, vector<1x8x64xbf16>
    %136 = vector.shape_cast %135 : vector<1x8x64xbf16> to vector<8x64xbf16>
    %cst_81 = arith.constant dense<0.000000e+00> : vector<16x64xf32>
    %137 = tpu.matmul %134, %136, %cst_81 {dimension_numbers = #tpu.dot_dimension_numbers<[1], [0], [0], [1], [0, 0, 1, 1], [], []>} : vector<16x8xbf16>, vector<8x64xbf16>, vector<16x64xf32> -> vector<16x64xf32>
    %138 = arith.addf %126, %137 : vector<16x64xf32>
    %c1_i32_82 = arith.constant 1 : i32
    %139 = arith.addi %arg1, %c1_i32_82 : i32
    %c0_83 = arith.constant 0 : index
    %140 = arith.index_cast %139 : i32 to index
    %c1_84 = arith.constant 1 : index
    %c0_85 = arith.constant 0 : index
    %141 = vector.load %arg2[%c0_83, %140, %c1_84, %c0_85] : memref<1x6x26x8xf32, #tpu.memory_space<vmem>>, vector<1x1x16x8xf32>
    %142 = vector.shape_cast %141 : vector<1x1x16x8xf32> to vector<1x16x8xf32>
    %143 = vector.shape_cast %142 : vector<1x16x8xf32> to vector<16x8xf32>
    %144 = arith.truncf %143 : vector<16x8xf32> to vector<16x8xbf16>
    %c10_86 = arith.constant 10 : index
    %c0_87 = arith.constant 0 : index
    %c0_88 = arith.constant 0 : index
    %145 = vector.load %arg3[%c10_86, %c0_87, %c0_88] : memref<27x8x64xbf16, #tpu.memory_space<vmem>>, vector<1x8x64xbf16>
    %146 = vector.shape_cast %145 : vector<1x8x64xbf16> to vector<8x64xbf16>
    %cst_89 = arith.constant dense<0.000000e+00> : vector<16x64xf32>
    %147 = tpu.matmul %144, %146, %cst_89 {dimension_numbers = #tpu.dot_dimension_numbers<[1], [0], [0], [1], [0, 0, 1, 1], [], []>} : vector<16x8xbf16>, vector<8x64xbf16>, vector<16x64xf32> -> vector<16x64xf32>
    %148 = arith.addf %138, %147 : vector<16x64xf32>
    %c1_i32_90 = arith.constant 1 : i32
    %149 = arith.addi %arg1, %c1_i32_90 : i32
    %c0_91 = arith.constant 0 : index
    %150 = arith.index_cast %149 : i32 to index
    %c2_92 = arith.constant 2 : index
    %c0_93 = arith.constant 0 : index
    %151 = vector.load %arg2[%c0_91, %150, %c2_92, %c0_93] : memref<1x6x26x8xf32, #tpu.memory_space<vmem>>, vector<1x1x16x8xf32>
    %152 = vector.shape_cast %151 : vector<1x1x16x8xf32> to vector<1x16x8xf32>
    %153 = vector.shape_cast %152 : vector<1x16x8xf32> to vector<16x8xf32>
    %cst_94 = arith.constant 0.000000e+00 : f32
    %154 = vector.broadcast %cst_94 : f32 to vector<16x8xf32>
    %155 = arith.select %20, %153, %154 : vector<16x8xi1>, vector<16x8xf32>
    %156 = arith.truncf %155 : vector<16x8xf32> to vector<16x8xbf16>
    %c11 = arith.constant 11 : index
    %c0_95 = arith.constant 0 : index
    %c0_96 = arith.constant 0 : index
    %157 = vector.load %arg3[%c11, %c0_95, %c0_96] : memref<27x8x64xbf16, #tpu.memory_space<vmem>>, vector<1x8x64xbf16>
    %158 = vector.shape_cast %157 : vector<1x8x64xbf16> to vector<8x64xbf16>
    %cst_97 = arith.constant dense<0.000000e+00> : vector<16x64xf32>
    %159 = tpu.matmul %156, %158, %cst_97 {dimension_numbers = #tpu.dot_dimension_numbers<[1], [0], [0], [1], [0, 0, 1, 1], [], []>} : vector<16x8xbf16>, vector<8x64xbf16>, vector<16x64xf32> -> vector<16x64xf32>
    %160 = arith.addf %148, %159 : vector<16x64xf32>
    %c1_i32_98 = arith.constant 1 : i32
    %161 = arith.addi %arg1, %c1_i32_98 : i32
    %c0_99 = arith.constant 0 : index
    %162 = arith.index_cast %161 : i32 to index
    %c4_100 = arith.constant 4 : index
    %c0_101 = arith.constant 0 : index
    %163 = vector.load %arg2[%c0_99, %162, %c4_100, %c0_101] : memref<1x6x26x8xf32, #tpu.memory_space<vmem>>, vector<1x1x16x8xf32>
    %164 = vector.shape_cast %163 : vector<1x1x16x8xf32> to vector<1x16x8xf32>
    %165 = vector.shape_cast %164 : vector<1x16x8xf32> to vector<16x8xf32>
    %cst_102 = arith.constant 0.000000e+00 : f32
    %166 = vector.broadcast %cst_102 : f32 to vector<16x8xf32>
    %167 = arith.select %18, %165, %166 : vector<16x8xi1>, vector<16x8xf32>
    %168 = arith.truncf %167 : vector<16x8xf32> to vector<16x8xbf16>
    %c12 = arith.constant 12 : index
    %c0_103 = arith.constant 0 : index
    %c0_104 = arith.constant 0 : index
    %169 = vector.load %arg3[%c12, %c0_103, %c0_104] : memref<27x8x64xbf16, #tpu.memory_space<vmem>>, vector<1x8x64xbf16>
    %170 = vector.shape_cast %169 : vector<1x8x64xbf16> to vector<8x64xbf16>
    %cst_105 = arith.constant dense<0.000000e+00> : vector<16x64xf32>
    %171 = tpu.matmul %168, %170, %cst_105 {dimension_numbers = #tpu.dot_dimension_numbers<[1], [0], [0], [1], [0, 0, 1, 1], [], []>} : vector<16x8xbf16>, vector<8x64xbf16>, vector<16x64xf32> -> vector<16x64xf32>
    %172 = arith.addf %160, %171 : vector<16x64xf32>
    %c1_i32_106 = arith.constant 1 : i32
    %173 = arith.addi %arg1, %c1_i32_106 : i32
    %c0_107 = arith.constant 0 : index
    %174 = arith.index_cast %173 : i32 to index
    %c5_108 = arith.constant 5 : index
    %c0_109 = arith.constant 0 : index
    %175 = vector.load %arg2[%c0_107, %174, %c5_108, %c0_109] : memref<1x6x26x8xf32, #tpu.memory_space<vmem>>, vector<1x1x16x8xf32>
    %176 = vector.shape_cast %175 : vector<1x1x16x8xf32> to vector<1x16x8xf32>
    %177 = vector.shape_cast %176 : vector<1x16x8xf32> to vector<16x8xf32>
    %178 = arith.truncf %177 : vector<16x8xf32> to vector<16x8xbf16>
    %c13 = arith.constant 13 : index
    %c0_110 = arith.constant 0 : index
    %c0_111 = arith.constant 0 : index
    %179 = vector.load %arg3[%c13, %c0_110, %c0_111] : memref<27x8x64xbf16, #tpu.memory_space<vmem>>, vector<1x8x64xbf16>
    %180 = vector.shape_cast %179 : vector<1x8x64xbf16> to vector<8x64xbf16>
    %cst_112 = arith.constant dense<0.000000e+00> : vector<16x64xf32>
    %181 = tpu.matmul %178, %180, %cst_112 {dimension_numbers = #tpu.dot_dimension_numbers<[1], [0], [0], [1], [0, 0, 1, 1], [], []>} : vector<16x8xbf16>, vector<8x64xbf16>, vector<16x64xf32> -> vector<16x64xf32>
    %182 = arith.addf %172, %181 : vector<16x64xf32>
    %c1_i32_113 = arith.constant 1 : i32
    %183 = arith.addi %arg1, %c1_i32_113 : i32
    %c0_114 = arith.constant 0 : index
    %184 = arith.index_cast %183 : i32 to index
    %c6_115 = arith.constant 6 : index
    %c0_116 = arith.constant 0 : index
    %185 = vector.load %arg2[%c0_114, %184, %c6_115, %c0_116] : memref<1x6x26x8xf32, #tpu.memory_space<vmem>>, vector<1x1x16x8xf32>
    %186 = vector.shape_cast %185 : vector<1x1x16x8xf32> to vector<1x16x8xf32>
    %187 = vector.shape_cast %186 : vector<1x16x8xf32> to vector<16x8xf32>
    %cst_117 = arith.constant 0.000000e+00 : f32
    %188 = vector.broadcast %cst_117 : f32 to vector<16x8xf32>
    %189 = arith.select %20, %187, %188 : vector<16x8xi1>, vector<16x8xf32>
    %190 = arith.truncf %189 : vector<16x8xf32> to vector<16x8xbf16>
    %c14 = arith.constant 14 : index
    %c0_118 = arith.constant 0 : index
    %c0_119 = arith.constant 0 : index
    %191 = vector.load %arg3[%c14, %c0_118, %c0_119] : memref<27x8x64xbf16, #tpu.memory_space<vmem>>, vector<1x8x64xbf16>
    %192 = vector.shape_cast %191 : vector<1x8x64xbf16> to vector<8x64xbf16>
    %cst_120 = arith.constant dense<0.000000e+00> : vector<16x64xf32>
    %193 = tpu.matmul %190, %192, %cst_120 {dimension_numbers = #tpu.dot_dimension_numbers<[1], [0], [0], [1], [0, 0, 1, 1], [], []>} : vector<16x8xbf16>, vector<8x64xbf16>, vector<16x64xf32> -> vector<16x64xf32>
    %194 = arith.addf %182, %193 : vector<16x64xf32>
    %c1_i32_121 = arith.constant 1 : i32
    %195 = arith.addi %arg1, %c1_i32_121 : i32
    %c0_122 = arith.constant 0 : index
    %196 = arith.index_cast %195 : i32 to index
    %c8_123 = arith.constant 8 : index
    %c0_124 = arith.constant 0 : index
    %197 = vector.load %arg2[%c0_122, %196, %c8_123, %c0_124] : memref<1x6x26x8xf32, #tpu.memory_space<vmem>>, vector<1x1x16x8xf32>
    %198 = vector.shape_cast %197 : vector<1x1x16x8xf32> to vector<1x16x8xf32>
    %199 = vector.shape_cast %198 : vector<1x16x8xf32> to vector<16x8xf32>
    %cst_125 = arith.constant 0.000000e+00 : f32
    %200 = vector.broadcast %cst_125 : f32 to vector<16x8xf32>
    %201 = arith.select %18, %199, %200 : vector<16x8xi1>, vector<16x8xf32>
    %202 = arith.truncf %201 : vector<16x8xf32> to vector<16x8xbf16>
    %c15 = arith.constant 15 : index
    %c0_126 = arith.constant 0 : index
    %c0_127 = arith.constant 0 : index
    %203 = vector.load %arg3[%c15, %c0_126, %c0_127] : memref<27x8x64xbf16, #tpu.memory_space<vmem>>, vector<1x8x64xbf16>
    %204 = vector.shape_cast %203 : vector<1x8x64xbf16> to vector<8x64xbf16>
    %cst_128 = arith.constant dense<0.000000e+00> : vector<16x64xf32>
    %205 = tpu.matmul %202, %204, %cst_128 {dimension_numbers = #tpu.dot_dimension_numbers<[1], [0], [0], [1], [0, 0, 1, 1], [], []>} : vector<16x8xbf16>, vector<8x64xbf16>, vector<16x64xf32> -> vector<16x64xf32>
    %206 = arith.addf %194, %205 : vector<16x64xf32>
    %c1_i32_129 = arith.constant 1 : i32
    %207 = arith.addi %arg1, %c1_i32_129 : i32
    %c0_130 = arith.constant 0 : index
    %208 = arith.index_cast %207 : i32 to index
    %c9_131 = arith.constant 9 : index
    %c0_132 = arith.constant 0 : index
    %209 = vector.load %arg2[%c0_130, %208, %c9_131, %c0_132] : memref<1x6x26x8xf32, #tpu.memory_space<vmem>>, vector<1x1x16x8xf32>
    %210 = vector.shape_cast %209 : vector<1x1x16x8xf32> to vector<1x16x8xf32>
    %211 = vector.shape_cast %210 : vector<1x16x8xf32> to vector<16x8xf32>
    %212 = arith.truncf %211 : vector<16x8xf32> to vector<16x8xbf16>
    %c16 = arith.constant 16 : index
    %c0_133 = arith.constant 0 : index
    %c0_134 = arith.constant 0 : index
    %213 = vector.load %arg3[%c16, %c0_133, %c0_134] : memref<27x8x64xbf16, #tpu.memory_space<vmem>>, vector<1x8x64xbf16>
    %214 = vector.shape_cast %213 : vector<1x8x64xbf16> to vector<8x64xbf16>
    %cst_135 = arith.constant dense<0.000000e+00> : vector<16x64xf32>
    %215 = tpu.matmul %212, %214, %cst_135 {dimension_numbers = #tpu.dot_dimension_numbers<[1], [0], [0], [1], [0, 0, 1, 1], [], []>} : vector<16x8xbf16>, vector<8x64xbf16>, vector<16x64xf32> -> vector<16x64xf32>
    %216 = arith.addf %206, %215 : vector<16x64xf32>
    %c1_i32_136 = arith.constant 1 : i32
    %217 = arith.addi %arg1, %c1_i32_136 : i32
    %c0_137 = arith.constant 0 : index
    %218 = arith.index_cast %217 : i32 to index
    %c10_138 = arith.constant 10 : index
    %c0_139 = arith.constant 0 : index
    %219 = vector.load %arg2[%c0_137, %218, %c10_138, %c0_139] : memref<1x6x26x8xf32, #tpu.memory_space<vmem>>, vector<1x1x16x8xf32>
    %220 = vector.shape_cast %219 : vector<1x1x16x8xf32> to vector<1x16x8xf32>
    %221 = vector.shape_cast %220 : vector<1x16x8xf32> to vector<16x8xf32>
    %cst_140 = arith.constant 0.000000e+00 : f32
    %222 = vector.broadcast %cst_140 : f32 to vector<16x8xf32>
    %223 = arith.select %20, %221, %222 : vector<16x8xi1>, vector<16x8xf32>
    %224 = arith.truncf %223 : vector<16x8xf32> to vector<16x8xbf16>
    %c17 = arith.constant 17 : index
    %c0_141 = arith.constant 0 : index
    %c0_142 = arith.constant 0 : index
    %225 = vector.load %arg3[%c17, %c0_141, %c0_142] : memref<27x8x64xbf16, #tpu.memory_space<vmem>>, vector<1x8x64xbf16>
    %226 = vector.shape_cast %225 : vector<1x8x64xbf16> to vector<8x64xbf16>
    %cst_143 = arith.constant dense<0.000000e+00> : vector<16x64xf32>
    %227 = tpu.matmul %224, %226, %cst_143 {dimension_numbers = #tpu.dot_dimension_numbers<[1], [0], [0], [1], [0, 0, 1, 1], [], []>} : vector<16x8xbf16>, vector<8x64xbf16>, vector<16x64xf32> -> vector<16x64xf32>
    %228 = arith.addf %216, %227 : vector<16x64xf32>
    %c2_i32 = arith.constant 2 : i32
    %229 = arith.addi %arg1, %c2_i32 : i32
    %c0_144 = arith.constant 0 : index
    %230 = arith.index_cast %229 : i32 to index
    %c0_145 = arith.constant 0 : index
    %c0_146 = arith.constant 0 : index
    %231 = vector.load %arg2[%c0_144, %230, %c0_145, %c0_146] : memref<1x6x26x8xf32, #tpu.memory_space<vmem>>, vector<1x1x16x8xf32>
    %232 = vector.shape_cast %231 : vector<1x1x16x8xf32> to vector<1x16x8xf32>
    %233 = vector.shape_cast %232 : vector<1x16x8xf32> to vector<16x8xf32>
    %cst_147 = arith.constant 0.000000e+00 : f32
    %234 = vector.broadcast %cst_147 : f32 to vector<16x8xf32>
    %235 = arith.select %18, %233, %234 : vector<16x8xi1>, vector<16x8xf32>
    %236 = arith.truncf %235 : vector<16x8xf32> to vector<16x8xbf16>
    %c18 = arith.constant 18 : index
    %c0_148 = arith.constant 0 : index
    %c0_149 = arith.constant 0 : index
    %237 = vector.load %arg3[%c18, %c0_148, %c0_149] : memref<27x8x64xbf16, #tpu.memory_space<vmem>>, vector<1x8x64xbf16>
    %238 = vector.shape_cast %237 : vector<1x8x64xbf16> to vector<8x64xbf16>
    %cst_150 = arith.constant dense<0.000000e+00> : vector<16x64xf32>
    %239 = tpu.matmul %236, %238, %cst_150 {dimension_numbers = #tpu.dot_dimension_numbers<[1], [0], [0], [1], [0, 0, 1, 1], [], []>} : vector<16x8xbf16>, vector<8x64xbf16>, vector<16x64xf32> -> vector<16x64xf32>
    %240 = arith.addf %228, %239 : vector<16x64xf32>
    %c2_i32_151 = arith.constant 2 : i32
    %241 = arith.addi %arg1, %c2_i32_151 : i32
    %c0_152 = arith.constant 0 : index
    %242 = arith.index_cast %241 : i32 to index
    %c1_153 = arith.constant 1 : index
    %c0_154 = arith.constant 0 : index
    %243 = vector.load %arg2[%c0_152, %242, %c1_153, %c0_154] : memref<1x6x26x8xf32, #tpu.memory_space<vmem>>, vector<1x1x16x8xf32>
    %244 = vector.shape_cast %243 : vector<1x1x16x8xf32> to vector<1x16x8xf32>
    %245 = vector.shape_cast %244 : vector<1x16x8xf32> to vector<16x8xf32>
    %246 = arith.truncf %245 : vector<16x8xf32> to vector<16x8xbf16>
    %c19 = arith.constant 19 : index
    %c0_155 = arith.constant 0 : index
    %c0_156 = arith.constant 0 : index
    %247 = vector.load %arg3[%c19, %c0_155, %c0_156] : memref<27x8x64xbf16, #tpu.memory_space<vmem>>, vector<1x8x64xbf16>
    %248 = vector.shape_cast %247 : vector<1x8x64xbf16> to vector<8x64xbf16>
    %cst_157 = arith.constant dense<0.000000e+00> : vector<16x64xf32>
    %249 = tpu.matmul %246, %248, %cst_157 {dimension_numbers = #tpu.dot_dimension_numbers<[1], [0], [0], [1], [0, 0, 1, 1], [], []>} : vector<16x8xbf16>, vector<8x64xbf16>, vector<16x64xf32> -> vector<16x64xf32>
    %250 = arith.addf %240, %249 : vector<16x64xf32>
    %c2_i32_158 = arith.constant 2 : i32
    %251 = arith.addi %arg1, %c2_i32_158 : i32
    %c0_159 = arith.constant 0 : index
    %252 = arith.index_cast %251 : i32 to index
    %c2_160 = arith.constant 2 : index
    %c0_161 = arith.constant 0 : index
    %253 = vector.load %arg2[%c0_159, %252, %c2_160, %c0_161] : memref<1x6x26x8xf32, #tpu.memory_space<vmem>>, vector<1x1x16x8xf32>
    %254 = vector.shape_cast %253 : vector<1x1x16x8xf32> to vector<1x16x8xf32>
    %255 = vector.shape_cast %254 : vector<1x16x8xf32> to vector<16x8xf32>
    %cst_162 = arith.constant 0.000000e+00 : f32
    %256 = vector.broadcast %cst_162 : f32 to vector<16x8xf32>
    %257 = arith.select %20, %255, %256 : vector<16x8xi1>, vector<16x8xf32>
    %258 = arith.truncf %257 : vector<16x8xf32> to vector<16x8xbf16>
    %c20 = arith.constant 20 : index
    %c0_163 = arith.constant 0 : index
    %c0_164 = arith.constant 0 : index
    %259 = vector.load %arg3[%c20, %c0_163, %c0_164] : memref<27x8x64xbf16, #tpu.memory_space<vmem>>, vector<1x8x64xbf16>
    %260 = vector.shape_cast %259 : vector<1x8x64xbf16> to vector<8x64xbf16>
    %cst_165 = arith.constant dense<0.000000e+00> : vector<16x64xf32>
    %261 = tpu.matmul %258, %260, %cst_165 {dimension_numbers = #tpu.dot_dimension_numbers<[1], [0], [0], [1], [0, 0, 1, 1], [], []>} : vector<16x8xbf16>, vector<8x64xbf16>, vector<16x64xf32> -> vector<16x64xf32>
    %262 = arith.addf %250, %261 : vector<16x64xf32>
    %c2_i32_166 = arith.constant 2 : i32
    %263 = arith.addi %arg1, %c2_i32_166 : i32
    %c0_167 = arith.constant 0 : index
    %264 = arith.index_cast %263 : i32 to index
    %c4_168 = arith.constant 4 : index
    %c0_169 = arith.constant 0 : index
    %265 = vector.load %arg2[%c0_167, %264, %c4_168, %c0_169] : memref<1x6x26x8xf32, #tpu.memory_space<vmem>>, vector<1x1x16x8xf32>
    %266 = vector.shape_cast %265 : vector<1x1x16x8xf32> to vector<1x16x8xf32>
    %267 = vector.shape_cast %266 : vector<1x16x8xf32> to vector<16x8xf32>
    %cst_170 = arith.constant 0.000000e+00 : f32
    %268 = vector.broadcast %cst_170 : f32 to vector<16x8xf32>
    %269 = arith.select %18, %267, %268 : vector<16x8xi1>, vector<16x8xf32>
    %270 = arith.truncf %269 : vector<16x8xf32> to vector<16x8xbf16>
    %c21 = arith.constant 21 : index
    %c0_171 = arith.constant 0 : index
    %c0_172 = arith.constant 0 : index
    %271 = vector.load %arg3[%c21, %c0_171, %c0_172] : memref<27x8x64xbf16, #tpu.memory_space<vmem>>, vector<1x8x64xbf16>
    %272 = vector.shape_cast %271 : vector<1x8x64xbf16> to vector<8x64xbf16>
    %cst_173 = arith.constant dense<0.000000e+00> : vector<16x64xf32>
    %273 = tpu.matmul %270, %272, %cst_173 {dimension_numbers = #tpu.dot_dimension_numbers<[1], [0], [0], [1], [0, 0, 1, 1], [], []>} : vector<16x8xbf16>, vector<8x64xbf16>, vector<16x64xf32> -> vector<16x64xf32>
    %274 = arith.addf %262, %273 : vector<16x64xf32>
    %c2_i32_174 = arith.constant 2 : i32
    %275 = arith.addi %arg1, %c2_i32_174 : i32
    %c0_175 = arith.constant 0 : index
    %276 = arith.index_cast %275 : i32 to index
    %c5_176 = arith.constant 5 : index
    %c0_177 = arith.constant 0 : index
    %277 = vector.load %arg2[%c0_175, %276, %c5_176, %c0_177] : memref<1x6x26x8xf32, #tpu.memory_space<vmem>>, vector<1x1x16x8xf32>
    %278 = vector.shape_cast %277 : vector<1x1x16x8xf32> to vector<1x16x8xf32>
    %279 = vector.shape_cast %278 : vector<1x16x8xf32> to vector<16x8xf32>
    %280 = arith.truncf %279 : vector<16x8xf32> to vector<16x8xbf16>
    %c22 = arith.constant 22 : index
    %c0_178 = arith.constant 0 : index
    %c0_179 = arith.constant 0 : index
    %281 = vector.load %arg3[%c22, %c0_178, %c0_179] : memref<27x8x64xbf16, #tpu.memory_space<vmem>>, vector<1x8x64xbf16>
    %282 = vector.shape_cast %281 : vector<1x8x64xbf16> to vector<8x64xbf16>
    %cst_180 = arith.constant dense<0.000000e+00> : vector<16x64xf32>
    %283 = tpu.matmul %280, %282, %cst_180 {dimension_numbers = #tpu.dot_dimension_numbers<[1], [0], [0], [1], [0, 0, 1, 1], [], []>} : vector<16x8xbf16>, vector<8x64xbf16>, vector<16x64xf32> -> vector<16x64xf32>
    %284 = arith.addf %274, %283 : vector<16x64xf32>
    %c2_i32_181 = arith.constant 2 : i32
    %285 = arith.addi %arg1, %c2_i32_181 : i32
    %c0_182 = arith.constant 0 : index
    %286 = arith.index_cast %285 : i32 to index
    %c6_183 = arith.constant 6 : index
    %c0_184 = arith.constant 0 : index
    %287 = vector.load %arg2[%c0_182, %286, %c6_183, %c0_184] : memref<1x6x26x8xf32, #tpu.memory_space<vmem>>, vector<1x1x16x8xf32>
    %288 = vector.shape_cast %287 : vector<1x1x16x8xf32> to vector<1x16x8xf32>
    %289 = vector.shape_cast %288 : vector<1x16x8xf32> to vector<16x8xf32>
    %cst_185 = arith.constant 0.000000e+00 : f32
    %290 = vector.broadcast %cst_185 : f32 to vector<16x8xf32>
    %291 = arith.select %20, %289, %290 : vector<16x8xi1>, vector<16x8xf32>
    %292 = arith.truncf %291 : vector<16x8xf32> to vector<16x8xbf16>
    %c23 = arith.constant 23 : index
    %c0_186 = arith.constant 0 : index
    %c0_187 = arith.constant 0 : index
    %293 = vector.load %arg3[%c23, %c0_186, %c0_187] : memref<27x8x64xbf16, #tpu.memory_space<vmem>>, vector<1x8x64xbf16>
    %294 = vector.shape_cast %293 : vector<1x8x64xbf16> to vector<8x64xbf16>
    %cst_188 = arith.constant dense<0.000000e+00> : vector<16x64xf32>
    %295 = tpu.matmul %292, %294, %cst_188 {dimension_numbers = #tpu.dot_dimension_numbers<[1], [0], [0], [1], [0, 0, 1, 1], [], []>} : vector<16x8xbf16>, vector<8x64xbf16>, vector<16x64xf32> -> vector<16x64xf32>
    %296 = arith.addf %284, %295 : vector<16x64xf32>
    %c2_i32_189 = arith.constant 2 : i32
    %297 = arith.addi %arg1, %c2_i32_189 : i32
    %c0_190 = arith.constant 0 : index
    %298 = arith.index_cast %297 : i32 to index
    %c8_191 = arith.constant 8 : index
    %c0_192 = arith.constant 0 : index
    %299 = vector.load %arg2[%c0_190, %298, %c8_191, %c0_192] : memref<1x6x26x8xf32, #tpu.memory_space<vmem>>, vector<1x1x16x8xf32>
    %300 = vector.shape_cast %299 : vector<1x1x16x8xf32> to vector<1x16x8xf32>
    %301 = vector.shape_cast %300 : vector<1x16x8xf32> to vector<16x8xf32>
    %cst_193 = arith.constant 0.000000e+00 : f32
    %302 = vector.broadcast %cst_193 : f32 to vector<16x8xf32>
    %303 = arith.select %18, %301, %302 : vector<16x8xi1>, vector<16x8xf32>
    %304 = arith.truncf %303 : vector<16x8xf32> to vector<16x8xbf16>
    %c24 = arith.constant 24 : index
    %c0_194 = arith.constant 0 : index
    %c0_195 = arith.constant 0 : index
    %305 = vector.load %arg3[%c24, %c0_194, %c0_195] : memref<27x8x64xbf16, #tpu.memory_space<vmem>>, vector<1x8x64xbf16>
    %306 = vector.shape_cast %305 : vector<1x8x64xbf16> to vector<8x64xbf16>
    %cst_196 = arith.constant dense<0.000000e+00> : vector<16x64xf32>
    %307 = tpu.matmul %304, %306, %cst_196 {dimension_numbers = #tpu.dot_dimension_numbers<[1], [0], [0], [1], [0, 0, 1, 1], [], []>} : vector<16x8xbf16>, vector<8x64xbf16>, vector<16x64xf32> -> vector<16x64xf32>
    %308 = arith.addf %296, %307 : vector<16x64xf32>
    %c2_i32_197 = arith.constant 2 : i32
    %309 = arith.addi %arg1, %c2_i32_197 : i32
    %c0_198 = arith.constant 0 : index
    %310 = arith.index_cast %309 : i32 to index
    %c9_199 = arith.constant 9 : index
    %c0_200 = arith.constant 0 : index
    %311 = vector.load %arg2[%c0_198, %310, %c9_199, %c0_200] : memref<1x6x26x8xf32, #tpu.memory_space<vmem>>, vector<1x1x16x8xf32>
    %312 = vector.shape_cast %311 : vector<1x1x16x8xf32> to vector<1x16x8xf32>
    %313 = vector.shape_cast %312 : vector<1x16x8xf32> to vector<16x8xf32>
    %314 = arith.truncf %313 : vector<16x8xf32> to vector<16x8xbf16>
    %c25 = arith.constant 25 : index
    %c0_201 = arith.constant 0 : index
    %c0_202 = arith.constant 0 : index
    %315 = vector.load %arg3[%c25, %c0_201, %c0_202] : memref<27x8x64xbf16, #tpu.memory_space<vmem>>, vector<1x8x64xbf16>
    %316 = vector.shape_cast %315 : vector<1x8x64xbf16> to vector<8x64xbf16>
    %cst_203 = arith.constant dense<0.000000e+00> : vector<16x64xf32>
    %317 = tpu.matmul %314, %316, %cst_203 {dimension_numbers = #tpu.dot_dimension_numbers<[1], [0], [0], [1], [0, 0, 1, 1], [], []>} : vector<16x8xbf16>, vector<8x64xbf16>, vector<16x64xf32> -> vector<16x64xf32>
    %318 = arith.addf %308, %317 : vector<16x64xf32>
    %c2_i32_204 = arith.constant 2 : i32
    %319 = arith.addi %arg1, %c2_i32_204 : i32
    %c0_205 = arith.constant 0 : index
    %320 = arith.index_cast %319 : i32 to index
    %c10_206 = arith.constant 10 : index
    %c0_207 = arith.constant 0 : index
    %321 = vector.load %arg2[%c0_205, %320, %c10_206, %c0_207] : memref<1x6x26x8xf32, #tpu.memory_space<vmem>>, vector<1x1x16x8xf32>
    %322 = vector.shape_cast %321 : vector<1x1x16x8xf32> to vector<1x16x8xf32>
    %323 = vector.shape_cast %322 : vector<1x16x8xf32> to vector<16x8xf32>
    %cst_208 = arith.constant 0.000000e+00 : f32
    %324 = vector.broadcast %cst_208 : f32 to vector<16x8xf32>
    %325 = arith.select %20, %323, %324 : vector<16x8xi1>, vector<16x8xf32>
    %326 = arith.truncf %325 : vector<16x8xf32> to vector<16x8xbf16>
    %c26 = arith.constant 26 : index
    %c0_209 = arith.constant 0 : index
    %c0_210 = arith.constant 0 : index
    %327 = vector.load %arg3[%c26, %c0_209, %c0_210] : memref<27x8x64xbf16, #tpu.memory_space<vmem>>, vector<1x8x64xbf16>
    %328 = vector.shape_cast %327 : vector<1x8x64xbf16> to vector<8x64xbf16>
    %cst_211 = arith.constant dense<0.000000e+00> : vector<16x64xf32>
    %329 = tpu.matmul %326, %328, %cst_211 {dimension_numbers = #tpu.dot_dimension_numbers<[1], [0], [0], [1], [0, 0, 1, 1], [], []>} : vector<16x8xbf16>, vector<8x64xbf16>, vector<16x64xf32> -> vector<16x64xf32>
    %330 = arith.addf %318, %329 : vector<16x64xf32>
    %cst_212 = arith.constant 0.000000e+00 : f32
    %331 = vector.broadcast %cst_212 : f32 to vector<16x64xf32>
    %332 = arith.maximumf %330, %331 : vector<16x64xf32>
    %333 = arith.truncf %332 : vector<16x64xf32> to vector<16x64xbf16>
    %c0_213 = arith.constant 0 : index
    %c0_214 = arith.constant 0 : index
    %334 = vector.load %arg5[%c0_213, %c0_214] : memref<64x8xbf16, #tpu.memory_space<vmem>>, vector<64x8xbf16>
    %cst_215 = arith.constant dense<0.000000e+00> : vector<16x8xf32>
    %335 = tpu.matmul %333, %334, %cst_215 {dimension_numbers = #tpu.dot_dimension_numbers<[1], [0], [0], [1], [0, 0, 1, 1], [], []>} : vector<16x64xbf16>, vector<64x8xbf16>, vector<16x8xf32> -> vector<16x8xf32>
    %c0_216 = arith.constant 0 : index
    %c0_217 = arith.constant 0 : index
    %336 = vector.load %arg6[%c0_216, %c0_217] : memref<1x8xf32, #tpu.memory_space<vmem>>, vector<1x8xf32>
    %337 = vector.broadcast %336 : vector<1x8xf32> to vector<16x8xf32>
    %338 = arith.addf %335, %337 : vector<16x8xf32>
    %c0_218 = arith.constant 0 : index
    %c0_219 = arith.constant 0 : index
    %c0_220 = arith.constant 0 : index
    %c0_221 = arith.constant 0 : index
    %339 = vector.load %arg7[%c0_218, %c0_219, %c0_220, %c0_221] : memref<1x1x16x8xf32, #tpu.memory_space<vmem>>, vector<1x1x16x8xf32>
    %340 = vector.shape_cast %339 : vector<1x1x16x8xf32> to vector<16x8xf32>
    %341 = vector.shape_cast %338 : vector<16x8xf32> to vector<1x1x16x8xf32>
    tpu.vector_store %arg7[%c0_218, %c0_219, %c0_220, %c0_221], %341 {strides = array<i32>} : memref<1x1x16x8xf32, #tpu.memory_space<vmem>>, vector<1x1x16x8xf32>,
    return
  }
  func.func @transform_0(%arg0: i32, %arg1: i32) -> (i32, i32, i32, i32) {
    %c0_i32 = arith.constant 0 : i32
    %c0_i32_0 = arith.constant 0 : i32
    %c0_i32_1 = arith.constant 0 : i32
    %c0_i32_2 = arith.constant 0 : i32
    return %arg0, %c0_i32, %c0_i32_0, %c0_i32_1 : i32, i32, i32, i32
  }
  func.func @transform_1(%arg0: i32, %arg1: i32) -> (i32, i32, i32) {
    %c0_i32 = arith.constant 0 : i32
    %c0_i32_0 = arith.constant 0 : i32
    %c0_i32_1 = arith.constant 0 : i32
    %c0_i32_2 = arith.constant 0 : i32
    return %c0_i32, %c0_i32_0, %c0_i32_1 : i32, i32, i32
  }
  func.func @transform_2(%arg0: i32, %arg1: i32) -> (i32, i32) {
    %c0_i32 = arith.constant 0 : i32
    %c0_i32_0 = arith.constant 0 : i32
    %c0_i32_1 = arith.constant 0 : i32
    return %c0_i32, %c0_i32_0 : i32, i32
  }
  func.func @transform_3(%arg0: i32, %arg1: i32) -> (i32, i32) {
    %c0_i32 = arith.constant 0 : i32
    %c0_i32_0 = arith.constant 0 : i32
    %c0_i32_1 = arith.constant 0 : i32
    return %c0_i32, %c0_i32_0 : i32, i32
  }
  func.func @transform_4(%arg0: i32, %arg1: i32) -> (i32, i32) {
    %c0_i32 = arith.constant 0 : i32
    %c0_i32_0 = arith.constant 0 : i32
    %c0_i32_1 = arith.constant 0 : i32
    return %c0_i32, %c0_i32_0 : i32, i32
  }
  func.func @transform_5(%arg0: i32, %arg1: i32) -> (i32, i32, i32, i32) {
    %c0_i32 = arith.constant 0 : i32
    %c0_i32_0 = arith.constant 0 : i32
    %c0_i32_1 = arith.constant 0 : i32
    return %arg0, %arg1, %c0_i32, %c0_i32_0 : i32, i32, i32, i32
  }
}

</mosaic_0001>

<bundles_post_ra>
// kernel: _lambda_.10
= control target key start
LH: loop header
LB: loop body
LE: loop exit
PB: predicated region body
PF: predicated region fallthrough
CT: control target
= control target key end

     0   :  { %s481_s18 = smov 0   ;;  %s529_s0 = inlined_call_operand.vmem [shape: f32[16,64], index: 0, kind: input, shape index: {}]   ;;  %s530_s1 = inlined_call_operand.vmem [shape: f32[1,64], index: 1, kind: input, shape index: {}]   ;;  %s531_s2 = inlined_call_operand.vmem [shape: f32[1,64], index: 2, kind: input, shape index: {}]   ;;  %s532_s3 = inlined_call_operand.vmem [shape: bf16[64,8], index: 3, kind: input, shape index: {}]   ;;  %s533_s4 = inlined_call_operand.vmem [shape: f32[1,8], index: 4, kind: input, shape index: {}]   ;;  %s534_s5 = inlined_call_operand.vmem [shape: f32[16,8], index: 5, kind: output, shape index: {}]  }
   0x1 LB: > { %s391_s19 = sadd.s32 4294967295, %s447_s18   ;;  %p395_p0 = scmp.ge.s32.totalorder %s447_s18, 1  ;;  %s447_s18 = sphi %s481_s18, %s15_s18  }
   0x2   : > { %p186_p1 = scmp.lt.s32.totalorder %s447_s18, 3 }
   0x4   : > { %p187_p2 = pnand %p395_p0, %p186_p1 }
   0x5   : > { %p212_p3 = scmp.lt.s32.totalorder (!%p187_p2), %s391_s19, 1  ;;  %vm224_vm0 = vcmask (!%p187_p2), 523264   ;;  %v435_v7 = vld [vmem:[%s532_s3] sm:$0xff] (!%p187_p2)   ;;  %v449_v8 = vmov (!%p187_p2), 0.0   ;;  %v436_v9 = vld [vmem:[%s532_s3 + $0x8] sm:$0xff] (!%p187_p2)   ;;  %v437_v10 = vld [vmem:[%s532_s3 + $0x10] sm:$0xff] (!%p187_p2)  }
   0x6   : > { %190 = sbr.rel (%p187_p2) target bundleno = 547 (0x223), region = 40  ;;  %413 = vmatprep.subr.bf16.mxu0 (!%p187_p2), %v449_v8  ;;  %v438_v11 = vld [vmem:[%s532_s3 + $0x18] sm:$0xff] (!%p187_p2)   ;;  %vm450_vm1 = vmmov (!%p187_p2), 0   ;;  %v398_v16 = vld [vmem:[%s530_s1] ss:$0 sm:$0xff] (!%p187_p2)  ;;  %vm336_vm2 = vcmask (!%p187_p2), 64512  }
   0x7   : > { %414 = vmatpush3.bf16.msra.mxu0 (!%p187_p2), %v435_v7  ;;  %421 = vmatprep.mubr.msk.bf16.mxu0 (!%p187_p2), %vm450_vm1, %v449_v8  ;;  %v399_v18 = vld [vmem:[%s531_s2] ss:$0 sm:$0xff] (!%p187_p2) }
   0x8   : > { %415 = vmatprep.subr.bf16.mxu0 (!%p187_p2), %v449_v8  ;;  %v400_v22 = vld [vmem:[%s533_s4] ss:$0 sm:$0xff] (!%p187_p2) }
   0xb   : > { %416 = vmatpush3.bf16.msra.mxu0 (!%p187_p2), %v436_v9 }
   0xc   : > { %417 = vmatprep.subr.bf16.mxu0 (!%p187_p2), %v449_v8 }
   0xd   : > { %s536_s19 = smov (!%p212_p3, %s391_s19), 1 }
   0xe   : > { %s396_s20 = sshll.u32 %s536_s19, 3 }
   0xf   : > { %s215_s23 = scalar_lea.vmem %s529_s0, %s396_s20  ;;  %418 = vmatpush3.bf16.msra.mxu0 %v437_v10  ;;  %s219_s15 = scalar_lea.vmem %s534_s5, %s396_s20 }
  0x10   : > { %v221_v0 = vld [vmem:[%s215_s23] sm:$0xff]  ;;  %419 = vmatprep.subr.bf16.mxu0 %v449_v8 }
  0x11   : > { %v225_v1 = vsel %vm224_vm0, %v221_v0, 0.0 }
  0x12   : > { %226 = vadd.xlane.f32.xlu0 %v225_v1 }
  0x13   : > { %420 = vmatpush3.bf16.msra.mxu0 %v438_v11 }
  0x9f   : > { %v227_v2 = vpop.xlane.xlu0 %226 }
  0xa0   : > { %v229_v3 = vmul.f32 0.015625, %v227_v2 }
  0xa2   : > { %v230_v4 = vsub.f32 %v221_v0, %v229_v3 }
  0xa4   : > { %v231_v5 = vmul.f32 %v230_v4, %v230_v4 }
  0xa6   : > { %v232_v6 = vsel %vm224_vm0, %v231_v5, 0.0 }
  0xa7   : > { %233 = vadd.xlane.f32.xlu0 %v232_v6 }
 0x134   : > { %v234_v12 = vpop.xlane.xlu0 %233 }
 0x135   : > { %v235_v13 = vmul.f32 0.015625, %v234_v12 }
 0x137   : > { %v236_v14 = vadd.f32 1e-05, %v235_v13 }
 0x139   : > { %439 = vrsqrt.f32 %v236_v14 }
 0x143   : > { %v440_v15 = vpop.eup %439 }
 0x144   : > { %v238_v17 = vmul.f32 %v440_v15, %v230_v4 }
 0x146   : > { %v245_v19 = vmul.f32 %v398_v16, %v238_v17 }
 0x148   : > { %v252_v20 = vadd.f32 %v399_v18, %v245_v19 }
 0x14a   : > { %v253_v21 = vpack.c.bf16 %v252_v20, %v252_v20 }
 0x14c   : > { %422 = vmatmul.mubr.msk.bf16.vlgmr.msra.gmra.mrb[0].mxu0 %vm224_vm0, %v253_v21 }
 0x21f   : > { %v330_v23 = vpop.f32.mrb[0].mxu0 }
 0x220   : > { %v331_v24 = vadd.f32 %v400_v22, %v330_v23  ;;  %v423_v25 = vpop.f32.mrb[1].mxu0 }
 0x221   : > { %v333_v26 = vpop.f32.mrb[2].mxu0 }
 0x222   : > { %337 = vst.msk [vmem:[%s219_s15] sm:$0xff] %vm336_vm2, %v331_v24  ;;  %v424_v27 = vpop.f32.mrb[3].mxu0 }
 0x223 PF: > { %s15_s18 = sadd.s32 1, %s447_s18  }
 0x224   : > { %p12_p4 = scmp.ge.s32.totalorder %s15_s18, 4  }
 0x226   :  { %14 = sbr.rel (!%p12_p4) target bundleno = 1 (0x1), region = 70 }

// kernel: _lambda_.9
= control target key start
LH: loop header
LB: loop body
LE: loop exit
PB: predicated region body
PF: predicated region fallthrough
CT: control target
= control target key end

     0   :  { %s854_s24 = smov 0   ;;  %s971_s0 = inlined_call_operand.vmem [shape: f32[16,64], index: 0, kind: input, shape index: {}]   ;;  %s972_s1 = inlined_call_operand.vmem [shape: f32[1,64], index: 1, kind: input, shape index: {}]   ;;  %s973_s2 = inlined_call_operand.vmem [shape: f32[1,64], index: 2, kind: input, shape index: {}]   ;;  %s974_s3 = inlined_call_operand.vmem [shape: bf16[64,256], index: 3, kind: input, shape index: {}]   ;;  %s975_s4 = inlined_call_operand.vmem [shape: f32[1,256], index: 4, kind: input, shape index: {}]   ;;  %s976_s5 = inlined_call_operand.vmem [shape: bf16[256,64], index: 5, kind: input, shape index: {}]   ;;  %s977_s6 = inlined_call_operand.vmem [shape: f32[1,64], index: 6, kind: input, shape index: {}]   ;;  %s978_s7 = inlined_call_operand.vmem [shape: f32[16,64], index: 7, kind: output, shape index: {}]  }
   0x1 LB: > { %s699_s25 = sadd.s32 4294967295, %s811_s24   ;;  %p703_p0 = scmp.ge.s32.totalorder %s811_s24, 1  ;;  %s811_s24 = sphi %s854_s24, %s17_s24  }
   0x2   : > { %p236_p1 = scmp.lt.s32.totalorder %s811_s24, 3 }
   0x4   : > { %p237_p2 = pnand %p703_p0, %p236_p1 }
   0x5   : > { %p266_p3 = scmp.lt.s32.totalorder (!%p237_p2), %s699_s25, 1  ;;  %vm278_vm0 = vcmask (!%p237_p2), 523264   ;;  %v767_v7 = vld [vmem:[%s974_s3 + $0x4] ss:$8 sps:$4 sm:$0xff] (!%p237_p2)   ;;  %v769_v8 = vld [vmem:[%s974_s3] ss:$8 sps:$4 sm:$0xff] (!%p237_p2)   ;;  %v318_v42 = vlaneseq (!%p237_p2) }
   0x6   : > { %240 = sbr.rel (%p237_p2) target bundleno = 818 (0x332), region = 48  ;;  %371 = vmatprep.subr.bf16.mxu0 (!%p237_p2), %v767_v7  ;;  %v770_v9 = vld [vmem:[%s974_s3 + $0x14] ss:$8 sps:$4 sm:$0xff] (!%p237_p2)   ;;  %v772_v10 = vld [vmem:[%s974_s3 + $0x10] ss:$8 sps:$4 sm:$0xff] (!%p237_p2)   ;;  %v813_v15 = vmov (!%p237_p2), 0  }
   0x7   : > { %372 = vmatpush1.bf16.msra.mxu0 (!%p237_p2), %v769_v8  ;;  %v773_v11 = vld [vmem:[%s974_s3 + $0x24] ss:$8 sps:$4 sm:$0xff] (!%p237_p2)   ;;  %v775_v12 = vld [vmem:[%s974_s3 + $0x20] ss:$8 sps:$4 sm:$0xff] (!%p237_p2)   ;;  %v776_v13 = vld [vmem:[%s974_s3 + $0x34] ss:$8 sps:$4 sm:$0xff] (!%p237_p2)   ;;  %403 = vmatprep.mubr.bf16.mxu0 (!%p237_p2), %v813_v15 }
   0x8   : > { %373 = vmatprep.subr.bf16.mxu0 (!%p237_p2), %v770_v9  ;;  %v778_v14 = vld [vmem:[%s974_s3 + $0x30] ss:$8 sps:$4 sm:$0xff] (!%p237_p2)   ;;  %v706_v20 = vld [vmem:[%s972_s1] ss:$0 sm:$0xff] (!%p237_p2)  ;;  %v781_v28 = vld [vmem:[%s976_s5 + $0x48] sm:$0xff] (!%p237_p2)   ;;  %v319_v43 = vshrl.u32 (!%p237_p2), %v318_v42, 7 }
   0x9   : > { %v707_v22 = vld [vmem:[%s973_s2] ss:$0 sm:$0xff] (!%p237_p2)  ;;  %v782_v29 = vld [vmem:[%s976_s5 + $0x8] sm:$0xff] (!%p237_p2)   ;;  %v783_v30 = vld [vmem:[%s976_s5 + $0x50] sm:$0xff] (!%p237_p2)  }
   0xa   : > { %v779_v26 = vld [vmem:[%s976_s5 + $0x40] sm:$0xff] (!%p237_p2)   ;;  %v784_v31 = vld [vmem:[%s976_s5 + $0x10] sm:$0xff] (!%p237_p2)   ;;  %v785_v32 = vld [vmem:[%s976_s5 + $0x58] sm:$0xff] (!%p237_p2)   ;;  %v320_v44 = vsub.s32 (!%p237_p2), 0, %v319_v43  ;;  %v324_v46 = vsub.s32 (!%p237_p2), 1, %v319_v43 }
   0xb   : > { %374 = vmatpush1.bf16.msra.mxu0 (!%p237_p2), %v772_v10  ;;  %v780_v27 = vld [vmem:[%s976_s5] sm:$0xff] (!%p237_p2)   ;;  %736 = vmatprep.subr.bf16.mxu1 (!%p237_p2), %v779_v26  ;;  %v786_v33 = vld [vmem:[%s976_s5 + $0x18] sm:$0xff] (!%p237_p2)   ;;  %v789_v36 = vld [vmem:[%s976_s5 + $0x68] sm:$0xff] (!%p237_p2)  }
   0xc   : > { %375 = vmatprep.subr.bf16.mxu0 (!%p237_p2), %v773_v11  ;;  %737 = vmatpush3.bf16.msra.mxu1 (!%p237_p2), %v780_v27  ;;  %v787_v34 = vld [vmem:[%s976_s5 + $0x60] sm:$0xff] (!%p237_p2)   ;;  %v790_v37 = vld [vmem:[%s976_s5 + $0x28] sm:$0xff] (!%p237_p2)   ;;  %v791_v38 = vld [vmem:[%s976_s5 + $0x70] sm:$0xff] (!%p237_p2)  }
   0xd   : > { %s980_s25 = smov (!%p266_p3, %s699_s25), 1  ;;  %738 = vmatprep.subr.bf16.mxu1 %v781_v28  ;;  %v788_v35 = vld [vmem:[%s976_s5 + $0x20] sm:$0xff]   ;;  %v792_v39 = vld [vmem:[%s976_s5 + $0x30] sm:$0xff]   ;;  %v793_v40 = vld [vmem:[%s976_s5 + $0x78] sm:$0xff]  }
   0xe   : > { %s704_s26 = sshll.u32 %s980_s25, 3  ;;  %v794_v41 = vld [vmem:[%s976_s5 + $0x38] sm:$0xff]   ;;  %v316_v45 = vld [vmem:[%s975_s4] sm:$0x3] }
   0xf   : > { %s269_s29 = scalar_lea.vmem %s971_s0, %s704_s26  ;;  %376 = vmatpush1.bf16.msra.mxu0 %v775_v12  ;;  %v321_v47 = vrot.slane %v316_v45, %v320_v44  ;;  %v325_v48 = vrot.slane %v316_v45, %v324_v46  ;;  %s273_s28 = scalar_lea.vmem %s978_s7, %s704_s26 }
  0x10   : > { %v870_v0 = vld [vmem:[%s269_s29] sm:$0xff]  ;;  %377 = vmatprep.subr.bf16.mxu0 %v776_v13  ;;  %739 = vmatpush3.bf16.msra.mxu1 %v782_v29 }
  0x11   : > { %v279_v1 = vsel %vm278_vm0, %v870_v0, 0.0  ;;  %740 = vmatprep.subr.bf16.mxu1 %v783_v30 }
  0x12   : > { %280 = vadd.xlane.f32.xlu0 %v279_v1 }
  0x13   : > { %378 = vmatpush1.bf16.msra.mxu0 %v778_v14 }
  0x14   : > { %741 = vmatpush3.bf16.msra.mxu1 %v784_v31 }
  0x15   : > { %742 = vmatprep.subr.bf16.mxu1 %v785_v32 }
  0x18   : > { %743 = vmatpush3.bf16.msra.mxu1 %v786_v33 }
  0x19   : > { %744 = vmatprep.subr.bf16.mxu1 %v787_v34 }
  0x1c   : > { %745 = vmatpush3.bf16.msra.mxu1 %v788_v35 }
  0x1d   : > { %746 = vmatprep.subr.bf16.mxu1 %v789_v36 }
  0x20   : > { %747 = vmatpush3.bf16.msra.mxu1 %v790_v37 }
  0x21   : > { %748 = vmatprep.subr.bf16.mxu1 %v791_v38 }
  0x24   : > { %749 = vmatpush3.bf16.msra.mxu1 %v792_v39 }
  0x25   : > { %750 = vmatprep.subr.bf16.mxu1 %v793_v40 }
  0x28   : > { %751 = vmatpush3.bf16.msra.mxu1 %v794_v41 }
  0x9f   : > { %v281_v2 = vpop.xlane.xlu0 %280 }
  0xa0   : > { %v283_v3 = vmul.f32 0.015625, %v281_v2 }
  0xa2   : > { %v284_v4 = vsub.f32 %v870_v0, %v283_v3 }
  0xa4   : > { %v285_v5 = vmul.f32 %v284_v4, %v284_v4 }
  0xa6   : > { %v286_v6 = vsel %vm278_vm0, %v285_v5, 0.0 }
  0xa7   : > { %287 = vadd.xlane.f32.xlu0 %v286_v6 }
 0x134   : > { %v288_v16 = vpop.xlane.xlu0 %287 }
 0x135   : > { %v289_v17 = vmul.f32 0.015625, %v288_v16 }
 0x137   : > { %v290_v18 = vadd.f32 1e-05, %v289_v17 }
 0x139   : > { %795 = vrsqrt.f32 %v290_v18 }
 0x143   : > { %v796_v19 = vpop.eup %795 }
 0x144   : > { %v292_v21 = vmul.f32 %v796_v19, %v284_v4 }
 0x146   : > { %v299_v23 = vmul.f32 %v706_v20, %v292_v21 }
 0x148   : > { %v306_v24 = vadd.f32 %v707_v22, %v299_v23 }
 0x14a   : > { %v307_v25 = vpack.c.bf16 %v306_v24, %v306_v24 }
 0x14c   : > { %716 = vmatmul.mubr.msk.bf16.vlgmr.msra.gmra.mrb[0].mxu0 %vm278_vm0, %v307_v25 }
 0x21f   : > { %v405_v49 = vpop.f32.mrb[0].mxu0 }
 0x220   : > { %v406_v50 = vadd.f32 %v405_v49, %v321_v47  ;;  %v407_v51 = vpop.f32.mrb[1].mxu0 }
 0x221   : > { %v408_v52 = vadd.f32 %v407_v51, %v325_v48  ;;  %v409_v53 = vpop.f32.mrb[2].mxu0  ;;  %v733_v48 = vld [vmem:[%s977_s6] ss:$0 sm:$0xff] }
 0x222   : > { %v414_v54 = vmul.f32 0.70710677, %v406_v50  ;;  %v410_v55 = vpop.f32.mrb[3].mxu0  ;;  %v412_v35 = vmul.f32 0.5, %v406_v50 }
 0x223   : > { %v415_v56 = vmul.f32 0.70710677, %v408_v52  ;;  %v413_v38 = vmul.f32 0.5, %v408_v52 }
 0x224   : > { %v416_v57 = vand.u32 2147483647, %v414_v54  ;;  %vm456_vm1 = vcmp.ge.f32.partialorder %v414_v54, 0.0 }
 0x225   : > { %v417_v58 = vand.u32 2147483647, %v415_v56  ;;  %vm457_vm2 = vcmp.ge.f32.partialorder %v415_v56, 0.0 }
 0x226   : > { %v418_v59 = vmul.f32 0.3275911, %v416_v57  ;;  %v444_v63 = vsub.f32 0.0, %v416_v57 }
 0x227   : > { %v419_v60 = vmul.f32 0.3275911, %v417_v58  ;;  %v445_v1 = vsub.f32 0.0, %v417_v58 }
 0x228   : > { %v420_v61 = vadd.f32 1.0, %v418_v59  ;;  %v446_v3 = vmul.f32 %v444_v63, %v416_v57 }
 0x229   : > { %v421_v62 = vadd.f32 1.0, %v419_v60  ;;  %v447_v5 = vmul.f32 %v445_v1, %v417_v58 }
 0x22a   : > { %797 = vrcp.f32 %v420_v61  ;;  %v448_v9 = vmul.f32 1.442695, %v446_v3 }
 0x22b   : > { %799 = vrcp.f32 %v421_v62  ;;  %v450_v11 = vmul.f32 1.442695, %v447_v5 }
 0x22c   : > { %801 = vpow2.f32 %v448_v9 }
 0x22d   : > { %803 = vpow2.f32 %v450_v11 }
 0x234   : > { %v798_v2 = vpop.eup %797 }
 0x235   : > { %v800_v4 = vpop.eup %799  ;;  %v426_v6 = vmul.f32 1.0614054, %v798_v2 }
 0x236   : > { %v427_v7 = vmul.f32 1.0614054, %v800_v4  ;;  %v802_v25 = vpop.eup %801 }
 0x237   : > { %v428_v8 = vadd.f32 -1.4531521, %v426_v6  ;;  %v804_v27 = vpop.eup %803 }
 0x238   : > { %v429_v10 = vadd.f32 -1.4531521, %v427_v7 }
 0x239   : > { %v430_v12 = vmul.f32 %v798_v2, %v428_v8 }
 0x23a   : > { %v431_v13 = vmul.f32 %v800_v4, %v429_v10 }
 0x23b   : > { %v432_v14 = vadd.f32 1.4214138, %v430_v12 }
 0x23c   : > { %v433_v15 = vadd.f32 1.4214138, %v431_v13 }
 0x23d   : > { %v434_v16 = vmul.f32 %v798_v2, %v432_v14 }
 0x23e   : > { %v435_v17 = vmul.f32 %v800_v4, %v433_v15 }
 0x23f   : > { %v436_v18 = vadd.f32 -0.28449672, %v434_v16 }
 0x240   : > { %v437_v19 = vadd.f32 -0.28449672, %v435_v17 }
 0x241   : > { %v438_v20 = vmul.f32 %v798_v2, %v436_v18 }
 0x242   : > { %v439_v21 = vmul.f32 %v800_v4, %v437_v19 }
 0x243   : > { %v440_v22 = vadd.f32 0.2548296, %v438_v20 }
 0x244   : > { %v441_v23 = vadd.f32 0.2548296, %v439_v21 }
 0x245   : > { %v442_v24 = vmul.f32 %v798_v2, %v440_v22 }
 0x246   : > { %v443_v26 = vmul.f32 %v800_v4, %v441_v23 }
 0x247   : > { %v452_v28 = vmul.f32 %v802_v25, %v442_v24 }
 0x248   : > { %v453_v29 = vmul.f32 %v804_v27, %v443_v26 }
 0x249   : > { %v454_v30 = vsub.f32 1.0, %v452_v28 }
 0x24a   : > { %v455_v31 = vsub.f32 1.0, %v453_v29 }
 0x24b   : > { %v458_v32 = vsub.f32 0.0, %v454_v30 }
 0x24c   : > { %v459_v33 = vsub.f32 0.0, %v455_v31 }
 0x24d   : > { %v460_v34 = vsel %vm456_vm1, %v454_v30, %v458_v32 }
 0x24e   : > { %v461_v36 = vsel %vm457_vm2, %v455_v31, %v459_v33  ;;  %v462_v37 = vadd.f32 1.0, %v460_v34 }
 0x24f   : > { %v463_v39 = vadd.f32 1.0, %v461_v36 }
 0x250   : > { %v464_v40 = vmul.f32 %v462_v37, %v412_v35 }
 0x251   : > { %v465_v41 = vmul.f32 %v463_v39, %v413_v38 }
 0x252   : > { %v466_v43 = vpack.c.bf16 %v464_v40, %v464_v40 }
 0x253   : > { %v467_v42 = vpack.c.bf16 %v465_v41, %v465_v41 }
 0x255   : > { %628 = vmatprep.mubr.bf16.mxu1 %v467_v42 }
 0x256   : > { %629 = vmatmul.mubr.bf16.vlgmr.msra.gmra.mrb[0].mxu1 %v466_v43 }
 0x329   : > { %v752_v44 = vpop.f32.mrb[0].mxu1 }
 0x32a   : > { %v753_v45 = vpop.f32.mrb[1].mxu1 }
 0x32b   : > { %v754_v46 = vadd.f32 %v753_v45, %v752_v44  ;;  %v755_v47 = vpop.f32.mrb[2].mxu1 }
 0x32c   : > { %v756_v49 = vpop.f32.mrb[3].mxu1 }
 0x32d   : > { %v636_v50 = vadd.f32 %v754_v46, %v870_v0 }
 0x32f   : > { %v644_v51 = vadd.f32 %v733_v48, %v636_v50 }
 0x331   : > { %645 = vst.msk [vmem:[%s273_s28] sm:$0xff] %vm278_vm0, %v644_v51 }
 0x332 PF: > { %s17_s24 = sadd.s32 1, %s811_s24  }
 0x333   : > { %p14_p4 = scmp.ge.s32.totalorder %s17_s24, 4  }
 0x335   :  { %16 = sbr.rel (!%p14_p4) target bundleno = 1 (0x1), region = 78 }

// kernel: _lambda_.7
= control target key start
LH: loop header
LB: loop body
LE: loop exit
PB: predicated region body
PF: predicated region fallthrough
CT: control target
= control target key end

     0   :  { %14 = vsyncpa [#allocation3], 0  ;;  %s1932_s29 = smov 0   ;;  %s2150_s0 = inlined_call_operand.vmem [shape: f32[16,64], index: 0, kind: input, shape index: {}, may-alias: {0,1}]   ;;  %s2151_s1 = inlined_call_operand.vmem [shape: f32[16,64], index: 1, kind: input, shape index: {}, may-alias: {0,1}]   ;;  %s2152_s2 = inlined_call_operand.vmem [shape: f32[1,64], index: 2, kind: input, shape index: {}]   ;;  %s2153_s3 = inlined_call_operand.vmem [shape: f32[1,64], index: 3, kind: input, shape index: {}]   ;;  %s2154_s4 = inlined_call_operand.vmem [shape: bf16[64,64], index: 4, kind: input, shape index: {}]   ;;  %s2155_s5 = inlined_call_operand.vmem [shape: bf16[64,64], index: 5, kind: input, shape index: {}]   ;;  %s2156_s6 = inlined_call_operand.vmem [shape: bf16[64,64], index: 6, kind: input, shape index: {}]   ;;  %s2157_s7 = inlined_call_operand.hbm [shape: bf16[64,64], index: 7, kind: input, shape index: {}]   ;;  %s2158_s8 = inlined_call_operand.vmem [shape: f32[1,64], index: 8, kind: input, shape index: {}]   ;;  %s2159_s9 = inlined_call_operand.vmem [shape: f32[16,64], index: 9, kind: output, shape index: {}]  }
   0x1 LB: > { %s1938_s30 = sadd.s32 4294967295, %s1872_s29   ;;  %p1575_p0 = scmp.ge.s32.totalorder %s1872_s29, 1  ;;  %s1872_s29 = sphi %s1932_s29, %s20_s29  }
   0x2   : > { %p250_p1 = scmp.lt.s32.totalorder %s1872_s29, 3  ;;  %s1874_s10 = smov [#allocation2]  }
   0x3   : > { %s277_s11 = sshll.u32 %s1874_s10, 4  ;;  %p2160_p3 = scmp.eq.s32.totalorder %s1938_s30, 0  ;;  %s278_s11 = int_to_ptr.vmem [resolvable:$true] %s277_s11 }
   0x4   : > { %p1942_p2 = pnand %p1575_p0, %p250_p1  ;;  %s1834_s16 = scalar_lea.hbm %s2157_s7, 512 }
   0x5   : > { %p1835_p6 = scmp.ne.s32.totalorder %s2157_s7, %s1834_s16  ;;  %p1841_p10 = scmp.lt.u32.totalorder %s1834_s16, %s2157_s7 }
   0x6   : > { %s2162_s12 = scalar_select %p1942_p2, 1, 0 }
   0x7   : > { %p1778_p4 = pneg %p1942_p2 }
   0x9   : > { %p1951_p5 = pnand %p2160_p3, %p1778_p4 }
   0xb   : > { %p1836_p7 = pneg %p1951_p5 }
   0xd   : > { %p1837_p8 = pnand %p1836_p7, %p1835_p6 }
   0xf   : > { %p1838_p9 = pneg %p1837_p8 }
  0x11   : > { %p1843_p11 = pnand %p1841_p10, %p1838_p9 }
  0x13   : > { %1846 = shalt.err (!%p1843_p11)
}
  0x14   : > { %s1847_s21 = scalar_lea.vmem %s278_s11, 512  ;;  %p1855_p1 = scmp.lt.s32.totalorder %s278_s11, %s278_s11 }
  0x15   : > { %p1848_p12 = scmp.ne.s32.totalorder %s278_s11, %s1847_s21  ;;  %p1856_p4 = scmp.lt.s32.totalorder %s1847_s21, %s1847_s21 }
  0x17   : > { %p1850_p13 = pnand %p1848_p12, %p1836_p7  ;;  %p1857_p3 = por %p1856_p4, %p1855_p1 }
  0x19   : > { %p1851_p0 = pneg %p1850_p13 }
  0x1b   : > { %p1858_p2 = pnand %p1857_p3, %p1851_p0 }
  0x1d   : > { %1861 = shalt.err (!%p1858_p2)
}
  0x1e   : > { %s1875_s22 = smov 64   ;;  %s1876_s23 = smov 4  }
  0x1f   : > { %1781 = dma.hbm_to_vmem [thread:$0]  (!%p1951_p5), %s2157_s7, 512, %s278_s11, [#allocation3], %s1875_s22, %s1875_s22, %s1876_s23  }
  0x20   : > { %p2164_p6 = scmp.ne.s32.totalorder %s2162_s12, 0 }
  0x21   : > { %p2165_p8 = scmp.eq.s32.totalorder (!%p2164_p6), %s1938_s30, 0 }
  0x22   : > { %310 = sbr.rel (%p2164_p6) target bundleno = 2187 (0x88b), region = 56 }
  0x29   : > { %1867 = dma.done.wait (%p2165_p8), [#allocation3], 512   ;;  %p2166_p7 = pmov %p2165_p8 }
  0x2a   : > { %p348_p2 = scmp.lt.s32.totalorder %s1938_s30, 1  ;;  %vm364_vm0 = vcmask 523264   ;;  %v1800_v7 = vld [vmem:[%s2154_s4] sm:$0xff]   ;;  %v1877_v9 = vmov 0.0   ;;  %v1802_v10 = vld [vmem:[%s2154_s4 + $0x8] sm:$0xff]   ;;  %vm1878_vm1 = vmmov 0  }
  0x2b   : > { %1869 = vsyncadd (%p2166_p7), [#allocation3], 4294966784  ;;  %v1801_v8 = vld [vmem:[%s2155_s5] sm:$0xff]   ;;  %1661 = vmatprep.subr.bf16.mxu0 %v1877_v9  ;;  %1673 = vmatprep.subr.bf16.mxu1 %v1877_v9  ;;  %v1803_v11 = vld [vmem:[%s2155_s5 + $0x8] sm:$0xff]   ;;  %vm621_vm2 = vcmask 130048   ;;  %s1879_s19 = smov 96  }
  0x2c   : > { %s2168_s30 = smov (!%p348_p2, %s1938_s30), 1  ;;  %1662 = vmatpush3.bf16.msra.mxu0 %v1800_v7  ;;  %1674 = vmatpush3.bf16.msra.mxu1 %v1801_v8  ;;  %v1804_v12 = vld [vmem:[%s2154_s4 + $0x10] sm:$0xff]   ;;  %v1806_v14 = vld [vmem:[%s2154_s4 + $0x18] sm:$0xff]   ;;  %v1582_v20 = vld [vmem:[%s2152_s2] ss:$0 sm:$0xff]  ;;  %s1880_s20 = smov 112  }
  0x2d   : > { %s1580_s26 = sshll.u32 %s2168_s30, 3  ;;  %1663 = vmatprep.subr.bf16.mxu0 %v1877_v9  ;;  %1675 = vmatprep.subr.bf16.mxu1 %v1877_v9  ;;  %v1805_v13 = vld [vmem:[%s2155_s5 + $0x10] sm:$0xff]   ;;  %v1807_v15 = vld [vmem:[%s2155_s5 + $0x18] sm:$0xff]   ;;  %v1583_v22 = vld [vmem:[%s2153_s3] ss:$0 sm:$0xff]  ;;  %vm699_vm3 = vcmask 64512  }
  0x2e   : > { %s351_s28 = scalar_lea.vmem %s2150_s0, %s1580_s26  ;;  %1669 = vmatprep.mubr.msk.bf16.mxu0 %vm1878_vm1, %v1877_v9  ;;  %1681 = vmatprep.mubr.msk.bf16.mxu1 %vm1878_vm1, %v1877_v9  ;;  %v1808_v25 = vld [vmem:[%s2156_s6] sm:$0xff]   ;;  %v1809_v27 = vld [vmem:[%s2156_s6 + $0x8] sm:$0xff]   ;;  %v1810_v28 = vld [vmem:[%s2156_s6 + $0x10] sm:$0xff]   ;;  %s1881_s21 = smov 80  }
  0x2f   : > { %v1987_v0 = vld [vmem:[%s351_s28] sm:$0xff]  ;;  %v1811_v29 = vld [vmem:[%s2156_s6 + $0x18] sm:$0xff]   ;;  %s359_s1 = scalar_lea.vmem %s2159_s9, %s1580_s26 }
  0x30   : > { %v365_v1 = vsel %vm364_vm0, %v1987_v0, 0.0  ;;  %1664 = vmatpush3.bf16.msra.mxu0 %v1802_v10  ;;  %1676 = vmatpush3.bf16.msra.mxu1 %v1803_v11 }
  0x31   : > { %366 = vadd.xlane.f32.xlu0 %v365_v1  ;;  %1665 = vmatprep.subr.bf16.mxu0 %v1877_v9 }
  0x32   : > { %1677 = vmatprep.subr.bf16.mxu1 %v1877_v9 }
  0x34   : > { %1666 = vmatpush3.bf16.msra.mxu0 %v1804_v12  ;;  %1678 = vmatpush3.bf16.msra.mxu1 %v1805_v13 }
  0x35   : > { %1667 = vmatprep.subr.bf16.mxu0 %v1877_v9  ;;  %1679 = vmatprep.subr.bf16.mxu1 %v1877_v9 }
  0x38   : > { %1668 = vmatpush3.bf16.msra.mxu0 %v1806_v14  ;;  %1680 = vmatpush3.bf16.msra.mxu1 %v1807_v15  ;;  %v1812_v15 = vld [vmem:[#allocation2] sm:$0xff]  }
  0x39   : > { %1685 = vmatprep.subr.bf16.mxu0 %v1877_v9  ;;  %1702 = vmatprep.subr.mxu1 %v1877_v9 }
  0xbe   : > { %v367_v2 = vpop.xlane.xlu0 %366 }
  0xbf   : > { %v369_v3 = vmul.f32 0.015625, %v367_v2 }
  0xc1   : > { %v370_v4 = vsub.f32 %v1987_v0, %v369_v3 }
  0xc3   : > { %v371_v5 = vmul.f32 %v370_v4, %v370_v4 }
  0xc5   : > { %v372_v6 = vsel %vm364_vm0, %v371_v5, 0.0 }
  0xc6   : > { %373 = vadd.xlane.f32.xlu0 %v372_v6 }
 0x153   : > { %v374_v16 = vpop.xlane.xlu0 %373 }
 0x154   : > { %v375_v17 = vmul.f32 0.015625, %v374_v16 }
 0x156   : > { %v376_v18 = vadd.f32 1e-05, %v375_v17 }
 0x158   : > { %1816 = vrsqrt.f32 %v376_v18 }
 0x162   : > { %v1817_v19 = vpop.eup %1816 }
 0x163   : > { %v378_v21 = vmul.f32 %v1817_v19, %v370_v4 }
 0x165   : > { %v385_v23 = vmul.f32 %v1582_v20, %v378_v21 }
 0x167   : > { %v392_v24 = vadd.f32 %v1583_v22, %v385_v23 }
 0x169   : > { %v393_v26 = vpack.c.bf16 %v392_v24, %v392_v24 }
 0x16b   : > { %1670 = vmatmul.mubr.msk.bf16.vlgmr.msra.gmra.mrb[0].mxu0 %vm364_vm0, %v393_v26  ;;  %1682 = vmatmul.mubr.msk.bf16.vlgmr.msra.gmra.mrb[0].mxu1 %vm364_vm0, %v393_v26 }
 0x16c   : > { %1686 = vmatpush3.bf16.msra.mxu0 %v1808_v25  ;;  %1693 = vmatprep.mubr.msk.bf16.mxu0 %vm1878_vm1, %v1877_v9 }
 0x16d   : > { %1687 = vmatprep.subr.bf16.mxu0 %v1877_v9  ;;  %1704 = vmatprep.mubr.msk.f32.mxu1 %vm1878_vm1, %v1877_v9 }
 0x170   : > { %1688 = vmatpush3.bf16.msra.mxu0 %v1809_v27 }
 0x171   : > { %1689 = vmatprep.subr.bf16.mxu0 %v1877_v9 }
 0x174   : > { %1690 = vmatpush3.bf16.msra.mxu0 %v1810_v28 }
 0x175   : > { %1691 = vmatprep.subr.bf16.mxu0 %v1877_v9 }
 0x178   : > { %1692 = vmatpush3.bf16.msra.mxu0 %v1811_v29 }
 0x179   : > { %1697 = vmatprep.subr.mxu0 %v1877_v9 }
 0x17b   : > { %1694 = vmatmul.mubr.msk.bf16.vlgmr.msra.gmra.mrb[4].mxu0 %vm364_vm0, %v393_v26 }
 0x17c   : > { %1699 = vmatprep.mubr.msk.f32.mxu0 %vm1878_vm1, %v1877_v9 }
 0x23e   : > { %v463_v30 = vpop.f32.mrb[0].mxu0  ;;  %v2062_v31 = vpop.f32.mrb[0].mxu1 }
 0x23f   : > { %1059 = vrot.lane.b32.xlu0 %v2062_v31, %s1879_s19  ;;  %839 = vrot.lane.b32.xlu1 %v2062_v31, %s1880_s20  ;;  %v1671_v32 = vpop.f32.mrb[1].mxu0  ;;  %v1683_v33 = vpop.f32.mrb[1].mxu1 }
 0x240   : > { %1698 = vmatpush3.xpose.msk.msra.mxu0 %vm621_vm2, %v2062_v31  ;;  %v466_v34 = vpop.f32.mrb[2].mxu0  ;;  %v538_v35 = vpop.f32.mrb[2].mxu1 }
 0x241   : > { %v1672_v36 = vpop.f32.mrb[3].mxu0  ;;  %v1684_v37 = vpop.f32.mrb[3].mxu1  ;;  %1713 = vmatprep.subr.mxu0 %v1877_v9 }
 0x243   : > { %1700 = vmatmul.mubr.msk.f32.vlgmr.msra.gmra.mrb[8].mxu0 %vm621_vm2, %v463_v30  ;;  %837 = vrot.lane.b32.xlu1 %v463_v30, %s1880_s20 }
 0x244   : > { %1715 = vmatprep.mubr.msk.f32.mxu0 %vm1878_vm1, %v1877_v9 }
 0x247   : > { %1057 = vrot.lane.b32.xlu1 %v463_v30, %s1879_s19 }
 0x24e   : > { %v2076_v38 = vpop.f32.mrb[4].mxu0 }
 0x24f   : > { %v1695_v39 = vpop.f32.mrb[5].mxu0  ;;  %1703 = vmatpush3.msra.mxu1 %v2076_v38 }
 0x250   : > { %v610_v40 = vpop.f32.mrb[6].mxu0  ;;  %1707 = vmatprep.subr.bf16.mxu1 %v1877_v9 }
 0x251   : > { %v1696_v41 = vpop.f32.mrb[7].mxu0  ;;  %v1813_v40 = vld [vmem:[#allocation2 + $0x8] sm:$0xff]  }
 0x2b1   : > { %v840_v42 = vpop.permute.xlu1 %839  ;;  %v1060_v44 = vpop.permute.xlu0 %1059 }
 0x2b2   : > { %1714 = vmatpush3.xpose.msk.msra.mxu0 %vm621_vm2, %v840_v42 }
 0x2b3   : > { %1729 = vmatprep.subr.mxu0 %v1877_v9 }
 0x2b5   : > { %v838_v43 = vpop.permute.xlu1 %837 }
 0x2b6   : > { %1716 = vmatmul.mubr.msk.f32.vlgmr.msra.gmra.mrb[10].mxu0 %vm621_vm2, %v838_v43 }
 0x2b7   : > { %1730 = vmatpush3.xpose.msk.msra.mxu0 %vm621_vm2, %v1060_v44  ;;  %1731 = vmatprep.mubr.msk.f32.mxu0 %vm1878_vm1, %v1877_v9 }
 0x2b8   : > { %1734 = vmatprep.subr.mxu0 %v1877_v9 }
 0x2b9   : > { %v1058_v45 = vpop.permute.xlu1 %1057 }
 0x2ba   : > { %1732 = vmatmul.mubr.msk.f32.vlgmr.msra.gmra.mrb[12].mxu0 %vm621_vm2, %v1058_v45 }
 0x2bb   : > { %1736 = vmatprep.mubr.msk.f32.mxu0 %vm1878_vm1, %v1877_v9 }
 0x316   : > { %v694_v46 = vpop.f32.mrb[8].mxu0 }
 0x317   : > { %v1701_v47 = vpop.f32.mrb[9].mxu0  ;;  %v698_v54 = vmul.f32 0.25, %v694_v46  ;;  %v1814_v46 = vld [vmem:[#allocation2 + $0x10] sm:$0xff]  }
 0x319   : > { %v700_v56 = vsel %vm699_vm3, %v698_v54, -inf }
 0x389   : > { %v911_v48 = vpop.f32.mrb[10].mxu0 }
 0x38a   : > { %v1717_v49 = vpop.f32.mrb[11].mxu0  ;;  %v915_v55 = vmul.f32 0.25, %v911_v48 }
 0x38c   : > { %v916_v57 = vsel %vm699_vm3, %v915_v55, -inf }
 0x38d   : > { %v1131_v50 = vpop.f32.mrb[12].mxu0 }
 0x38e   : > { %v1135_v51 = vmul.f32 0.25, %v1131_v50  ;;  %v1733_v52 = vpop.f32.mrb[13].mxu0 }
 0x390   : > { %v1136_v53 = vsel %vm699_vm3, %v1135_v51, -inf }
 0x391   : > { %1137 = vmax.xlane.f32.xlu1 %v1136_v53  ;;  %v1599_v53 = vld [vmem:[%s2158_s8] ss:$0 sm:$0xff] }
 0x3a2   : > { %1147 = vrot.lane.b32.xlu1 %v2076_v38, %s1879_s19 }
 0x3a6   : > { %1276 = vrot.lane.b32.xlu1 %v463_v30, %s1881_s21 }
 0x3ca   : > { %701 = vmax.xlane.f32.xlu1 %v700_v56 }
 0x3ce   : > { %917 = vmax.xlane.f32.xlu1 %v916_v57 }
 0x41e   : > { %v1138_v58 = vpop.xlane.xlu1 %1137 }
 0x41f   : > { %v1139_v59 = vsub.f32 %v1135_v51, %v1138_v58 }
 0x421   : > { %v1140_v60 = vmul.f32 1.442695, %v1139_v59 }
 0x422   : > { %v1148_v61 = vpop.permute.xlu1 %1147 }
 0x423   : > { %1818 = vpow2.f32 %v1140_v60  ;;  %1735 = vmatpush3.msra.mxu0 %v1148_v61 }
 0x424   : > { %1745 = vmatprep.subr.mxu0 %v1877_v9 }
 0x426   : > { %v1277_v1 = vpop.permute.xlu1 %1276 }
 0x42d   : > { %v1819_v62 = vpop.eup %1818 }
 0x42e   : > { %v1142_v63 = vsel %vm699_vm3, %v1819_v62, 0.0 }
 0x42f   : > { %1143 = vadd.xlane.f32.xlu0 %v1142_v63 }
 0x445   : > { %1278 = vrot.lane.b32.xlu0 %v2062_v31, %s1881_s21 }
 0x457   : > { %v702_v2 = vpop.xlane.xlu1 %701 }
 0x458   : > { %v703_v3 = vsub.f32 %v698_v54, %v702_v2  ;;  %v620_v54 = vadd.f32 %v1599_v53, %v1987_v0 }
 0x45a   : > { %v704_v4 = vmul.f32 1.442695, %v703_v3 }
 0x45b   : > { %v918_v16 = vpop.xlane.xlu1 %917 }
 0x45c   : > { %1820 = vpow2.f32 %v704_v4  ;;  %v919_v17 = vsub.f32 %v915_v55, %v918_v16 }
 0x45e   : > { %v920_v18 = vmul.f32 1.442695, %v919_v17 }
 0x466   : > { %v1821_v5 = vpop.eup %1820 }
 0x467   : > { %v706_v6 = vsel %vm699_vm3, %v1821_v5, 0.0 }
 0x468   : > { %707 = vadd.xlane.f32.xlu0 %v706_v6 }
 0x4bc   : > { %v1144_v7 = vpop.xlane.xlu0 %1143 }
 0x4bd   : > { %1822 = vrcp.f32 %v1144_v7 }
 0x4c0   : > { %v1279_v11 = vpop.permute.xlu0 %1278 }
 0x4c7   : > { %v1823_v8 = vpop.eup %1822 }
 0x4c8   : > { %v1146_v10 = vmul.f32 %v1823_v8, %v1819_v62 }
 0x4ca   : > { %1737 = vmatmul.mubr.msk.f32.vlgmr.msra.gmra.mrb[14].mxu0 %vm699_vm3, %v1146_v10 }
 0x4cb   : > { %1746 = vmatpush3.xpose.msk.msra.mxu0 %vm621_vm2, %v1279_v11  ;;  %1747 = vmatprep.mubr.msk.f32.mxu0 %vm1878_vm1, %v1877_v9 }
 0x4cc   : > { %1750 = vmatprep.subr.mxu0 %v1877_v9 }
 0x4ce   : > { %1748 = vmatmul.mubr.msk.f32.vlgmr.msra.gmra.mrb[16].mxu0 %vm621_vm2, %v1277_v1 }
 0x4cf   : > { %1752 = vmatprep.mubr.msk.f32.mxu0 %vm1878_vm1, %v1877_v9 }
 0x4f5   : > { %v708_v12 = vpop.xlane.xlu0 %707 }
 0x4f6   : > { %1824 = vrcp.f32 %v708_v12 }
 0x4f7   : > { %1826 = vpow2.f32 %v920_v18 }
 0x500   : > { %v1825_v13 = vpop.eup %1824 }
 0x501   : > { %v710_v14 = vmul.f32 %v1825_v13, %v1821_v5  ;;  %v1827_v25 = vpop.eup %1826 }
 0x502   : > { %v922_v26 = vsel %vm699_vm3, %v1827_v25, 0.0 }
 0x503   : > { %1705 = vmatmul.mubr.msk.f32.vlgmr.msra.gmra.mrb[4].mxu1 %vm699_vm3, %v710_v14 }
 0x504   : > { %1709 = vmatprep.mubr.msk.bf16.mxu1 %vm1878_vm1, %v1877_v9  ;;  %1708 = vmatpush3.bf16.msra.mxu1 %v1812_v15 }
 0x505   : > { %1718 = vmatprep.subr.mxu1 %v1877_v9 }
 0x59d   : > { %v1219_v19 = vpop.f32.mrb[14].mxu0 }
 0x59e   : > { %v1738_v20 = vpop.f32.mrb[15].mxu0  ;;  %v1223_v49 = vpack.c.bf16 %v1219_v19, %v1219_v19 }
 0x5a1   : > { %v1350_v21 = vpop.f32.mrb[16].mxu0 }
 0x5a2   : > { %v1354_v22 = vmul.f32 0.25, %v1350_v21  ;;  %v1749_v23 = vpop.f32.mrb[17].mxu0 }
 0x5a4   : > { %v1355_v24 = vsel %vm699_vm3, %v1354_v22, -inf }
 0x5a5   : > { %1356 = vmax.xlane.f32.xlu1 %v1355_v24 }
 0x5a9   : > { %923 = vadd.xlane.f32.xlu1 %v922_v26 }
 0x5ba   : > { %928 = vrot.lane.b32.xlu1 %v2076_v38, %s1880_s20 }
 0x5d6   : > { %v780_v27 = vpop.f32.mrb[4].mxu1 }
 0x5d7   : > { %v784_v28 = vpack.c.bf16 %v780_v27, %v780_v27  ;;  %v1706_v29 = vpop.f32.mrb[5].mxu1 }
 0x5d9   : > { %1710 = vmatmul.mubr.msk.bf16.vlgmr.msra.gmra.mrb[8].mxu1 %vm621_vm2, %v784_v28 }
 0x5da   : > { %1720 = vmatprep.mubr.msk.f32.mxu1 %vm1878_vm1, %v1877_v9 }
 0x632   : > { %v1357_v30 = vpop.xlane.xlu1 %1356 }
 0x633   : > { %v1358_v31 = vsub.f32 %v1354_v22, %v1357_v30 }
 0x635   : > { %v1359_v32 = vmul.f32 1.442695, %v1358_v31 }
 0x636   : > { %v924_v33 = vpop.xlane.xlu1 %923 }
 0x637   : > { %1828 = vpow2.f32 %v1359_v32 }
 0x638   : > { %1830 = vrcp.f32 %v924_v33 }
 0x63a   : > { %v929_v34 = vpop.permute.xlu1 %928 }
 0x63b   : > { %1719 = vmatpush3.msra.mxu1 %v929_v34 }
 0x63c   : > { %1723 = vmatprep.subr.bf16.mxu1 %v1877_v9 }
 0x641   : > { %v1829_v35 = vpop.eup %1828 }
 0x642   : > { %v1831_v36 = vpop.eup %1830  ;;  %v1361_v37 = vsel %vm699_vm3, %v1829_v35, 0.0 }
 0x643   : > { %v926_v39 = vmul.f32 %v1831_v36, %v1827_v25  ;;  %1362 = vadd.xlane.f32.xlu0 %v1361_v37 }
 0x645   : > { %1721 = vmatmul.mubr.msk.f32.vlgmr.msra.gmra.mrb[6].mxu1 %vm699_vm3, %v926_v39 }
 0x646   : > { %1725 = vmatprep.mubr.msk.bf16.mxu1 %vm1878_vm1, %v1877_v9  ;;  %1724 = vmatpush3.bf16.msra.mxu1 %v1813_v40 }
 0x647   : > { %1739 = vmatprep.subr.bf16.mxu1 %v1877_v9 }
 0x659   : > { %1366 = vrot.lane.b32.xlu0 %v2076_v38, %s1881_s21  ;;  %v1815_v38 = vld [vmem:[#allocation2 + $0x18] sm:$0xff]  }
 0x6d0   : > { %v1363_v41 = vpop.xlane.xlu0 %1362 }
 0x6d1   : > { %1832 = vrcp.f32 %v1363_v41 }
 0x6d4   : > { %v1367_v42 = vpop.permute.xlu0 %1366 }
 0x6d5   : > { %1751 = vmatpush3.msra.mxu0 %v1367_v42 }
 0x6db   : > { %v1833_v43 = vpop.eup %1832 }
 0x6dc   : > { %v1365_v44 = vmul.f32 %v1833_v43, %v1829_v35 }
 0x6de   : > { %1753 = vmatmul.mubr.msk.f32.vlgmr.msra.gmra.mrb[18].mxu0 %vm699_vm3, %v1365_v44 }
 0x718   : > { %v1000_v45 = vpop.f32.mrb[6].mxu1 }
 0x719   : > { %v1004_v47 = vpack.c.bf16 %v1000_v45, %v1000_v45  ;;  %v1722_v48 = vpop.f32.mrb[7].mxu1 }
 0x71b   : > { %1726 = vmatmul.mubr.msk.bf16.vlgmr.msra.gmra.mrb[8].mxu1 %vm621_vm2, %v1004_v47 }
 0x71c   : > { %1740 = vmatpush3.bf16.msra.mxu1 %v1814_v46  ;;  %1741 = vmatprep.mubr.msk.bf16.mxu1 %vm1878_vm1, %v1877_v9 }
 0x71d   : > { %1755 = vmatprep.subr.bf16.mxu1 %v1877_v9 }
 0x727   : > { %1742 = vmatmul.mubr.msk.bf16.vlgmr.msra.gmra.mrb[8].mxu1 %vm621_vm2, %v1223_v49 }
 0x728   : > { %1756 = vmatpush3.bf16.msra.mxu1 %v1815_v38  ;;  %1757 = vmatprep.mubr.msk.bf16.mxu1 %vm1878_vm1, %v1877_v9 }
 0x7b1   : > { %v1438_v50 = vpop.f32.mrb[18].mxu0 }
 0x7b2   : > { %v1442_v51 = vpack.c.bf16 %v1438_v50, %v1438_v50  ;;  %v1754_v52 = vpop.f32.mrb[19].mxu0 }
 0x7b4   : > { %1758 = vmatmul.mubr.msk.bf16.vlgmr.msra.gmra.mrb[8].mxu1 %vm621_vm2, %v1442_v51 }
 0x887   : > { %v1488_v55 = vpop.f32.mrb[8].mxu1 }
 0x888   : > { %v1761_v56 = vadd.f32 %v1488_v55, %v620_v54  ;;  %v1759_v57 = vpop.f32.mrb[9].mxu1 }
 0x889   : > { %v1491_v9 = vpop.f32.mrb[10].mxu1 }
 0x88a   : > { %1495 = vst.msk [vmem:[%s359_s1] sm:$0xff] %vm364_vm0, %v1761_v56  ;;  %v1760_v58 = vpop.f32.mrb[11].mxu1 }
 0x88b PF: > { %s20_s29 = sadd.s32 1, %s1872_s29  }
 0x88c   : > { %p17_p3 = scmp.ge.s32.totalorder %s20_s29, 4  }
 0x88e   :  { %19 = sbr.rel (!%p17_p3) target bundleno = 1 (0x1), region = 94 }
 0x895   :  { %1515 = vsyncpa [#allocation3], 1 }
 0x896   :  { %1517 = vsyncpa [#allocation3 + $0x1], 1 }

// kernel: _lambda_.8
= control target key start
LH: loop header
LB: loop body
LE: loop exit
PB: predicated region body
PF: predicated region fallthrough
CT: control target
= control target key end

     0   :  { %s1861_s30 = smov 0   ;;  %s2053_s0 = inlined_call_operand.vmem [shape: f32[16,64], index: 0, kind: input, shape index: {}]   ;;  %s2054_s1 = inlined_call_operand.vmem [shape: f32[16,64], index: 1, kind: input, shape index: {}]   ;;  %s2055_s2 = inlined_call_operand.vmem [shape: f32[1,64], index: 2, kind: input, shape index: {}]   ;;  %s2056_s3 = inlined_call_operand.vmem [shape: f32[1,64], index: 3, kind: input, shape index: {}]   ;;  %s2057_s4 = inlined_call_operand.vmem [shape: bf16[64,64], index: 4, kind: input, shape index: {}]   ;;  %s2058_s5 = inlined_call_operand.vmem [shape: bf16[64,64], index: 5, kind: input, shape index: {}]   ;;  %s2059_s6 = inlined_call_operand.vmem [shape: bf16[64,64], index: 6, kind: input, shape index: {}]   ;;  %s2060_s7 = inlined_call_operand.vmem [shape: bf16[64,64], index: 7, kind: input, shape index: {}]   ;;  %s2061_s8 = inlined_call_operand.vmem [shape: f32[1,64], index: 8, kind: input, shape index: {}]   ;;  %s2062_s9 = inlined_call_operand.vmem [shape: f32[16,64], index: 9, kind: output, shape index: {}]  }
   0x1 LB: > { %s1551_s10 = sadd.s32 4294967295, %s1804_s30   ;;  %p1555_p0 = scmp.ge.s32.totalorder %s1804_s30, 1  ;;  %s1804_s30 = sphi %s1861_s30, %s19_s30  }
   0x2   : > { %p295_p1 = scmp.lt.s32.totalorder %s1804_s30, 3 }
   0x4   : > { %p296_p2 = pnand %p1555_p0, %p295_p1 }
   0x5   : > { %p333_p3 = scmp.lt.s32.totalorder (!%p296_p2), %s1551_s10, 1  ;;  %vm349_vm0 = vcmask (!%p296_p2), 523264   ;;  %v1764_v7 = vld [vmem:[%s2058_s5] sm:$0xff] (!%p296_p2)   ;;  %v1806_v8 = vmov (!%p296_p2), 0.0   ;;  %v1765_v9 = vld [vmem:[%s2058_s5 + $0x8] sm:$0xff] (!%p296_p2)   ;;  %v1767_v11 = vld [vmem:[%s2058_s5 + $0x10] sm:$0xff] (!%p296_p2)  }
   0x6   : > { %299 = sbr.rel (%p296_p2) target bundleno = 2152 (0x868), region = 56  ;;  %1650 = vmatprep.subr.bf16.mxu1 (!%p296_p2), %v1806_v8  ;;  %1638 = vmatprep.subr.bf16.mxu0 (!%p296_p2), %v1806_v8  ;;  %v1766_v10 = vld [vmem:[%s2057_s4] sm:$0xff] (!%p296_p2)   ;;  %vm1807_vm1 = vmmov (!%p296_p2), 0   ;;  %v1768_v12 = vld [vmem:[%s2057_s4 + $0x8] sm:$0xff] (!%p296_p2)   ;;  %v1769_v14 = vld [vmem:[%s2058_s5 + $0x18] sm:$0xff] (!%p296_p2)   ;;  %vm611_vm2 = vcmask (!%p296_p2), 130048  }
   0x7   : > { %1651 = vmatpush3.bf16.msra.mxu1 (!%p296_p2), %v1764_v7  ;;  %1658 = vmatprep.mubr.msk.bf16.mxu1 (!%p296_p2), %vm1807_vm1, %v1806_v8  ;;  %v1770_v15 = vld [vmem:[%s2057_s4 + $0x10] sm:$0xff] (!%p296_p2)   ;;  %v1771_v17 = vld [vmem:[%s2057_s4 + $0x18] sm:$0xff] (!%p296_p2)   ;;  %v1559_v22 = vld [vmem:[%s2055_s2] ss:$0 sm:$0xff] (!%p296_p2)  ;;  %s1808_s27 = smov (!%p296_p2), 112   ;;  %s1809_s28 = smov (!%p296_p2), 96  }
   0x8   : > { %1652 = vmatprep.subr.bf16.mxu1 (!%p296_p2), %v1806_v8  ;;  %1639 = vmatpush3.bf16.msra.mxu0 (!%p296_p2), %v1766_v10  ;;  %v1560_v24 = vld [vmem:[%s2056_s3] ss:$0 sm:$0xff] (!%p296_p2)  ;;  %v1773_v29 = vld [vmem:[%s2059_s6 + $0x8] sm:$0xff] (!%p296_p2)   ;;  %v1774_v30 = vld [vmem:[%s2059_s6 + $0x10] sm:$0xff] (!%p296_p2)   ;;  %vm689_vm3 = vcmask (!%p296_p2), 64512   ;;  %s1810_s29 = smov (!%p296_p2), 80  }
   0x9   : > { %1640 = vmatprep.subr.bf16.mxu0 (!%p296_p2), %v1806_v8  ;;  %1646 = vmatprep.mubr.msk.bf16.mxu0 (!%p296_p2), %vm1807_vm1, %v1806_v8  ;;  %v1772_v27 = vld [vmem:[%s2059_s6] sm:$0xff] (!%p296_p2)   ;;  %v1775_v31 = vld [vmem:[%s2059_s6 + $0x18] sm:$0xff] (!%p296_p2)  }
   0xb   : > { %1653 = vmatpush3.bf16.msra.mxu1 (!%p296_p2), %v1765_v9 }
   0xc   : > { %1654 = vmatprep.subr.bf16.mxu1 (!%p296_p2), %v1806_v8  ;;  %1641 = vmatpush3.bf16.msra.mxu0 (!%p296_p2), %v1768_v12 }
   0xd   : > { %s2064_s10 = smov (!%p333_p3, %s1551_s10), 1  ;;  %1642 = vmatprep.subr.bf16.mxu0 %v1806_v8 }
   0xe   : > { %s1869_s11 = sshll.u32 %s2064_s10, 3 }
   0xf   : > { %s336_s14 = scalar_lea.vmem %s2053_s0, %s1869_s11  ;;  %s340_s25 = scalar_lea.vmem %s2054_s1, %s1869_s11  ;;  %1655 = vmatpush3.bf16.msra.mxu1 %v1767_v11 }
  0x10   : > { %v1875_v0 = vld [vmem:[%s336_s14] sm:$0xff]  ;;  %1656 = vmatprep.subr.bf16.mxu1 %v1806_v8  ;;  %1643 = vmatpush3.bf16.msra.mxu0 %v1770_v15  ;;  %s344_s23 = scalar_lea.vmem %s2062_s9, %s1869_s11 }
  0x11   : > { %v350_v1 = vsel %vm349_vm0, %v1875_v0, 0.0  ;;  %v379_v13 = vld [vmem:[%s340_s25] sm:$0xff]  ;;  %1644 = vmatprep.subr.bf16.mxu0 %v1806_v8 }
  0x12   : > { %351 = vadd.xlane.f32.xlu0 %v350_v1  ;;  %v380_v16 = vpack.c.bf16 %v379_v13, %v379_v13 }
  0x13   : > { %1657 = vmatpush3.bf16.msra.mxu1 %v1769_v14 }
  0x14   : > { %1679 = vmatprep.subr.mxu1 %v1806_v8  ;;  %1645 = vmatpush3.bf16.msra.mxu0 %v1771_v17  ;;  %v1776_v17 = vld [vmem:[%s2060_s7] sm:$0xff]  }
  0x15   : > { %1662 = vmatprep.subr.bf16.mxu0 %v1806_v8 }
  0x16   : > { %1659 = vmatmul.mubr.msk.bf16.vlgmr.msra.gmra.mrb[0].mxu1 %vm349_vm0, %v380_v16 }
  0x17   : > { %1681 = vmatprep.mubr.msk.f32.mxu1 %vm1807_vm1, %v1806_v8 }
  0x9f   : > { %v352_v2 = vpop.xlane.xlu0 %351 }
  0xa0   : > { %v354_v3 = vmul.f32 0.015625, %v352_v2 }
  0xa2   : > { %v355_v4 = vsub.f32 %v1875_v0, %v354_v3 }
  0xa4   : > { %v356_v5 = vmul.f32 %v355_v4, %v355_v4 }
  0xa6   : > { %v357_v6 = vsel %vm349_vm0, %v356_v5, 0.0 }
  0xa7   : > { %358 = vadd.xlane.f32.xlu0 %v357_v6 }
  0xe9   : > { %v1954_v32 = vpop.f32.mrb[0].mxu1 }
  0xea   : > { %v1660_v33 = vpop.f32.mrb[1].mxu1  ;;  %829 = vrot.lane.b32.xlu1 %v1954_v32, %s1808_s27  ;;  %1049 = vrot.lane.b32.xlu0 %v1954_v32, %s1809_s28 }
  0xeb   : > { %v528_v34 = vpop.f32.mrb[2].mxu1 }
  0xec   : > { %v1661_v35 = vpop.f32.mrb[3].mxu1 }
 0x134   : > { %v359_v18 = vpop.xlane.xlu0 %358 }
 0x135   : > { %v360_v19 = vmul.f32 0.015625, %v359_v18 }
 0x137   : > { %v361_v20 = vadd.f32 1e-05, %v360_v19 }
 0x139   : > { %1780 = vrsqrt.f32 %v361_v20 }
 0x143   : > { %v1781_v21 = vpop.eup %1780 }
 0x144   : > { %v363_v23 = vmul.f32 %v1781_v21, %v355_v4 }
 0x146   : > { %v370_v25 = vmul.f32 %v1559_v22, %v363_v23 }
 0x148   : > { %v377_v26 = vadd.f32 %v1560_v24, %v370_v25 }
 0x14a   : > { %v378_v28 = vpack.c.bf16 %v377_v26, %v377_v26 }
 0x14c   : > { %1647 = vmatmul.mubr.msk.bf16.vlgmr.msra.gmra.mrb[0].mxu0 %vm349_vm0, %v378_v28 }
 0x14d   : > { %1663 = vmatpush3.bf16.msra.mxu0 %v1772_v27  ;;  %1670 = vmatprep.mubr.msk.bf16.mxu0 %vm1807_vm1, %v1806_v8 }
 0x14e   : > { %1664 = vmatprep.subr.bf16.mxu0 %v1806_v8 }
 0x151   : > { %1665 = vmatpush3.bf16.msra.mxu0 %v1773_v29 }
 0x152   : > { %1666 = vmatprep.subr.bf16.mxu0 %v1806_v8 }
 0x155   : > { %1667 = vmatpush3.bf16.msra.mxu0 %v1774_v30 }
 0x156   : > { %1668 = vmatprep.subr.bf16.mxu0 %v1806_v8 }
 0x159   : > { %1669 = vmatpush3.bf16.msra.mxu0 %v1775_v31 }
 0x15a   : > { %1674 = vmatprep.subr.mxu0 %v1806_v8 }
 0x15c   : > { %1671 = vmatmul.mubr.msk.bf16.vlgmr.msra.gmra.mrb[4].mxu0 %vm349_vm0, %v380_v16  ;;  %v830_v36 = vpop.permute.xlu1 %829  ;;  %v1050_v46 = vpop.permute.xlu0 %1049 }
 0x15d   : > { %1676 = vmatprep.mubr.msk.f32.mxu0 %vm1807_vm1, %v1806_v8 }
 0x162   : > { %1675 = vmatpush3.xpose.msk.msra.mxu0 %vm611_vm2, %v1954_v32 }
 0x163   : > { %1690 = vmatprep.subr.mxu0 %v1806_v8 }
 0x21f   : > { %v450_v37 = vpop.f32.mrb[0].mxu0 }
 0x220   : > { %827 = vrot.lane.b32.xlu1 %v450_v37, %s1808_s27  ;;  %v1648_v38 = vpop.f32.mrb[1].mxu0  ;;  %1677 = vmatmul.mubr.msk.f32.vlgmr.msra.gmra.mrb[8].mxu0 %vm611_vm2, %v450_v37 }
 0x221   : > { %v453_v39 = vpop.f32.mrb[2].mxu0  ;;  %1691 = vmatpush3.xpose.msk.msra.mxu0 %vm611_vm2, %v830_v36  ;;  %1692 = vmatprep.mubr.msk.f32.mxu0 %vm1807_vm1, %v1806_v8 }
 0x222   : > { %v1649_v40 = vpop.f32.mrb[3].mxu0  ;;  %1706 = vmatprep.subr.mxu0 %v1806_v8 }
 0x224   : > { %1047 = vrot.lane.b32.xlu1 %v450_v37, %s1809_s28 }
 0x22f   : > { %v1970_v41 = vpop.f32.mrb[4].mxu0 }
 0x230   : > { %v1672_v42 = vpop.f32.mrb[5].mxu0  ;;  %1680 = vmatpush3.msra.mxu1 %v1970_v41 }
 0x231   : > { %v600_v43 = vpop.f32.mrb[6].mxu0  ;;  %1684 = vmatprep.subr.bf16.mxu1 %v1806_v8  ;;  %v1777_v42 = vld [vmem:[%s2060_s7 + $0x8] sm:$0xff]  }
 0x232   : > { %v1673_v44 = vpop.f32.mrb[7].mxu0 }
 0x292   : > { %v828_v45 = vpop.permute.xlu1 %827 }
 0x293   : > { %1693 = vmatmul.mubr.msk.f32.vlgmr.msra.gmra.mrb[10].mxu0 %vm611_vm2, %v828_v45 }
 0x294   : > { %1707 = vmatpush3.xpose.msk.msra.mxu0 %vm611_vm2, %v1050_v46  ;;  %1708 = vmatprep.mubr.msk.f32.mxu0 %vm1807_vm1, %v1806_v8 }
 0x295   : > { %1711 = vmatprep.subr.mxu0 %v1806_v8 }
 0x296   : > { %v1048_v47 = vpop.permute.xlu1 %1047 }
 0x297   : > { %1709 = vmatmul.mubr.msk.f32.vlgmr.msra.gmra.mrb[12].mxu0 %vm611_vm2, %v1048_v47 }
 0x298   : > { %1713 = vmatprep.mubr.msk.f32.mxu0 %vm1807_vm1, %v1806_v8 }
 0x2f3   : > { %v684_v48 = vpop.f32.mrb[8].mxu0 }
 0x2f4   : > { %v1678_v49 = vpop.f32.mrb[9].mxu0  ;;  %v688_v56 = vmul.f32 0.25, %v684_v48 }
 0x2f6   : > { %v690_v58 = vsel %vm689_vm3, %v688_v56, -inf }
 0x366   : > { %v901_v50 = vpop.f32.mrb[10].mxu0 }
 0x367   : > { %v1694_v51 = vpop.f32.mrb[11].mxu0  ;;  %v905_v57 = vmul.f32 0.25, %v901_v50  ;;  %v1779_v50 = vld [vmem:[%s2060_s7 + $0x18] sm:$0xff]  }
 0x369   : > { %v906_v59 = vsel %vm689_vm3, %v905_v57, -inf }
 0x36a   : > { %v1121_v52 = vpop.f32.mrb[12].mxu0 }
 0x36b   : > { %v1125_v53 = vmul.f32 0.25, %v1121_v52  ;;  %v1710_v54 = vpop.f32.mrb[13].mxu0 }
 0x36d   : > { %v1126_v55 = vsel %vm689_vm3, %v1125_v53, -inf }
 0x36e   : > { %1127 = vmax.xlane.f32.xlu1 %v1126_v55  ;;  %v1576_v55 = vld [vmem:[%s2061_s8] ss:$0 sm:$0xff] }
 0x37f   : > { %1137 = vrot.lane.b32.xlu1 %v1970_v41, %s1809_s28 }
 0x383   : > { %1266 = vrot.lane.b32.xlu1 %v450_v37, %s1810_s29 }
 0x3a7   : > { %691 = vmax.xlane.f32.xlu1 %v690_v58 }
 0x3ab   : > { %907 = vmax.xlane.f32.xlu1 %v906_v59 }
 0x3fb   : > { %v1128_v60 = vpop.xlane.xlu1 %1127 }
 0x3fc   : > { %v1129_v61 = vsub.f32 %v1125_v53, %v1128_v60 }
 0x3fe   : > { %v1130_v62 = vmul.f32 1.442695, %v1129_v61 }
 0x3ff   : > { %v1138_v63 = vpop.permute.xlu1 %1137 }
 0x400   : > { %1782 = vpow2.f32 %v1130_v62  ;;  %1712 = vmatpush3.msra.mxu0 %v1138_v63 }
 0x401   : > { %1722 = vmatprep.subr.mxu0 %v1806_v8 }
 0x403   : > { %v1267_v3 = vpop.permute.xlu1 %1266 }
 0x40a   : > { %v1783_v1 = vpop.eup %1782 }
 0x40b   : > { %v1132_v2 = vsel %vm689_vm3, %v1783_v1, 0.0 }
 0x40c   : > { %1133 = vadd.xlane.f32.xlu0 %v1132_v2 }
 0x422   : > { %1268 = vrot.lane.b32.xlu0 %v1954_v32, %s1810_s29 }
 0x434   : > { %v692_v4 = vpop.xlane.xlu1 %691 }
 0x435   : > { %v693_v5 = vsub.f32 %v688_v56, %v692_v4  ;;  %v610_v56 = vadd.f32 %v1576_v55, %v1875_v0 }
 0x437   : > { %v694_v6 = vmul.f32 1.442695, %v693_v5 }
 0x438   : > { %v908_v18 = vpop.xlane.xlu1 %907 }
 0x439   : > { %1784 = vpow2.f32 %v694_v6  ;;  %v909_v19 = vsub.f32 %v905_v57, %v908_v18 }
 0x43b   : > { %v910_v20 = vmul.f32 1.442695, %v909_v19 }
 0x443   : > { %v1785_v7 = vpop.eup %1784 }
 0x444   : > { %v696_v9 = vsel %vm689_vm3, %v1785_v7, 0.0 }
 0x445   : > { %697 = vadd.xlane.f32.xlu0 %v696_v9 }
 0x499   : > { %v1134_v10 = vpop.xlane.xlu0 %1133 }
 0x49a   : > { %1786 = vrcp.f32 %v1134_v10 }
 0x49d   : > { %v1269_v13 = vpop.permute.xlu0 %1268 }
 0x4a4   : > { %v1787_v11 = vpop.eup %1786 }
 0x4a5   : > { %v1136_v12 = vmul.f32 %v1787_v11, %v1783_v1 }
 0x4a7   : > { %1714 = vmatmul.mubr.msk.f32.vlgmr.msra.gmra.mrb[14].mxu0 %vm689_vm3, %v1136_v12 }
 0x4a8   : > { %1723 = vmatpush3.xpose.msk.msra.mxu0 %vm611_vm2, %v1269_v13  ;;  %1724 = vmatprep.mubr.msk.f32.mxu0 %vm1807_vm1, %v1806_v8 }
 0x4a9   : > { %1727 = vmatprep.subr.mxu0 %v1806_v8 }
 0x4ab   : > { %1725 = vmatmul.mubr.msk.f32.vlgmr.msra.gmra.mrb[16].mxu0 %vm611_vm2, %v1267_v3 }
 0x4ac   : > { %1729 = vmatprep.mubr.msk.f32.mxu0 %vm1807_vm1, %v1806_v8 }
 0x4d2   : > { %v698_v14 = vpop.xlane.xlu0 %697 }
 0x4d3   : > { %1788 = vrcp.f32 %v698_v14 }
 0x4d4   : > { %1790 = vpow2.f32 %v910_v20 }
 0x4dd   : > { %v1789_v15 = vpop.eup %1788 }
 0x4de   : > { %v700_v16 = vmul.f32 %v1789_v15, %v1785_v7  ;;  %v1791_v27 = vpop.eup %1790 }
 0x4df   : > { %v912_v28 = vsel %vm689_vm3, %v1791_v27, 0.0 }
 0x4e0   : > { %1682 = vmatmul.mubr.msk.f32.vlgmr.msra.gmra.mrb[4].mxu1 %vm689_vm3, %v700_v16 }
 0x4e1   : > { %1686 = vmatprep.mubr.msk.bf16.mxu1 %vm1807_vm1, %v1806_v8  ;;  %1685 = vmatpush3.bf16.msra.mxu1 %v1776_v17 }
 0x4e2   : > { %1695 = vmatprep.subr.mxu1 %v1806_v8 }
 0x57a   : > { %v1209_v21 = vpop.f32.mrb[14].mxu0 }
 0x57b   : > { %v1715_v22 = vpop.f32.mrb[15].mxu0  ;;  %v1213_v51 = vpack.c.bf16 %v1209_v21, %v1209_v21 }
 0x57e   : > { %v1340_v23 = vpop.f32.mrb[16].mxu0 }
 0x57f   : > { %v1344_v24 = vmul.f32 0.25, %v1340_v23  ;;  %v1726_v25 = vpop.f32.mrb[17].mxu0 }
 0x581   : > { %v1345_v26 = vsel %vm689_vm3, %v1344_v24, -inf }
 0x582   : > { %1346 = vmax.xlane.f32.xlu1 %v1345_v26 }
 0x586   : > { %913 = vadd.xlane.f32.xlu1 %v912_v28 }
 0x597   : > { %918 = vrot.lane.b32.xlu1 %v1970_v41, %s1808_s27 }
 0x5b3   : > { %v770_v29 = vpop.f32.mrb[4].mxu1 }
 0x5b4   : > { %v774_v30 = vpack.c.bf16 %v770_v29, %v770_v29  ;;  %v1683_v31 = vpop.f32.mrb[5].mxu1 }
 0x5b6   : > { %1687 = vmatmul.mubr.msk.bf16.vlgmr.msra.gmra.mrb[8].mxu1 %vm611_vm2, %v774_v30 }
 0x5b7   : > { %1697 = vmatprep.mubr.msk.f32.mxu1 %vm1807_vm1, %v1806_v8 }
 0x60f   : > { %v1347_v32 = vpop.xlane.xlu1 %1346 }
 0x610   : > { %v1348_v33 = vsub.f32 %v1344_v24, %v1347_v32 }
 0x612   : > { %v1349_v34 = vmul.f32 1.442695, %v1348_v33 }
 0x613   : > { %v914_v35 = vpop.xlane.xlu1 %913 }
 0x614   : > { %1792 = vpow2.f32 %v1349_v34 }
 0x615   : > { %1794 = vrcp.f32 %v914_v35 }
 0x617   : > { %v919_v36 = vpop.permute.xlu1 %918 }
 0x618   : > { %1696 = vmatpush3.msra.mxu1 %v919_v36 }
 0x619   : > { %1700 = vmatprep.subr.bf16.mxu1 %v1806_v8 }
 0x61e   : > { %v1793_v37 = vpop.eup %1792 }
 0x61f   : > { %v1795_v38 = vpop.eup %1794  ;;  %v1351_v39 = vsel %vm689_vm3, %v1793_v37, 0.0 }
 0x620   : > { %v916_v40 = vmul.f32 %v1795_v38, %v1791_v27  ;;  %1352 = vadd.xlane.f32.xlu0 %v1351_v39 }
 0x622   : > { %1698 = vmatmul.mubr.msk.f32.vlgmr.msra.gmra.mrb[6].mxu1 %vm689_vm3, %v916_v40 }
 0x623   : > { %1702 = vmatprep.mubr.msk.bf16.mxu1 %vm1807_vm1, %v1806_v8  ;;  %1701 = vmatpush3.bf16.msra.mxu1 %v1777_v42 }
 0x624   : > { %1716 = vmatprep.subr.bf16.mxu1 %v1806_v8 }
 0x636   : > { %1356 = vrot.lane.b32.xlu0 %v1970_v41, %s1810_s29  ;;  %v1778_v41 = vld [vmem:[%s2060_s7 + $0x10] sm:$0xff]  }
 0x6ad   : > { %v1353_v43 = vpop.xlane.xlu0 %1352 }
 0x6ae   : > { %1796 = vrcp.f32 %v1353_v43 }
 0x6b1   : > { %v1357_v44 = vpop.permute.xlu0 %1356 }
 0x6b2   : > { %1728 = vmatpush3.msra.mxu0 %v1357_v44 }
 0x6b8   : > { %v1797_v45 = vpop.eup %1796 }
 0x6b9   : > { %v1355_v46 = vmul.f32 %v1797_v45, %v1793_v37 }
 0x6bb   : > { %1730 = vmatmul.mubr.msk.f32.vlgmr.msra.gmra.mrb[18].mxu0 %vm689_vm3, %v1355_v46 }
 0x6f5   : > { %v990_v47 = vpop.f32.mrb[6].mxu1 }
 0x6f6   : > { %v994_v48 = vpack.c.bf16 %v990_v47, %v990_v47  ;;  %v1699_v49 = vpop.f32.mrb[7].mxu1 }
 0x6f8   : > { %1703 = vmatmul.mubr.msk.bf16.vlgmr.msra.gmra.mrb[8].mxu1 %vm611_vm2, %v994_v48 }
 0x6f9   : > { %1717 = vmatpush3.bf16.msra.mxu1 %v1778_v41  ;;  %1718 = vmatprep.mubr.msk.bf16.mxu1 %vm1807_vm1, %v1806_v8 }
 0x6fa   : > { %1732 = vmatprep.subr.bf16.mxu1 %v1806_v8 }
 0x704   : > { %1719 = vmatmul.mubr.msk.bf16.vlgmr.msra.gmra.mrb[8].mxu1 %vm611_vm2, %v1213_v51 }
 0x705   : > { %1733 = vmatpush3.bf16.msra.mxu1 %v1779_v50  ;;  %1734 = vmatprep.mubr.msk.bf16.mxu1 %vm1807_vm1, %v1806_v8 }
 0x78e   : > { %v1428_v52 = vpop.f32.mrb[18].mxu0 }
 0x78f   : > { %v1432_v53 = vpack.c.bf16 %v1428_v52, %v1428_v52  ;;  %v1731_v54 = vpop.f32.mrb[19].mxu0 }
 0x791   : > { %1735 = vmatmul.mubr.msk.bf16.vlgmr.msra.gmra.mrb[8].mxu1 %vm611_vm2, %v1432_v53 }
 0x864   : > { %v1478_v57 = vpop.f32.mrb[8].mxu1 }
 0x865   : > { %v1738_v58 = vadd.f32 %v1478_v57, %v610_v56  ;;  %v1736_v59 = vpop.f32.mrb[9].mxu1 }
 0x866   : > { %v1481_v60 = vpop.f32.mrb[10].mxu1 }
 0x867   : > { %1485 = vst.msk [vmem:[%s344_s23] sm:$0xff] %vm349_vm0, %v1738_v58  ;;  %v1737_v8 = vpop.f32.mrb[11].mxu1 }
 0x868 PF: > { %s19_s30 = sadd.s32 1, %s1804_s30  }
 0x869   : > { %p16_p4 = scmp.ge.s32.totalorder %s19_s30, 4  }
 0x86b   :  { %18 = sbr.rel (!%p16_p4) target bundleno = 1 (0x1), region = 89 }

// kernel: _lambda_.11
= control target key start
LH: loop header
LB: loop body
LE: loop exit
PB: predicated region body
PF: predicated region fallthrough
CT: control target
= control target key end

     0   :  { %v370_v0 = vmov 0.0   ;;  %vm371_vm0 = vmmov 0   ;;  %vm68_vm1 = vcmask 523264   ;;  %vm281_vm2 = vcmask 517120   ;;  %s469_s1 = inlined_call_operand.vmem [shape: bf16[64,64], index: 1, kind: input, shape index: {}]   ;;  %s470_s3 = inlined_call_operand.vmem [shape: bf16[64,64], index: 3, kind: input, shape index: {}]   ;;  %s471_s0 = inlined_call_operand.vmem [shape: f32[2,64], index: 0, kind: input, shape index: {}]   ;;  %s472_s5 = inlined_call_operand.vmem [shape: bf16[64,64], index: 5, kind: input, shape index: {}]   ;;  %s473_s2 = inlined_call_operand.vmem [shape: f32[1,64], index: 2, kind: input, shape index: {}]   ;;  %s474_s4 = inlined_call_operand.vmem [shape: f32[1,64], index: 4, kind: input, shape index: {}]   ;;  %s475_s6 = inlined_call_operand.vmem [shape: f32[1,64], index: 6, kind: input, shape index: {}]   ;;  %s476_s7 = inlined_call_operand.vmem [shape: f32[2,64], index: 7, kind: output, shape index: {}]  }
   0x1   :  { %320 = vmatprep.subr.bf16.mxu0 %v370_v0  ;;  %v358_v1 = vld [vmem:[%s469_s1] sm:$0xff]   ;;  %328 = vmatprep.mubr.msk.bf16.mxu0 %vm371_vm0, %v370_v0  ;;  %v359_v2 = vld [vmem:[%s469_s1 + $0x8] sm:$0xff]   ;;  %v360_v4 = vld [vmem:[%s469_s1 + $0x10] sm:$0xff]  }
   0x2   :  { %332 = vmatprep.subr.bf16.mxu1 %v370_v0  ;;  %340 = vmatprep.mubr.msk.bf16.mxu1 %vm371_vm0, %v370_v0  ;;  %v362_v3 = vld [vmem:[%s470_s3] sm:$0xff]   ;;  %v363_v5 = vld [vmem:[%s470_s3 + $0x8] sm:$0xff]   ;;  %v361_v6 = vld [vmem:[%s469_s1 + $0x18] sm:$0xff]  }
   0x3   :  { %321 = vmatpush3.bf16.msra.mxu0 %v358_v1  ;;  %333 = vmatpush3.bf16.msra.mxu1 %v362_v3  ;;  %v27_v7 = vld [vmem:[%s471_s0] sm:$0x3]  ;;  %v364_v9 = vld [vmem:[%s470_s3 + $0x10] sm:$0xff]   ;;  %v365_v10 = vld [vmem:[%s470_s3 + $0x18] sm:$0xff]  }
   0x4   :  { %322 = vmatprep.subr.bf16.mxu0 %v370_v0  ;;  %334 = vmatprep.subr.bf16.mxu1 %v370_v0  ;;  %v28_v8 = vpack.c.bf16 %v27_v7, %v27_v7  ;;  %v366_v11 = vld [vmem:[%s472_s5] sm:$0xff]   ;;  %v367_v12 = vld [vmem:[%s472_s5 + $0x8] sm:$0xff]   ;;  %v368_v21 = vld [vmem:[%s472_s5 + $0x10] sm:$0xff]  }
   0x5   :  { %v287_v13 = vld [vmem:[%s473_s2] ss:$0 sm:$0xff]  ;;  %v369_v22 = vld [vmem:[%s472_s5 + $0x18] sm:$0xff]  }
   0x6   :  { %v293_v23 = vld [vmem:[%s474_s4] ss:$0 sm:$0xff] }
   0x7   :  { %323 = vmatpush3.bf16.msra.mxu0 %v359_v2  ;;  %335 = vmatpush3.bf16.msra.mxu1 %v363_v5  ;;  %v299_v31 = vld [vmem:[%s475_s6] ss:$0 sm:$0xff] }
   0x8   :  { %324 = vmatprep.subr.bf16.mxu0 %v370_v0  ;;  %336 = vmatprep.subr.bf16.mxu1 %v370_v0 }
   0xb   :  { %325 = vmatpush3.bf16.msra.mxu0 %v360_v4  ;;  %337 = vmatpush3.bf16.msra.mxu1 %v364_v9 }
   0xc   :  { %326 = vmatprep.subr.bf16.mxu0 %v370_v0  ;;  %338 = vmatprep.subr.bf16.mxu1 %v370_v0 }
   0xf   :  { %327 = vmatpush3.bf16.msra.mxu0 %v361_v6  ;;  %339 = vmatpush3.bf16.msra.mxu1 %v365_v10 }
  0x10   :  { %344 = vmatprep.subr.bf16.mxu0 %v370_v0 }
  0x12   :  { %329 = vmatmul.mubr.msk.bf16.vlgmr.msra.gmra.mrb[0].mxu0 %vm68_vm1, %v28_v8 }
  0x13   :  { %352 = vmatprep.mubr.msk.bf16.mxu0 %vm371_vm0, %v370_v0  ;;  %345 = vmatpush3.bf16.msra.mxu0 %v366_v11 }
  0x14   :  { %346 = vmatprep.subr.bf16.mxu0 %v370_v0 }
  0x17   :  { %347 = vmatpush3.bf16.msra.mxu0 %v367_v12 }
  0x18   :  { %348 = vmatprep.subr.bf16.mxu0 %v370_v0 }
  0x1b   :  { %349 = vmatpush3.bf16.msra.mxu0 %v368_v21 }
  0x1c   :  { %350 = vmatprep.subr.bf16.mxu0 %v370_v0 }
  0x1f   :  { %351 = vmatpush3.bf16.msra.mxu0 %v369_v22 }
  0xe5   :  { %v106_v14 = vpop.f32.mrb[0].mxu0 }
  0xe6   :  { %v107_v15 = vadd.f32 %v287_v13, %v106_v14  ;;  %v330_v16 = vpop.f32.mrb[1].mxu0 }
  0xe7   :  { %v109_v17 = vpop.f32.mrb[2].mxu0 }
  0xe8   :  { %v112_v18 = vmax.f32 %v107_v15, 0.0  ;;  %v331_v19 = vpop.f32.mrb[3].mxu0 }
  0xea   :  { %v113_v20 = vpack.c.bf16 %v112_v18, %v112_v18 }
  0xec   :  { %341 = vmatmul.mubr.msk.bf16.vlgmr.msra.gmra.mrb[0].mxu1 %vm68_vm1, %v113_v20 }
 0x1bf   :  { %v190_v24 = vpop.f32.mrb[0].mxu1 }
 0x1c0   :  { %v191_v25 = vadd.f32 %v293_v23, %v190_v24  ;;  %v342_v26 = vpop.f32.mrb[1].mxu1 }
 0x1c1   :  { %v193_v27 = vpop.f32.mrb[2].mxu1 }
 0x1c2   :  { %v196_v28 = vmax.f32 %v191_v25, 0.0  ;;  %v343_v29 = vpop.f32.mrb[3].mxu1 }
 0x1c4   :  { %v197_v30 = vpack.c.bf16 %v196_v28, %v196_v28 }
 0x1c6   :  { %353 = vmatmul.mubr.msk.bf16.vlgmr.msra.gmra.mrb[4].mxu0 %vm68_vm1, %v197_v30 }
 0x299   :  { %v274_v32 = vpop.f32.mrb[4].mxu0 }
 0x29a   :  { %v275_v33 = vadd.f32 %v299_v31, %v274_v32  ;;  %v354_v34 = vpop.f32.mrb[5].mxu0 }
 0x29b   :  { %v277_v35 = vpop.f32.mrb[6].mxu0 }
 0x29c   :  { %v280_v36 = vadd.f32 %v275_v33, %v27_v7  ;;  %v355_v37 = vpop.f32.mrb[7].mxu0 }
 0x29e   :  { %282 = vst.msk [vmem:[%s476_s7] sm:$0x3] %vm281_vm2, %v280_v36 }

// kernel: _lambda_.12
= control target key start
LH: loop header
LB: loop body
LE: loop exit
PB: predicated region body
PF: predicated region fallthrough
CT: control target
= control target key end

     0   :  { %s2210_s12 = smov 0   ;;  %s2212_s13 = smov 0   ;;  %s2596_s0 = inlined_call_operand.vmem [shape: f32[2,4,10,8], index: 0, kind: input, shape index: {}]   ;;  %s2597_s1 = inlined_call_operand.vmem [shape: bf16[27,8,64], index: 1, kind: input, shape index: {}]   ;;  %s2598_s2 = inlined_call_operand.vmem [shape: f32[1,64], index: 2, kind: input, shape index: {}]   ;;  %s2599_s3 = inlined_call_operand.vmem [shape: f32[2,2,4,64], index: 3, kind: output, shape index: {}]  }
   0x1   :  { %s2214_s14 = smov 0   ;;  %s2216_s15 = smov 0  }
   0x2   :  { %s2218_s16 = smov 0  }
   0x3 LB: > { %s22_s17 = sadd.s32 1, %s2178_s14  ;;  %s25_s18 = sadd.s32 1, %s2182_s15  ;;  %s2186_s16 = sphi %s2218_s16, %s13_s16   ;;  %s2182_s15 = sphi %s2216_s15, %s2607_s15   ;;  %s2178_s14 = sphi %s2214_s14, %s2606_s14   ;;  %s2174_s13 = sphi %s2212_s13, %s2605_s13   ;;  %s2170_s12 = sphi %s2210_s12, %s2604_s12  }
   0x4   : > { %p23_p0 = scmp.ge.s32.totalorder %s22_s17, 2  ;;  %p1709_p1 = scmp.ge.s32.totalorder %s2186_s16, 1 }
   0x5   : > { %p151_p2 = scmp.lt.s32.totalorder %s2186_s16, 5 }
   0x6   : > { %s2609_s17 = smov (%p23_p0, %s22_s17), 0  ;;  %s2611_s18 = smov (!%p23_p0, %s25_s18), %s2182_s15 }
   0x7   : > { %p152_p3 = pnand %p1709_p1, %p151_p2  ;;  %p27_p4 = scmp.ge.s32.totalorder %s2611_s18, 2 }
   0x8   : > { %vm226_vm0 = vcmask (!%p152_p3), 1043456   ;;  %v1746_v0 = vld [vmem:[%s2597_s1 + $0x34] sm:$0xf] (!%p152_p3)  ;;  %v221_v1 = vld [vmem:[%s2597_s1] sm:$0xf] (!%p152_p3)  ;;  %v192_v2 = vlaneseq (!%p152_p3)  ;;  %v2188_v3 = vmov (!%p152_p3), 0.0  }
   0x9   : > { %s2613_s18 = smov (%p27_p4, %s2611_s18), 0  ;;  %155 = sbr.rel (%p152_p3) target bundleno = 396 (0x18c), region = 32 }
   0xa   : > { %1920 = vmatprep.subr.bf16.mxu0 (!%p152_p3), %v2188_v3  ;;  %v899_v4 = vsel (!%p152_p3), %vm226_vm0, %v1746_v0, 0  ;;  %1842 = vmatprep.subr.bf16.mxu1 (!%p152_p3), %v2188_v3  ;;  %v228_v5 = vsel (!%p152_p3), %vm226_vm0, %v221_v1, 0  ;;  %p178_p5 = scmp.lt.s32.totalorder (!%p152_p3), %s2174_s13, 1  ;;  %v193_v6 = vshrl.u32 (!%p152_p3), %v192_v2, 7  ;;  %vm2189_vm1 = vmmov (!%p152_p3), 0   ;;  %s1715_s23 = sshll.u32 (!%p152_p3), %s2170_s12, 4 }
   0xb   : > { %1921 = vmatpush3.bf16.msra.mxu0 (!%p152_p3), %v899_v4  ;;  %1843 = vmatpush3.bf16.msra.mxu1 (!%p152_p3), %v228_v5  ;;  %v1749_v8 = vld [vmem:[%s2597_s1 + $0x38] sm:$0xf] (!%p152_p3)  ;;  %v1717_v10 = vld [vmem:[%s2597_s1 + $0x4] sm:$0xf] (!%p152_p3)  ;;  %vm222_vm3 = vcmask (!%p152_p3), 64512   ;;  %p185_p6 = scmp.lt.s32.totalorder (!%p152_p3), %s2170_s12, 1 }
   0xc   : > { %1922 = vmatprep.mubr.msk.bf16.mxu0 (!%p152_p3), %vm2189_vm1, %v2188_v3  ;;  %1926 = vmatprep.subr.bf16.mxu0 (!%p152_p3), %v2188_v3  ;;  %v198_v7 = vand.u32 (!%p152_p3), 1, %v193_v6  ;;  %v951_v14 = vsel (!%p152_p3), %vm226_vm0, %v1749_v8, 0  ;;  %v279_v17 = vsel (!%p152_p3), %vm226_vm0, %v1717_v10, 0  ;;  %v1751_v24 = vld [vmem:[%s2597_s1 + $0x3c] sm:$0xf] (!%p152_p3)  ;;  %vm1615_vm5 = vcmask (!%p152_p3), 519168  }
   0xd   : > { %1844 = vmatprep.mubr.msk.bf16.mxu1 (!%p152_p3), %vm2189_vm1, %v2188_v3  ;;  %1848 = vmatprep.subr.bf16.mxu1 (!%p152_p3), %v2188_v3  ;;  %v1719_v28 = vld [vmem:[%s2597_s1 + $0x8] sm:$0xf] (!%p152_p3)  ;;  %v1002_v32 = vsel (!%p152_p3), %vm226_vm0, %v1751_v24, 0  ;;  %v1754_v45 = vld [vmem:[%s2597_s1 + $0x40] sm:$0xf] (!%p152_p3) }
   0xe   : > { %vm2272_vm2 = vcmp.ne.s32.totalorder (!%p152_p3), %v198_v7, 0  ;;  %vm2289_vm4 = vcmp.ne.s32.totalorder (!%p152_p3), %v198_v7, 1  ;;  %v331_v35 = vsel (!%p152_p3), %vm226_vm0, %v1719_v28, 0  ;;  %v1721_v48 = vld [vmem:[%s2597_s1 + $0xc] sm:$0xf] (!%p152_p3)  ;;  %v1053_v50 = vsel (!%p152_p3), %vm226_vm0, %v1754_v45, 0 }
   0xf   : > { %v382_v51 = vsel (!%p152_p3), %vm226_vm0, %v1721_v48, 0  ;;  %v1757_v54 = vld [vmem:[%s2597_s1 + $0x44] sm:$0xf] (!%p152_p3)  ;;  %v1723_v56 = vld [vmem:[%s2597_s1 + $0x10] sm:$0xf] (!%p152_p3) }
  0x10   : > { %s2615_s13 = smov (!%p178_p5, %s2174_s13), 1  ;;  %v1105_v58 = vsel %vm226_vm0, %v1757_v54, 0  ;;  %v433_v59 = vsel %vm226_vm0, %v1723_v56, 0  ;;  %v1761_v63 = vld [vmem:[%s2597_s1 + $0x48] sm:$0xf]  ;;  %s2617_s12 = smov (!%p185_p6, %s2170_s12), 1 }
  0x11   : > { %s1787_s24 = sshll.u32 %s2615_s13, 6  ;;  %v1725_v1 = vld [vmem:[%s2597_s1 + $0x14] sm:$0xf]  ;;  %v1160_v4 = vsel %vm226_vm0, %v1761_v63, 0  ;;  %v1738_v45 = vld [vmem:[%s2597_s1 + $0x28] sm:$0xf] }
  0x12   : > { %s182_s27 = scalar_lea.vmem %s2596_s0, %s1787_s24  ;;  %v485_v5 = vsel %vm226_vm0, %v1725_v1, 0 }
  0x13   : > { %s2276_s30 = scalar_lea.vmem %s182_s27, %s1715_s23 }
  0x14   : > { %v1745_v11 = vld [vmem:[%s2276_s30 + $0x13] sm:$0xf]  ;;  %v218_v12 = vld [vmem:[%s2276_s30] sm:$0xf]  ;;  %v630_v26 = vld [vmem:[%s2276_s30 + $0x6] sm:$0xf] }
  0x15   : > { %v892_v13 = vpack.c.bf16 %v1745_v11, %v1745_v11  ;;  %v219_v15 = vsel %vm2272_vm2, %v218_v12, 0.0  ;;  %v1748_v19 = vld [vmem:[%s2276_s30 + $0x14] sm:$0xf]  ;;  %v1766_v21 = vld [vmem:[%s2276_s30 + $0x22] sm:$0xf]  ;;  %v2321_v29 = vsel %vm2289_vm4, %v630_v26, 0.0 }
  0x16   : > { %v220_v16 = vpack.c.bf16 %v219_v15, %v219_v15  ;;  %v943_v20 = vsel %vm2289_vm4, %v1748_v19, 0.0  ;;  %v271_v22 = vld [vmem:[%s2276_s30 + $0x1] sm:$0xf]  ;;  %v2306_v23 = vsel %vm2289_vm4, %v1766_v21, 0.0  ;;  %v2313_v25 = vsel %vm2272_vm2, %v1766_v21, 0.0 }
  0x17   : > { %1923 = vmatmul.mubr.msk.bf16.vlgmr.msra.gmra.mrb[0].mxu0 %vm222_vm3, %v892_v13  ;;  %v944_v27 = vpack.c.bf16 %v943_v20, %v943_v20  ;;  %v272_v30 = vpack.c.bf16 %v271_v22, %v271_v22  ;;  %v1734_v31 = vld [vmem:[%s2276_s30 + $0x10] sm:$0xf]  ;;  %v1774_v34 = vld [vmem:[%s2276_s30 + $0x24] sm:$0xf]  ;;  %v994_v42 = vsel %vm2272_vm2, %v1748_v19, 0.0  ;;  %v1256_v28 = vpack.c.bf16 %v2306_v23, %v2306_v23 }
  0x18   : > { %1927 = vmatpush3.bf16.msra.mxu0 %v951_v14  ;;  %1845 = vmatmul.mubr.msk.bf16.vlgmr.msra.gmra.mrb[0].mxu1 %vm222_vm3, %v220_v16  ;;  %v2327_v33 = vsel %vm2272_vm2, %v1734_v31, 0.0  ;;  %v2333_v36 = vsel %vm2289_vm4, %v1774_v34, 0.0  ;;  %v2338_v37 = vsel %vm2272_vm2, %v1774_v34, 0.0  ;;  %v1740_v38 = vld [vmem:[%s2276_s30 + $0x12] sm:$0xf]  ;;  %v995_v47 = vpack.c.bf16 %v994_v42, %v994_v42 }
  0x19   : > { %1849 = vmatpush3.bf16.msra.mxu1 %v279_v17  ;;  %1928 = vmatprep.mubr.msk.bf16.mxu0 %vm2189_vm1, %v2188_v3  ;;  %v2346_v39 = vsel %vm2289_vm4, %v1740_v38, 0.0  ;;  %v2350_v40 = vsel %vm2272_vm2, %v1740_v38, 0.0  ;;  %v322_v41 = vld [vmem:[%s2276_s30 + $0x2] sm:$0xf]  ;;  %v1782_v44 = vld [vmem:[%s2276_s30 + $0x26] sm:$0xf]  ;;  %v1461_v56 = vpack.c.bf16 %v2338_v37, %v2338_v37 }
  0x1a   : > { %1932 = vmatprep.subr.bf16.mxu0 %v2188_v3  ;;  %1850 = vmatprep.mubr.msk.bf16.mxu1 %vm2189_vm1, %v2188_v3  ;;  %v323_v43 = vsel %vm2289_vm4, %v322_v41, 0.0  ;;  %v2367_v46 = vsel %vm2289_vm4, %v1782_v44, 0.0  ;;  %v1753_v52 = vld [vmem:[%s2276_s30 + $0x15] sm:$0xf]  ;;  %v374_v53 = vsel %vm2272_vm2, %v322_v41, 0.0  ;;  %v632_v41 = vpack.c.bf16 %v2321_v29, %v2321_v29 }
  0x1b   : > { %1854 = vmatprep.subr.bf16.mxu1 %v2188_v3  ;;  %v324_v49 = vpack.c.bf16 %v323_v43, %v323_v43  ;;  %v1046_v55 = vpack.c.bf16 %v1753_v52, %v1753_v52  ;;  %v375_v57 = vpack.c.bf16 %v374_v53, %v374_v53  ;;  %v1756_v60 = vld [vmem:[%s2276_s30 + $0x16] sm:$0xf]  ;;  %v425_v62 = vld [vmem:[%s2276_s30 + $0x3] sm:$0xf]  ;;  %v1764_v11 = vld [vmem:[%s2597_s1 + $0x4c] sm:$0xf] }
  0x1c   : > { %v1097_v61 = vsel %vm2289_vm4, %v1756_v60, 0.0  ;;  %v426_v2 = vpack.c.bf16 %v425_v62, %v425_v62  ;;  %v1760_v6 = vld [vmem:[%s2276_s30 + $0x20] sm:$0xf]  ;;  %v476_v7 = vld [vmem:[%s2276_s30 + $0x4] sm:$0xf]  ;;  %v1211_v15 = vsel %vm226_vm0, %v1764_v11, 0  ;;  %v841_v62 = vpack.c.bf16 %v2350_v40, %v2350_v40 }
  0x1d   : > { %v1098_v0 = vpack.c.bf16 %v1097_v61, %v1097_v61  ;;  %v1152_v8 = vsel %vm2272_vm2, %v1760_v6, 0.0  ;;  %v477_v10 = vsel %vm2289_vm4, %v476_v7, 0.0  ;;  %v1727_v13 = vld [vmem:[%s2597_s1 + $0x18] sm:$0xf]  ;;  %v1763_v17 = vld [vmem:[%s2276_s30 + $0x21] sm:$0xf] }
  0x1e   : > { %v1153_v12 = vpack.c.bf16 %v1152_v8, %v1152_v8  ;;  %v478_v14 = vpack.c.bf16 %v477_v10, %v477_v10  ;;  %v536_v16 = vsel %vm226_vm0, %v1727_v13, 0  ;;  %v528_v18 = vsel %vm2272_vm2, %v476_v7, 0.0  ;;  %v1767_v19 = vld [vmem:[%s2597_s1 + $0x50] sm:$0xf]  ;;  %v1729_v21 = vld [vmem:[%s2597_s1 + $0x1c] sm:$0xf] }
  0x1f   : > { %v1204_v20 = vpack.c.bf16 %v1763_v17, %v1763_v17  ;;  %v529_v22 = vpack.c.bf16 %v528_v18, %v528_v18  ;;  %v1263_v24 = vsel %vm226_vm0, %v1767_v19, 0  ;;  %v587_v26 = vsel %vm226_vm0, %v1729_v21, 0  ;;  %v579_v9 = vld [vmem:[%s2276_s30 + $0x5] sm:$0xf]  ;;  %v1772_v23 = vld [vmem:[%s2597_s1 + $0x58] sm:$0xf] }
  0x20   : > { %v580_v31 = vpack.c.bf16 %v579_v9, %v579_v9  ;;  %v1735_v38 = vld [vmem:[%s2597_s1 + $0x24] sm:$0xf]  ;;  %v1365_v42 = vsel %vm226_vm0, %v1772_v23, 0  ;;  %v1775_v29 = vld [vmem:[%s2597_s1 + $0x5c] sm:$0xf] }
  0x21   : > { %v694_v43 = vsel %vm226_vm0, %v1735_v38, 0  ;;  %v1417_v48 = vsel %vm226_vm0, %v1775_v29, 0  ;;  %v1741_v52 = vld [vmem:[%s2597_s1 + $0x2c] sm:$0xf]  ;;  %v1779_v37 = vld [vmem:[%s2276_s30 + $0x25] sm:$0xf] }
  0x22   : > { %v1512_v61 = vpack.c.bf16 %v1779_v37, %v1779_v37 }
  0x23   : > { %1929 = vmatmul.mubr.msk.bf16.vlgmr.msra.gmra.mrb[0].mxu0 %vm222_vm3, %v944_v27  ;;  %v1769_v27 = vld [vmem:[%s2597_s1 + $0x54] sm:$0xf] }
  0x24   : > { %1933 = vmatpush3.bf16.msra.mxu0 %v1002_v32  ;;  %1851 = vmatmul.mubr.msk.bf16.vlgmr.msra.gmra.mrb[0].mxu1 %vm222_vm3, %v272_v30  ;;  %v1731_v30 = vld [vmem:[%s2597_s1 + $0x20] sm:$0xf]  ;;  %v1314_v32 = vsel %vm226_vm0, %v1769_v27, 0 }
  0x25   : > { %1855 = vmatpush3.bf16.msra.mxu1 %v331_v35  ;;  %1934 = vmatprep.mubr.msk.bf16.mxu0 %vm2189_vm1, %v2188_v3  ;;  %v639_v34 = vsel %vm226_vm0, %v1731_v30, 0  ;;  %v1307_v35 = vpack.c.bf16 %v2313_v25, %v2313_v25  ;;  %v1771_v25 = vld [vmem:[%s2276_s30 + $0x23] sm:$0xf] }
  0x26   : > { %1938 = vmatprep.subr.bf16.mxu0 %v2188_v3  ;;  %1856 = vmatprep.mubr.msk.bf16.mxu1 %vm2189_vm1, %v2188_v3  ;;  %v1358_v44 = vpack.c.bf16 %v1771_v25, %v1771_v25 }
  0x27   : > { %1860 = vmatprep.subr.bf16.mxu1 %v2188_v3 }
  0x2f   : > { %1935 = vmatmul.mubr.msk.bf16.vlgmr.msra.gmra.mrb[0].mxu0 %vm222_vm3, %v995_v47  ;;  %v687_v47 = vpack.c.bf16 %v2327_v33, %v2327_v33  ;;  %v1737_v33 = vld [vmem:[%s2276_s30 + $0x11] sm:$0xf]  ;;  %s1712_s30 = sshll.u32 %s2615_s13, 1 }
  0x30   : > { %1939 = vmatpush3.bf16.msra.mxu0 %v1053_v50  ;;  %1857 = vmatmul.mubr.msk.bf16.vlgmr.msra.gmra.mrb[0].mxu1 %vm222_vm3, %v324_v49  ;;  %v745_v49 = vsel %vm226_vm0, %v1738_v45, 0  ;;  %v1777_v50 = vld [vmem:[%s2597_s1 + $0x60] sm:$0xf]  ;;  %v738_v53 = vpack.c.bf16 %v1737_v33, %v1737_v33  ;;  %s188_s23 = sadd.s32 %s1712_s30, %s2617_s12 }
  0x31   : > { %1861 = vmatpush3.bf16.msra.mxu1 %v382_v51  ;;  %1940 = vmatprep.mubr.msk.bf16.mxu0 %vm2189_vm1, %v2188_v3  ;;  %v1410_v51 = vpack.c.bf16 %v2333_v36, %v2333_v36  ;;  %v1468_v54 = vsel %vm226_vm0, %v1777_v50, 0  ;;  %v1780_v36 = vld [vmem:[%s2597_s1 + $0x64] sm:$0xf]  ;;  %s1713_s24 = sshll.u32 %s188_s23, 2 }
  0x32   : > { %1944 = vmatprep.subr.bf16.mxu0 %v2188_v3  ;;  %1862 = vmatprep.mubr.msk.bf16.mxu1 %vm2189_vm1, %v2188_v3  ;;  %s190_s27 = scalar_lea.vmem %s2599_s3, %s1713_s24 }
  0x33   : > { %1866 = vmatprep.subr.bf16.mxu1 %v2188_v3 }
  0x3b   : > { %1941 = vmatmul.mubr.msk.bf16.vlgmr.msra.gmra.mrb[0].mxu0 %vm222_vm3, %v1046_v55  ;;  %v797_v55 = vsel %vm226_vm0, %v1741_v52, 0 }
  0x3c   : > { %1945 = vmatpush3.bf16.msra.mxu0 %v1105_v58  ;;  %1863 = vmatmul.mubr.msk.bf16.vlgmr.msra.gmra.mrb[0].mxu1 %vm222_vm3, %v375_v57  ;;  %v1743_v57 = vld [vmem:[%s2597_s1 + $0x30] sm:$0xf]  ;;  %v790_v58 = vpack.c.bf16 %v2346_v39, %v2346_v39  ;;  %v1783_v39 = vld [vmem:[%s2597_s1 + $0x68] sm:$0xf] }
  0x3d   : > { %1867 = vmatpush3.bf16.msra.mxu1 %v433_v59  ;;  %1946 = vmatprep.mubr.msk.bf16.mxu0 %vm2189_vm1, %v2188_v3  ;;  %v1519_v59 = vsel %vm226_vm0, %v1780_v36, 0  ;;  %v848_v60 = vsel %vm226_vm0, %v1743_v57, 0  ;;  %v1571_v63 = vsel %vm226_vm0, %v1783_v39, 0 }
  0x3e   : > { %1950 = vmatprep.subr.bf16.mxu0 %v2188_v3  ;;  %1868 = vmatprep.mubr.msk.bf16.mxu1 %vm2189_vm1, %v2188_v3 }
  0x3f   : > { %1872 = vmatprep.subr.bf16.mxu1 %v2188_v3 }
  0x47   : > { %1947 = vmatmul.mubr.msk.bf16.vlgmr.msra.gmra.mrb[0].mxu0 %vm222_vm3, %v1098_v0  ;;  %v1564_v0 = vpack.c.bf16 %v2367_v46, %v2367_v46 }
  0x48   : > { %1951 = vmatpush3.bf16.msra.mxu0 %v1160_v4  ;;  %1869 = vmatmul.mubr.msk.bf16.vlgmr.msra.gmra.mrb[0].mxu1 %vm222_vm3, %v426_v2 }
  0x49   : > { %1873 = vmatpush3.bf16.msra.mxu1 %v485_v5  ;;  %1952 = vmatprep.mubr.msk.bf16.mxu0 %vm2189_vm1, %v2188_v3  ;;  %v1714_v5 = vld [vmem:[%s2598_s2] ss:$0 sm:$0xff] }
  0x4a   : > { %1956 = vmatprep.subr.bf16.mxu0 %v2188_v3  ;;  %1874 = vmatprep.mubr.msk.bf16.mxu1 %vm2189_vm1, %v2188_v3 }
  0x4b   : > { %1878 = vmatprep.subr.bf16.mxu1 %v2188_v3 }
  0x53   : > { %1953 = vmatmul.mubr.msk.bf16.vlgmr.msra.gmra.mrb[0].mxu0 %vm222_vm3, %v1153_v12 }
  0x54   : > { %1957 = vmatpush3.bf16.msra.mxu0 %v1211_v15  ;;  %1875 = vmatmul.mubr.msk.bf16.vlgmr.msra.gmra.mrb[0].mxu1 %vm222_vm3, %v478_v14 }
  0x55   : > { %1879 = vmatpush3.bf16.msra.mxu1 %v536_v16  ;;  %1958 = vmatprep.mubr.msk.bf16.mxu0 %vm2189_vm1, %v2188_v3 }
  0x56   : > { %1962 = vmatprep.subr.bf16.mxu0 %v2188_v3  ;;  %1880 = vmatprep.mubr.msk.bf16.mxu1 %vm2189_vm1, %v2188_v3 }
  0x57   : > { %1884 = vmatprep.subr.bf16.mxu1 %v2188_v3 }
  0x5f   : > { %1959 = vmatmul.mubr.msk.bf16.vlgmr.msra.gmra.mrb[0].mxu0 %vm222_vm3, %v1204_v20 }
  0x60   : > { %1963 = vmatpush3.bf16.msra.mxu0 %v1263_v24  ;;  %1881 = vmatmul.mubr.msk.bf16.vlgmr.msra.gmra.mrb[0].mxu1 %vm222_vm3, %v529_v22 }
  0x61   : > { %1885 = vmatpush3.bf16.msra.mxu1 %v587_v26  ;;  %1964 = vmatprep.mubr.msk.bf16.mxu0 %vm2189_vm1, %v2188_v3 }
  0x62   : > { %1968 = vmatprep.subr.bf16.mxu0 %v2188_v3  ;;  %1886 = vmatprep.mubr.msk.bf16.mxu1 %vm2189_vm1, %v2188_v3 }
  0x63   : > { %1890 = vmatprep.subr.bf16.mxu1 %v2188_v3 }
  0x6b   : > { %1965 = vmatmul.mubr.msk.bf16.vlgmr.msra.gmra.mrb[0].mxu0 %vm222_vm3, %v1256_v28 }
  0x6c   : > { %1969 = vmatpush3.bf16.msra.mxu0 %v1314_v32  ;;  %1887 = vmatmul.mubr.msk.bf16.vlgmr.msra.gmra.mrb[0].mxu1 %vm222_vm3, %v580_v31 }
  0x6d   : > { %1891 = vmatpush3.bf16.msra.mxu1 %v639_v34  ;;  %1970 = vmatprep.mubr.msk.bf16.mxu0 %vm2189_vm1, %v2188_v3 }
  0x6e   : > { %1974 = vmatprep.subr.bf16.mxu0 %v2188_v3  ;;  %1892 = vmatprep.mubr.msk.bf16.mxu1 %vm2189_vm1, %v2188_v3 }
  0x6f   : > { %1896 = vmatprep.subr.bf16.mxu1 %v2188_v3 }
  0x77   : > { %1971 = vmatmul.mubr.msk.bf16.vlgmr.msra.gmra.mrb[0].mxu0 %vm222_vm3, %v1307_v35 }
  0x78   : > { %1975 = vmatpush3.bf16.msra.mxu0 %v1365_v42  ;;  %1893 = vmatmul.mubr.msk.bf16.vlgmr.msra.gmra.mrb[0].mxu1 %vm222_vm3, %v632_v41 }
  0x79   : > { %1897 = vmatpush3.bf16.msra.mxu1 %v694_v43  ;;  %1976 = vmatprep.mubr.msk.bf16.mxu0 %vm2189_vm1, %v2188_v3 }
  0x7a   : > { %1980 = vmatprep.subr.bf16.mxu0 %v2188_v3  ;;  %1898 = vmatprep.mubr.msk.bf16.mxu1 %vm2189_vm1, %v2188_v3 }
  0x7b   : > { %1902 = vmatprep.subr.bf16.mxu1 %v2188_v3 }
  0x83   : > { %1977 = vmatmul.mubr.msk.bf16.vlgmr.msra.gmra.mrb[0].mxu0 %vm222_vm3, %v1358_v44 }
  0x84   : > { %1981 = vmatpush3.bf16.msra.mxu0 %v1417_v48  ;;  %1899 = vmatmul.mubr.msk.bf16.vlgmr.msra.gmra.mrb[0].mxu1 %vm222_vm3, %v687_v47 }
  0x85   : > { %1903 = vmatpush3.bf16.msra.mxu1 %v745_v49  ;;  %1982 = vmatprep.mubr.msk.bf16.mxu0 %vm2189_vm1, %v2188_v3 }
  0x86   : > { %1986 = vmatprep.subr.bf16.mxu0 %v2188_v3  ;;  %1904 = vmatprep.mubr.msk.bf16.mxu1 %vm2189_vm1, %v2188_v3 }
  0x87   : > { %1908 = vmatprep.subr.bf16.mxu1 %v2188_v3 }
  0x8f   : > { %1983 = vmatmul.mubr.msk.bf16.vlgmr.msra.gmra.mrb[0].mxu0 %vm222_vm3, %v1410_v51 }
  0x90   : > { %1987 = vmatpush3.bf16.msra.mxu0 %v1468_v54  ;;  %1905 = vmatmul.mubr.msk.bf16.vlgmr.msra.gmra.mrb[0].mxu1 %vm222_vm3, %v738_v53 }
  0x91   : > { %1909 = vmatpush3.bf16.msra.mxu1 %v797_v55  ;;  %1988 = vmatprep.mubr.msk.bf16.mxu0 %vm2189_vm1, %v2188_v3 }
  0x92   : > { %1992 = vmatprep.subr.bf16.mxu0 %v2188_v3  ;;  %1910 = vmatprep.mubr.msk.bf16.mxu1 %vm2189_vm1, %v2188_v3 }
  0x93   : > { %1914 = vmatprep.subr.bf16.mxu1 %v2188_v3 }
  0x9b   : > { %1989 = vmatmul.mubr.msk.bf16.vlgmr.msra.gmra.mrb[0].mxu0 %vm222_vm3, %v1461_v56 }
  0x9c   : > { %1993 = vmatpush3.bf16.msra.mxu0 %v1519_v59  ;;  %1911 = vmatmul.mubr.msk.bf16.vlgmr.msra.gmra.mrb[0].mxu1 %vm222_vm3, %v790_v58 }
  0x9d   : > { %1915 = vmatpush3.bf16.msra.mxu1 %v848_v60  ;;  %1994 = vmatprep.mubr.msk.bf16.mxu0 %vm2189_vm1, %v2188_v3 }
  0x9e   : > { %1998 = vmatprep.subr.bf16.mxu0 %v2188_v3  ;;  %1916 = vmatprep.mubr.msk.bf16.mxu1 %vm2189_vm1, %v2188_v3 }
  0xa7   : > { %1995 = vmatmul.mubr.msk.bf16.vlgmr.msra.gmra.mrb[0].mxu0 %vm222_vm3, %v1512_v61 }
  0xa8   : > { %1999 = vmatpush3.bf16.msra.mxu0 %v1571_v63  ;;  %1917 = vmatmul.mubr.msk.bf16.vlgmr.msra.gmra.mrb[0].mxu1 %vm222_vm3, %v841_v62 }
  0xa9   : > { %2000 = vmatprep.mubr.msk.bf16.mxu0 %vm2189_vm1, %v2188_v3 }
  0xb3   : > { %2001 = vmatmul.mubr.msk.bf16.vlgmr.msra.gmra.mrb[0].mxu0 %vm222_vm3, %v1564_v0 }
 0x17b   : > { %v884_v1 = vpop.f32.mrb[0].mxu1 }
 0x17c   : > { %v1918_v2 = vpop.f32.mrb[1].mxu1  ;;  %v2004_v6 = vadd.f32 %v1714_v5, %v884_v1 }
 0x17d   : > { %v887_v4 = vpop.f32.mrb[2].mxu1 }
 0x17e   : > { %v1919_v40 = vpop.f32.mrb[3].mxu1 }
 0x186   : > { %v1607_v3 = vpop.f32.mrb[0].mxu0 }
 0x187   : > { %v2005_v7 = vadd.f32 %v2004_v6, %v1607_v3  ;;  %v2002_v8 = vpop.f32.mrb[1].mxu0 }
 0x188   : > { %v1610_v46 = vpop.f32.mrb[2].mxu0 }
 0x189   : > { %v1614_v10 = vmax.f32 %v2005_v7, 0.0  ;;  %v2003_v11 = vpop.f32.mrb[3].mxu0 }
 0x18b   : > { %1616 = vst.msk [vmem:[%s190_s27] sm:$0xf] %vm1615_vm5, %v1614_v10 }
 0x18c PF: > { %s13_s16 = sadd.s32 1, %s2186_s16   ;;  %s2604_s12 = smov %s2178_s14 }
 0x18d   : > { %p10_p7 = scmp.ge.s32.totalorder %s13_s16, 6   ;;  %s2605_s13 = smov %s2182_s15 }
 0x18e   : > { %s2606_s14 = smov %s2609_s17  ;;  %s2607_s15 = smov %s2613_s18 }
 0x18f   :  { %12 = sbr.rel (!%p10_p7) target bundleno = 3 (0x3), region = 91 }

// kernel: _lambda_.13
= control target key start
LH: loop header
LB: loop body
LE: loop exit
PB: predicated region body
PF: predicated region fallthrough
CT: control target
= control target key end

     0   :  { %s2539_s18 = smov 0   ;;  %s2541_s19 = smov 0   ;;  %s3060_s0 = inlined_call_operand.vmem [shape: f32[2,6,26,8], index: 0, kind: input, shape index: {}]   ;;  %s3061_s1 = inlined_call_operand.vmem [shape: bf16[27,8,64], index: 1, kind: input, shape index: {}]   ;;  %s3062_s2 = inlined_call_operand.vmem [shape: f32[1,64], index: 2, kind: input, shape index: {}]   ;;  %s3063_s3 = inlined_call_operand.vmem [shape: bf16[64,8], index: 3, kind: input, shape index: {}]   ;;  %s3064_s4 = inlined_call_operand.vmem [shape: f32[1,8], index: 4, kind: input, shape index: {}]   ;;  %s3065_s5 = inlined_call_operand.vmem [shape: f32[2,4,16,8], index: 5, kind: output, shape index: {}]  }
   0x1   :  { %s2543_s20 = smov 0   ;;  %s2545_s21 = smov 0  }
   0x2   :  { %s2547_s22 = smov 0  }
   0x3 LB: > { %s24_s23 = sadd.s32 1, %s2497_s20  ;;  %s27_s24 = sadd.s32 1, %s2501_s21  ;;  %s2505_s22 = sphi %s2547_s22, %s15_s22   ;;  %s2501_s21 = sphi %s2545_s21, %s3077_s21   ;;  %s2497_s20 = sphi %s2543_s20, %s3076_s20   ;;  %s2493_s19 = sphi %s2541_s19, %s3075_s19   ;;  %s2489_s18 = sphi %s2539_s18, %s3074_s18  }
   0x4   : > { %p25_p0 = scmp.ge.s32.totalorder %s24_s23, 4  ;;  %p1977_p1 = scmp.ge.s32.totalorder %s2505_s22, 1 }
   0x5   : > { %p201_p2 = scmp.lt.s32.totalorder %s2505_s22, 9 }
   0x6   : > { %s3079_s23 = smov (%p25_p0, %s24_s23), 0  ;;  %s3081_s24 = smov (!%p25_p0, %s27_s24), %s2501_s21 }
   0x7   : > { %p202_p3 = pnand %p1977_p1, %p201_p2  ;;  %p29_p4 = scmp.ge.s32.totalorder %s3081_s24, 2 }
   0x8   : > { %vm299_vm0 = vcmask (!%p202_p3), 1043456   ;;  %v2016_v0 = vld [vmem:[%s3061_s1 + $0x30] sm:$0xf] (!%p202_p3)  ;;  %v294_v1 = vld [vmem:[%s3061_s1] sm:$0xf] (!%p202_p3)  ;;  %v248_v2 = vlaneseq (!%p202_p3)  ;;  %v2507_v3 = vmov (!%p202_p3), 0.0  }
   0x9   : > { %s3083_s24 = smov (%p29_p4, %s3081_s24), 0  ;;  %205 = sbr.rel (%p202_p3) target bundleno = 631 (0x277), region = 40 }
   0xa   : > { %2214 = vmatprep.subr.bf16.mxu0 (!%p202_p3), %v2507_v3  ;;  %2142 = vmatprep.subr.bf16.mxu1 (!%p202_p3), %v2507_v3  ;;  %v968_v4 = vsel (!%p202_p3), %vm299_vm0, %v2016_v0, 0  ;;  %v301_v5 = vsel (!%p202_p3), %vm299_vm0, %v294_v1, 0  ;;  %p233_p5 = scmp.lt.s32.totalorder (!%p202_p3), %s2493_s19, 1  ;;  %v249_v6 = vshrl.u32 (!%p202_p3), %v248_v2, 7  ;;  %vm2508_vm1 = vmmov (!%p202_p3), 0   ;;  %s1983_s30 = sshll.u32 (!%p202_p3), %s2489_s18, 5 }
   0xb   : > { %2215 = vmatpush3.bf16.msra.mxu0 (!%p202_p3), %v968_v4  ;;  %2143 = vmatpush3.bf16.msra.mxu1 (!%p202_p3), %v301_v5  ;;  %v2020_v12 = vld [vmem:[%s3061_s1 + $0x34] sm:$0xf] (!%p202_p3)  ;;  %v1985_v13 = vld [vmem:[%s3061_s1 + $0x4] sm:$0xf] (!%p202_p3)  ;;  %vm295_vm4 = vcmask (!%p202_p3), 64512   ;;  %vm1832_vm7 = vcmask (!%p202_p3), 523264  }
   0xc   : > { %2144 = vmatprep.mubr.msk.bf16.mxu1 (!%p202_p3), %vm2508_vm1, %v2507_v3  ;;  %2216 = vmatprep.mubr.msk.bf16.mxu0 (!%p202_p3), %vm2508_vm1, %v2507_v3  ;;  %v250_v7 = vadd.s32 (!%p202_p3), 8, %v249_v6  ;;  %v255_v8 = vand.u32 (!%p202_p3), 3, %v249_v6  ;;  %v355_v23 = vsel (!%p202_p3), %vm299_vm0, %v1985_v13, 0  ;;  %v1022_v26 = vsel (!%p202_p3), %vm299_vm0, %v2020_v12, 0  ;;  %v1987_v43 = vld [vmem:[%s3061_s1 + $0x8] sm:$0xf] (!%p202_p3) }
   0xd   : > { %2220 = vmatprep.subr.bf16.mxu0 (!%p202_p3), %v2507_v3  ;;  %2148 = vmatprep.subr.bf16.mxu1 (!%p202_p3), %v2507_v3  ;;  %v2024_v49 = vld [vmem:[%s3061_s1 + $0x38] sm:$0xf] (!%p202_p3)  ;;  %v411_v56 = vsel (!%p202_p3), %vm299_vm0, %v1987_v43, 0  ;;  %v2032_v10 = vld [vmem:[%s3061_s1 + $0x40] sm:$0xf] (!%p202_p3)  ;;  %p240_p6 = scmp.lt.s32.totalorder (!%p202_p3), %s2489_s18, 3 }
   0xe   : > { %v262_v9 = vand.u32 (!%p202_p3), 3, %v250_v7  ;;  %vm2598_vm2 = vcmp.ne.s32.totalorder (!%p202_p3), %v255_v8, 0  ;;  %vm2632_vm5 = vcmp.ne.s32.totalorder (!%p202_p3), %v255_v8, 3  ;;  %v1078_v61 = vsel (!%p202_p3), %vm299_vm0, %v2024_v49, 0  ;;  %v1997_v27 = vld [vmem:[%s3061_s1 + $0x1c] sm:$0xf] (!%p202_p3) }
   0xf   : > { %v2045_v47 = vld [vmem:[%s3061_s1 + $0x4c] sm:$0xf] (!%p202_p3) }
  0x10   : > { %s3085_s19 = smov (!%p233_p5, %s2493_s19), 1  ;;  %vm2602_vm3 = vcmp.ne.s32.totalorder %v262_v9, 0  ;;  %vm2684_vm6 = vcmp.ne.s32.totalorder %v262_v9, 3  ;;  %s3087_s18 = smov (!%p240_p6, %s2489_s18), 3 }
  0x11   : > { %s2420_s29 = smul.u32 192, %s3085_s19  ;;  %s1979_s25 = sshll.u32 %s3087_s18, 1 }
  0x12   : > { %s1980_s26 = sshll.u32 %s3085_s19, 3 }
  0x13   : > { %s237_s8 = scalar_lea.vmem %s3060_s0, %s2420_s29 }
  0x14   : > { %s2606_s9 = scalar_lea.vmem %s237_s8, %s1983_s30 }
  0x15   : > { %v289_v14 = vld [vmem:[%s2606_s9] sm:$0xff]  ;;  %v290_v15 = vld [vmem:[%s2606_s9 + $0x8] sm:$0xff]  ;;  %v623_v32 = vld [vmem:[%s2606_s9 + $0x10] sm:$0xff] }
  0x16   : > { %v2014_v16 = vld [vmem:[%s2606_s9 + $0x24] sm:$0xff]  ;;  %v291_v17 = vsel %vm2598_vm2, %v289_v14, 0.0  ;;  %v292_v18 = vsel %vm2602_vm3, %v290_v15, 0.0  ;;  %v2015_v19 = vld [vmem:[%s2606_s9 + $0x2c] sm:$0xff]  ;;  %v624_v24 = vsel %vm2598_vm2, %v290_v15, 0.0  ;;  %v625_v34 = vsel %vm2602_vm3, %v623_v32, 0.0 }
  0x17   : > { %v959_v20 = vsel %vm2598_vm2, %v2014_v16, 0.0  ;;  %v293_v21 = vpack.c.bf16 %v292_v18, %v291_v17  ;;  %v960_v22 = vsel %vm2602_vm3, %v2015_v19, 0.0  ;;  %v2639_v28 = vld [vmem:[%s2606_s9 + $0xa] sm:$0xff]  ;;  %v346_v30 = vld [vmem:[%s2606_s9 + $0x1] sm:$0xff]  ;;  %v2664_v39 = vpack.c.bf16 %v625_v34, %v624_v24  ;;  %v733_v50 = vld [vmem:[%s2606_s9 + $0x12] sm:$0xff] }
  0x18   : > { %v961_v25 = vpack.c.bf16 %v960_v22, %v959_v20  ;;  %v734_v29 = vsel %vm2632_vm5, %v2639_v28, 0.0  ;;  %v2649_v31 = vld [vmem:[%s2606_s9 + $0x9] sm:$0xff]  ;;  %v2039_v35 = vld [vmem:[%s2606_s9 + $0x40] sm:$0xff]  ;;  %v2672_v42 = vld [vmem:[%s2606_s9 + $0x11] sm:$0xff]  ;;  %v735_v52 = vsel %vm2684_vm6, %v733_v50, 0.0 }
  0x19   : > { %2145 = vmatmul.mubr.msk.bf16.vlgmr.msra.gmra.mrb[0].mxu1 %vm295_vm4, %v293_v21  ;;  %v2018_v33 = vld [vmem:[%s2606_s9 + $0x25] sm:$0xff]  ;;  %v2019_v37 = vld [vmem:[%s2606_s9 + $0x2d] sm:$0xff]  ;;  %v1294_v40 = vsel %vm2598_vm2, %v2039_v35, 0.0  ;;  %v680_v45 = vpack.c.bf16 %v2672_v42, %v2649_v31  ;;  %v348_v48 = vpack.c.bf16 %v2649_v31, %v346_v30  ;;  %v2704_v58 = vpack.c.bf16 %v735_v52, %v734_v29 }
  0x1a   : > { %2217 = vmatmul.mubr.msk.bf16.vlgmr.msra.gmra.mrb[0].mxu0 %vm295_vm4, %v961_v25  ;;  %2149 = vmatpush3.bf16.msra.mxu1 %v355_v23  ;;  %v2658_v36 = vld [vmem:[%s2606_s9 + $0x48] sm:$0xff]  ;;  %v1015_v51 = vpack.c.bf16 %v2019_v37, %v2018_v33  ;;  %v2002_v55 = vld [vmem:[%s2606_s9 + $0x20] sm:$0xff]  ;;  %v2064_v24 = vld [vmem:[%s2606_s9 + $0x50] sm:$0xff] }
  0x1b   : > { %2221 = vmatpush3.bf16.msra.mxu0 %v1022_v26  ;;  %2150 = vmatprep.mubr.msk.bf16.mxu1 %vm2508_vm1, %v2507_v3  ;;  %v2662_v38 = vld [vmem:[%s2606_s9 + $0x28] sm:$0xff]  ;;  %v1295_v41 = vsel %vm2602_vm3, %v2658_v36, 0.0  ;;  %v793_v63 = vsel %vm2598_vm2, %v2002_v55, 0.0  ;;  %v1626_v25 = vsel %vm2598_vm2, %v2658_v36, 0.0  ;;  %v403_v26 = vsel %vm2684_vm6, %v2639_v28, 0.0  ;;  %v2785_v36 = vld [vmem:[%s2606_s9 + $0x51] sm:$0xff] }
  0x1c   : > { %2222 = vmatprep.mubr.msk.bf16.mxu0 %vm2508_vm1, %v2507_v3  ;;  %2226 = vmatprep.subr.bf16.mxu0 %v2507_v3  ;;  %v2677_v44 = vpack.c.bf16 %v1295_v41, %v1294_v40  ;;  %v794_v46 = vsel %vm2602_vm3, %v2662_v38, 0.0  ;;  %v2047_v53 = vld [vmem:[%s2606_s9 + $0x42] sm:$0xff]  ;;  %v2697_v54 = vld [vmem:[%s2606_s9 + $0x4a] sm:$0xff]  ;;  %v1627_v33 = vsel %vm2602_vm3, %v2064_v24, 0.0  ;;  %v2028_v40 = vld [vmem:[%s3061_s1 + $0x3c] sm:$0xf] }
  0x1d   : > { %2154 = vmatprep.subr.bf16.mxu1 %v2507_v3  ;;  %v2702_v57 = vld [vmem:[%s2606_s9 + $0x29] sm:$0xff]  ;;  %v1404_v59 = vsel %vm2632_vm5, %v2047_v53, 0.0  ;;  %v1405_v60 = vsel %vm2684_vm6, %v2697_v54, 0.0  ;;  %v2719_v2 = vld [vmem:[%s2606_s9 + $0x21] sm:$0xff]  ;;  %v2722_v4 = vpack.c.bf16 %v794_v46, %v793_v63  ;;  %v2782_v28 = vpack.c.bf16 %v1627_v33, %v1626_v25  ;;  %v2053_v42 = vld [vmem:[%s3061_s1 + $0x54] sm:$0xf] }
  0x1e   : > { %v2712_v62 = vpack.c.bf16 %v1405_v60, %v1404_v59  ;;  %v2051_v0 = vld [vmem:[%s2606_s9 + $0x44] sm:$0xff]  ;;  %v2052_v1 = vld [vmem:[%s2606_s9 + $0x4c] sm:$0xff]  ;;  %v849_v7 = vpack.c.bf16 %v2702_v57, %v2719_v2  ;;  %v1125_v55 = vsel %vm2598_vm2, %v2662_v38, 0.0  ;;  %v1736_v60 = vsel %vm2632_vm5, %v2697_v54, 0.0 }
  0x1f   : > { %v1460_v5 = vsel %vm2598_vm2, %v2051_v0, 0.0  ;;  %v1461_v6 = vsel %vm2602_vm3, %v2052_v1, 0.0  ;;  %v400_v8 = vld [vmem:[%s2606_s9 + $0x2] sm:$0xff]  ;;  %v2733_v9 = vld [vmem:[%s2606_s9 + $0x2a] sm:$0xff]  ;;  %v2072_v59 = vld [vmem:[%s2606_s9 + $0x52] sm:$0xff]  ;;  %v1188_v1 = vsel %vm299_vm0, %v2032_v10, 0 }
  0x20   : > { %v2735_v12 = vpack.c.bf16 %v1461_v6, %v1460_v5  ;;  %v2022_v13 = vld [vmem:[%s2606_s9 + $0x26] sm:$0xff]  ;;  %v904_v15 = vsel %vm2684_vm6, %v2733_v9, 0.0  ;;  %v2023_v17 = vld [vmem:[%s2606_s9 + $0x2e] sm:$0xff]  ;;  %v402_v21 = vsel %vm2632_vm5, %v400_v8, 0.0  ;;  %v1737_v63 = vsel %vm2684_vm6, %v2072_v59, 0.0 }
  0x21   : > { %v2010_v14 = vld [vmem:[%s2606_s9 + $0x22] sm:$0xff]  ;;  %v2060_v19 = vld [vmem:[%s2606_s9 + $0x4e] sm:$0xff]  ;;  %v1069_v29 = vsel %vm2632_vm5, %v2022_v13, 0.0  ;;  %v1070_v34 = vsel %vm2684_vm6, %v2023_v17, 0.0  ;;  %v404_v37 = vpack.c.bf16 %v403_v26, %v402_v21  ;;  %v2826_v11 = vpack.c.bf16 %v1737_v63, %v1736_v60 }
  0x22   : > { %v2059_v16 = vld [vmem:[%s2606_s9 + $0x46] sm:$0xff]  ;;  %v903_v18 = vsel %vm2632_vm5, %v2010_v14, 0.0  ;;  %v1571_v23 = vsel %vm2684_vm6, %v2060_v19, 0.0  ;;  %v1071_v43 = vpack.c.bf16 %v1070_v34, %v1069_v29  ;;  %v2031_v8 = vld [vmem:[%s2606_s9 + $0x31] sm:$0xff]  ;;  %v1235_v25 = vsel %vm2632_vm5, %v2733_v9, 0.0 }
  0x23   : > { %v1570_v20 = vsel %vm2632_vm5, %v2059_v16, 0.0  ;;  %v2757_v22 = vpack.c.bf16 %v904_v15, %v903_v18  ;;  %v1989_v30 = vld [vmem:[%s3061_s1 + $0xc] sm:$0xf]  ;;  %v456_v49 = vld [vmem:[%s2606_s9 + $0x4] sm:$0xff]  ;;  %v1993_v13 = vld [vmem:[%s3061_s1 + $0x14] sm:$0xf]  ;;  %v1181_v16 = vpack.c.bf16 %v2031_v8, %v2702_v57 }
  0x24   : > { %v2773_v32 = vpack.c.bf16 %v1571_v23, %v1570_v20  ;;  %v2780_v35 = vld [vmem:[%s2606_s9 + $0x49] sm:$0xff]  ;;  %v467_v46 = vsel %vm299_vm0, %v1989_v30, 0  ;;  %v458_v52 = vsel %vm2598_vm2, %v456_v49, 0.0  ;;  %v2036_v15 = vld [vmem:[%s3061_s1 + $0x44] sm:$0xf]  ;;  %v577_v17 = vsel %vm299_vm0, %v1993_v13, 0 }
  0x25   : > { %2151 = vmatmul.mubr.msk.bf16.vlgmr.msra.gmra.mrb[0].mxu1 %vm295_vm4, %v348_v48  ;;  %v1682_v41 = vpack.c.bf16 %v2785_v36, %v2780_v35  ;;  %v1134_v48 = vsel %vm299_vm0, %v2028_v40, 0  ;;  %v457_v50 = vld [vmem:[%s2606_s9 + $0xc] sm:$0xff]  ;;  %v1244_v18 = vsel %vm299_vm0, %v2036_v15, 0  ;;  %v1995_v29 = vld [vmem:[%s3061_s1 + $0x18] sm:$0xf]  ;;  %v687_v9 = vsel %vm299_vm0, %v1997_v27, 0 }
  0x26   : > { %2223 = vmatmul.mubr.msk.bf16.vlgmr.msra.gmra.mrb[0].mxu0 %vm295_vm4, %v1015_v51  ;;  %2155 = vmatpush3.bf16.msra.mxu1 %v411_v56  ;;  %v2027_v51 = vld [vmem:[%s2606_s9 + $0x30] sm:$0xff]  ;;  %v459_v53 = vsel %vm2602_vm3, %v457_v50, 0.0  ;;  %v512_v5 = vld [vmem:[%s2606_s9 + $0x5] sm:$0xff]  ;;  %v2065_v57 = vld [vmem:[%s3061_s1 + $0x60] sm:$0xf] }
  0x27   : > { %2227 = vmatpush3.bf16.msra.mxu0 %v1078_v61  ;;  %2156 = vmatprep.mubr.msk.bf16.mxu1 %vm2508_vm1, %v2507_v3  ;;  %v1126_v56 = vsel %vm2602_vm3, %v2027_v51, 0.0  ;;  %v1991_v61 = vld [vmem:[%s3061_s1 + $0x10] sm:$0xf]  ;;  %v460_v0 = vpack.c.bf16 %v459_v53, %v458_v52  ;;  %v566_v19 = vld [vmem:[%s2606_s9 + $0x6] sm:$0xff]  ;;  %v1469_v51 = vsel %vm299_vm0, %v2053_v42, 0  ;;  %v1635_v2 = vsel %vm299_vm0, %v2065_v57, 0 }
  0x28   : > { %2228 = vmatprep.mubr.msk.bf16.mxu0 %vm2508_vm1, %v2507_v3  ;;  %2232 = vmatprep.subr.bf16.mxu0 %v2507_v3  ;;  %v1127_v38 = vpack.c.bf16 %v1126_v56, %v1125_v55  ;;  %v521_v54 = vsel %vm299_vm0, %v1991_v61, 0  ;;  %v513_v6 = vld [vmem:[%s2606_s9 + $0xd] sm:$0xff]  ;;  %v568_v23 = vsel %vm2632_vm5, %v566_v19, 0.0  ;;  %v2041_v33 = vld [vmem:[%s3061_s1 + $0x48] sm:$0xf]  ;;  %v2466_v36 = vld [vmem:[%s3063_s3 + $0x18] sm:$0xff]  }
  0x29   : > { %2160 = vmatprep.subr.bf16.mxu1 %v2507_v3  ;;  %v514_v14 = vpack.c.bf16 %v513_v6, %v512_v5  ;;  %v567_v20 = vld [vmem:[%s2606_s9 + $0xe] sm:$0xff]  ;;  %v1303_v40 = vsel %vm299_vm0, %v2041_v33, 0  ;;  %v2004_v31 = vld [vmem:[%s3061_s1 + $0x24] sm:$0xf]  ;;  %v2075_v19 = vld [vmem:[%s3064_s4] ss:$0 sm:$0xff] }
  0x2a   : > { %v2035_v21 = vld [vmem:[%s2606_s9 + $0x32] sm:$0xff]  ;;  %v569_v24 = vsel %vm2684_vm6, %v567_v20, 0.0  ;;  %v2055_v55 = vld [vmem:[%s2606_s9 + $0x45] sm:$0xff] }
  0x2b   : > { %v1236_v26 = vsel %vm2684_vm6, %v2035_v21, 0.0  ;;  %v570_v30 = vpack.c.bf16 %v569_v24, %v568_v23  ;;  %v2056_v56 = vld [vmem:[%s2606_s9 + $0x4d] sm:$0xff] }
  0x2c   : > { %v1237_v34 = vpack.c.bf16 %v1236_v26, %v1235_v25  ;;  %v1516_v59 = vpack.c.bf16 %v2056_v56, %v2055_v55 }
  0x31   : > { %2157 = vmatmul.mubr.msk.bf16.vlgmr.msra.gmra.mrb[0].mxu1 %vm295_vm4, %v404_v37  ;;  %v633_v37 = vsel %vm299_vm0, %v1995_v29, 0 }
  0x32   : > { %2229 = vmatmul.mubr.msk.bf16.vlgmr.msra.gmra.mrb[0].mxu0 %vm295_vm4, %v1071_v43  ;;  %2161 = vmatpush3.bf16.msra.mxu1 %v467_v46  ;;  %v1357_v43 = vsel %vm299_vm0, %v2045_v47, 0  ;;  %v2043_v46 = vld [vmem:[%s2606_s9 + $0x41] sm:$0xff]  ;;  %s244_s9 = sadd.s32 %s1980_s26, %s1979_s25 }
  0x33   : > { %2233 = vmatpush3.bf16.msra.mxu0 %v1134_v48  ;;  %2162 = vmatprep.mubr.msk.bf16.mxu1 %vm2508_vm1, %v2507_v3  ;;  %v1350_v48 = vpack.c.bf16 %v2780_v35, %v2043_v46  ;;  %v2465_v35 = vld [vmem:[%s3063_s3 + $0x10] sm:$0xff]   ;;  %s1981_s27 = sshll.u32 %s244_s9, 3 }
  0x34   : > { %2234 = vmatprep.mubr.msk.bf16.mxu0 %vm2508_vm1, %v2507_v3  ;;  %2238 = vmatprep.subr.bf16.mxu0 %v2507_v3  ;;  %s246_s7 = scalar_lea.vmem %s3065_s5, %s1981_s27 }
  0x35   : > { %2166 = vmatprep.subr.bf16.mxu1 %v2507_v3 }
  0x3d   : > { %2163 = vmatmul.mubr.msk.bf16.vlgmr.msra.gmra.mrb[0].mxu1 %vm295_vm4, %v460_v0  ;;  %v2464_v0 = vld [vmem:[%s3063_s3 + $0x8] sm:$0xff]  }
  0x3e   : > { %2235 = vmatmul.mubr.msk.bf16.vlgmr.msra.gmra.mrb[0].mxu0 %vm295_vm4, %v1127_v38  ;;  %2167 = vmatpush3.bf16.msra.mxu1 %v521_v54  ;;  %v1982_v54 = vld [vmem:[%s3062_s2] ss:$0 sm:$0xff] }
  0x3f   : > { %2239 = vmatpush3.bf16.msra.mxu0 %v1188_v1  ;;  %2168 = vmatprep.mubr.msk.bf16.mxu1 %vm2508_vm1, %v2507_v3 }
  0x40   : > { %2240 = vmatprep.mubr.msk.bf16.mxu0 %vm2508_vm1, %v2507_v3  ;;  %2244 = vmatprep.subr.bf16.mxu0 %v2507_v3 }
  0x41   : > { %2172 = vmatprep.subr.bf16.mxu1 %v2507_v3 }
  0x49   : > { %2169 = vmatmul.mubr.msk.bf16.vlgmr.msra.gmra.mrb[0].mxu1 %vm295_vm4, %v514_v14 }
  0x4a   : > { %2241 = vmatmul.mubr.msk.bf16.vlgmr.msra.gmra.mrb[0].mxu0 %vm295_vm4, %v1181_v16  ;;  %2173 = vmatpush3.bf16.msra.mxu1 %v577_v17 }
  0x4b   : > { %2245 = vmatpush3.bf16.msra.mxu0 %v1244_v18  ;;  %2174 = vmatprep.mubr.msk.bf16.mxu1 %vm2508_vm1, %v2507_v3 }
  0x4c   : > { %2246 = vmatprep.mubr.msk.bf16.mxu0 %vm2508_vm1, %v2507_v3  ;;  %2250 = vmatprep.subr.bf16.mxu0 %v2507_v3 }
  0x4d   : > { %2178 = vmatprep.subr.bf16.mxu1 %v2507_v3 }
  0x55   : > { %2175 = vmatmul.mubr.msk.bf16.vlgmr.msra.gmra.mrb[0].mxu1 %vm295_vm4, %v570_v30 }
  0x56   : > { %2247 = vmatmul.mubr.msk.bf16.vlgmr.msra.gmra.mrb[0].mxu0 %vm295_vm4, %v1237_v34  ;;  %2179 = vmatpush3.bf16.msra.mxu1 %v633_v37 }
  0x57   : > { %2251 = vmatpush3.bf16.msra.mxu0 %v1303_v40  ;;  %2180 = vmatprep.mubr.msk.bf16.mxu1 %vm2508_vm1, %v2507_v3 }
  0x58   : > { %2252 = vmatprep.mubr.msk.bf16.mxu0 %vm2508_vm1, %v2507_v3  ;;  %2256 = vmatprep.subr.bf16.mxu0 %v2507_v3 }
  0x59   : > { %2184 = vmatprep.subr.bf16.mxu1 %v2507_v3 }
  0x61   : > { %2181 = vmatmul.mubr.msk.bf16.vlgmr.msra.gmra.mrb[0].mxu1 %vm295_vm4, %v2664_v39  ;;  %v1999_v39 = vld [vmem:[%s3061_s1 + $0x20] sm:$0xf] }
  0x62   : > { %2253 = vmatmul.mubr.msk.bf16.vlgmr.msra.gmra.mrb[0].mxu0 %vm295_vm4, %v2677_v44  ;;  %2185 = vmatpush3.bf16.msra.mxu1 %v687_v9  ;;  %v2049_v44 = vld [vmem:[%s3061_s1 + $0x50] sm:$0xf]  ;;  %v743_v49 = vsel %vm299_vm0, %v1999_v39, 0 }
  0x63   : > { %2257 = vmatpush3.bf16.msra.mxu0 %v1357_v43  ;;  %2186 = vmatprep.mubr.msk.bf16.mxu1 %vm2508_vm1, %v2507_v3  ;;  %v1413_v50 = vsel %vm299_vm0, %v2049_v44, 0 }
  0x64   : > { %2258 = vmatprep.mubr.msk.bf16.mxu0 %vm2508_vm1, %v2507_v3  ;;  %2262 = vmatprep.subr.bf16.mxu0 %v2507_v3 }
  0x65   : > { %2190 = vmatprep.subr.bf16.mxu1 %v2507_v3 }
  0x6d   : > { %2187 = vmatmul.mubr.msk.bf16.vlgmr.msra.gmra.mrb[0].mxu1 %vm295_vm4, %v680_v45  ;;  %v802_v45 = vsel %vm299_vm0, %v2004_v31, 0 }
  0x6e   : > { %2259 = vmatmul.mubr.msk.bf16.vlgmr.msra.gmra.mrb[0].mxu0 %vm295_vm4, %v1350_v48  ;;  %2191 = vmatpush3.bf16.msra.mxu1 %v743_v49 }
  0x6f   : > { %2263 = vmatpush3.bf16.msra.mxu0 %v1413_v50  ;;  %2192 = vmatprep.mubr.msk.bf16.mxu1 %vm2508_vm1, %v2507_v3 }
  0x70   : > { %2264 = vmatprep.mubr.msk.bf16.mxu0 %vm2508_vm1, %v2507_v3  ;;  %2268 = vmatprep.subr.bf16.mxu0 %v2507_v3 }
  0x71   : > { %2196 = vmatprep.subr.bf16.mxu1 %v2507_v3 }
  0x79   : > { %2193 = vmatmul.mubr.msk.bf16.vlgmr.msra.gmra.mrb[0].mxu1 %vm295_vm4, %v2704_v58  ;;  %v2008_v58 = vld [vmem:[%s3061_s1 + $0x28] sm:$0xf] }
  0x7a   : > { %2265 = vmatmul.mubr.msk.bf16.vlgmr.msra.gmra.mrb[0].mxu0 %vm295_vm4, %v2712_v62  ;;  %2197 = vmatpush3.bf16.msra.mxu1 %v802_v45  ;;  %v2057_v62 = vld [vmem:[%s3061_s1 + $0x58] sm:$0xf]  ;;  %v856_v52 = vsel %vm299_vm0, %v2008_v58, 0 }
  0x7b   : > { %2269 = vmatpush3.bf16.msra.mxu0 %v1469_v51  ;;  %2198 = vmatprep.mubr.msk.bf16.mxu1 %vm2508_vm1, %v2507_v3  ;;  %v1523_v53 = vsel %vm299_vm0, %v2057_v62, 0 }
  0x7c   : > { %2270 = vmatprep.mubr.msk.bf16.mxu0 %vm2508_vm1, %v2507_v3  ;;  %2274 = vmatprep.subr.bf16.mxu0 %v2507_v3 }
  0x7d   : > { %2202 = vmatprep.subr.bf16.mxu1 %v2507_v3 }
  0x85   : > { %2199 = vmatmul.mubr.msk.bf16.vlgmr.msra.gmra.mrb[0].mxu1 %vm295_vm4, %v2722_v4  ;;  %v2012_v4 = vld [vmem:[%s3061_s1 + $0x2c] sm:$0xf] }
  0x86   : > { %2271 = vmatmul.mubr.msk.bf16.vlgmr.msra.gmra.mrb[0].mxu0 %vm295_vm4, %v2735_v12  ;;  %2203 = vmatpush3.bf16.msra.mxu1 %v856_v52  ;;  %v2061_v12 = vld [vmem:[%s3061_s1 + $0x5c] sm:$0xf]  ;;  %v912_v60 = vsel %vm299_vm0, %v2012_v4, 0 }
  0x87   : > { %2275 = vmatpush3.bf16.msra.mxu0 %v1523_v53  ;;  %2204 = vmatprep.mubr.msk.bf16.mxu1 %vm2508_vm1, %v2507_v3  ;;  %v1579_v61 = vsel %vm299_vm0, %v2061_v12, 0 }
  0x88   : > { %2276 = vmatprep.mubr.msk.bf16.mxu0 %vm2508_vm1, %v2507_v3  ;;  %2280 = vmatprep.subr.bf16.mxu0 %v2507_v3 }
  0x89   : > { %2208 = vmatprep.subr.bf16.mxu1 %v2507_v3 }
  0x91   : > { %2205 = vmatmul.mubr.msk.bf16.vlgmr.msra.gmra.mrb[0].mxu1 %vm295_vm4, %v849_v7  ;;  %v2069_v7 = vld [vmem:[%s3061_s1 + $0x64] sm:$0xf] }
  0x92   : > { %2277 = vmatmul.mubr.msk.bf16.vlgmr.msra.gmra.mrb[0].mxu0 %vm295_vm4, %v1516_v59  ;;  %2209 = vmatpush3.bf16.msra.mxu1 %v912_v60  ;;  %v1689_v63 = vsel %vm299_vm0, %v2069_v7, 0 }
  0x93   : > { %2281 = vmatpush3.bf16.msra.mxu0 %v1579_v61  ;;  %2210 = vmatprep.mubr.msk.bf16.mxu1 %vm2508_vm1, %v2507_v3 }
  0x94   : > { %2282 = vmatprep.mubr.msk.bf16.mxu0 %vm2508_vm1, %v2507_v3  ;;  %2286 = vmatprep.subr.bf16.mxu0 %v2507_v3 }
  0x95   : > { %2304 = vmatprep.subr.bf16.mxu1 %v2507_v3 }
  0x9d   : > { %2211 = vmatmul.mubr.msk.bf16.vlgmr.msra.gmra.mrb[0].mxu1 %vm295_vm4, %v2757_v22  ;;  %v2073_v22 = vld [vmem:[%s3061_s1 + $0x68] sm:$0xf] }
  0x9e   : > { %2283 = vmatmul.mubr.msk.bf16.vlgmr.msra.gmra.mrb[0].mxu0 %vm295_vm4, %v2773_v32  ;;  %2312 = vmatprep.mubr.msk.bf16.mxu1 %vm2508_vm1, %v2507_v3  ;;  %v1745_v32 = vsel %vm299_vm0, %v2073_v22, 0 }
  0x9f   : > { %2287 = vmatpush3.bf16.msra.mxu0 %v1635_v2  ;;  %2288 = vmatprep.mubr.msk.bf16.mxu0 %vm2508_vm1, %v2507_v3 }
  0xa0   : > { %2292 = vmatprep.subr.bf16.mxu0 %v2507_v3 }
  0xaa   : > { %2289 = vmatmul.mubr.msk.bf16.vlgmr.msra.gmra.mrb[0].mxu0 %vm295_vm4, %v2782_v28  ;;  %v2463_v28 = vld [vmem:[%s3063_s3] sm:$0xff]  }
  0xab   : > { %2293 = vmatpush3.bf16.msra.mxu0 %v1689_v63  ;;  %2294 = vmatprep.mubr.msk.bf16.mxu0 %vm2508_vm1, %v2507_v3 }
  0xac   : > { %2298 = vmatprep.subr.bf16.mxu0 %v2507_v3  ;;  %2305 = vmatpush3.bf16.msra.mxu1 %v2463_v28 }
  0xad   : > { %2306 = vmatprep.subr.bf16.mxu1 %v2507_v3 }
  0xb0   : > { %2307 = vmatpush3.bf16.msra.mxu1 %v2464_v0 }
  0xb1   : > { %2308 = vmatprep.subr.bf16.mxu1 %v2507_v3 }
  0xb4   : > { %2309 = vmatpush3.bf16.msra.mxu1 %v2465_v35 }
  0xb5   : > { %2310 = vmatprep.subr.bf16.mxu1 %v2507_v3 }
  0xb6   : > { %2295 = vmatmul.mubr.msk.bf16.vlgmr.msra.gmra.mrb[0].mxu0 %vm295_vm4, %v1682_v41 }
  0xb7   : > { %2299 = vmatpush3.bf16.msra.mxu0 %v1745_v32  ;;  %2300 = vmatprep.mubr.msk.bf16.mxu0 %vm2508_vm1, %v2507_v3 }
  0xb8   : > { %2311 = vmatpush3.bf16.msra.mxu1 %v2466_v36 }
  0xc2   : > { %2301 = vmatmul.mubr.msk.bf16.vlgmr.msra.gmra.mrb[0].mxu0 %vm295_vm4, %v2826_v11 }
 0x170   : > { %v948_v41 = vpop.f32.mrb[0].mxu1 }
 0x171   : > { %v2212_v10 = vpop.f32.mrb[1].mxu1  ;;  %v2316_v1 = vadd.f32 %v1982_v54, %v948_v41 }
 0x172   : > { %v951_v11 = vpop.f32.mrb[2].mxu1 }
 0x173   : > { %v2213_v38 = vpop.f32.mrb[3].mxu1  ;;  %v2318_v6 = vadd.f32 %v1982_v54, %v951_v11 }
 0x195   : > { %v1781_v5 = vpop.f32.mrb[0].mxu0 }
 0x196   : > { %v2317_v3 = vadd.f32 %v2316_v1, %v1781_v5  ;;  %v2302_v8 = vpop.f32.mrb[1].mxu0 }
 0x197   : > { %v1784_v13 = vpop.f32.mrb[2].mxu0 }
 0x198   : > { %v2319_v14 = vadd.f32 %v2318_v6, %v1784_v13  ;;  %v2303_v15 = vpop.f32.mrb[3].mxu0  ;;  %v1790_v16 = vmax.f32 %v2317_v3, 0.0 }
 0x19a   : > { %v1791_v17 = vmax.f32 %v2319_v14, 0.0 }
 0x19c   : > { %v1792_v18 = vpack.c.bf16 %v1791_v17, %v1790_v16 }
 0x19e   : > { %2313 = vmatmul.mubr.msk.bf16.vlgmr.msra.gmra.mrb[4].mxu1 %vm1832_vm7, %v1792_v18 }
 0x271   : > { %v1870_v20 = vpop.f32.mrb[4].mxu1 }
 0x272   : > { %v1871_v21 = vadd.f32 %v2075_v19, %v1870_v20  ;;  %v2314_v23 = vpop.f32.mrb[5].mxu1 }
 0x273   : > { %v1873_v24 = vpop.f32.mrb[6].mxu1 }
 0x274   : > { %1877 = vst.msk [vmem:[%s246_s7] sm:$0xff] %vm295_vm4, %v1871_v21  ;;  %v1874_v25 = vadd.f32 %v2075_v19, %v1873_v24  ;;  %v2315_v26 = vpop.f32.mrb[7].mxu1 }
 0x276   : > { %1878 = vst.msk [vmem:[%s246_s7 + $0x8] sm:$0xff] %vm295_vm4, %v1874_v25 }
 0x277 PF: > { %s15_s22 = sadd.s32 1, %s2505_s22   ;;  %s3074_s18 = smov %s2497_s20 }
 0x278   : > { %p12_p7 = scmp.ge.s32.totalorder %s15_s22, 10   ;;  %s3075_s19 = smov %s2501_s21 }
 0x279   : > { %s3076_s20 = smov %s3079_s23  ;;  %s3077_s21 = smov %s3083_s24 }
 0x27a   :  { %14 = sbr.rel (!%p12_p7) target bundleno = 3 (0x3), region = 99 }

</bundles_post_ra>
